<compile_context>
chip_gen: v7x
topology: tpu7x:2x2x1
jax: 0.10.0
libtpu: 0.0.40
codegen_flags: <defaults>
</compile_context>

<pallas_src>
import functools

import jax
import jax.numpy as jnp
from jax import lax
from jax.experimental import pallas as pl
from jax.experimental.pallas import tpu as pltpu

LANE = 128      # channel width kept lane-dense (multiple of 128)
SUBLANE = 8


def _round_up(v, m):
    return (v + m - 1) // m * m


# ----------------------------------------------------------------------------
# Fused backbone kernel:
#   stem 3x3 -> b1 1x1 reduce -> b2 3x3 (in-VMEM halo conv) -> b3 1x1 expand
#   + f32 residual + ReLU + global average pool.   One image per grid step.
# ----------------------------------------------------------------------------
def _backbone_kernel(p0_ref, w0_ref, s0_ref, b0_ref,
                     w1_ref, s1_ref, b1_ref,
                     w2_ref, s2_ref, b2_ref,
                     w3_ref, s3_ref, b3_ref,
                     out_ref, pad_ref, *, H, W, PAD):
    HW = H * W
    C = out_ref.shape[-1]
    f32 = jnp.float32
    bf16 = jnp.bfloat16

    # ---- stem: 3x3 conv (im2col patches) + folded BN + ReLU -----------------
    h0 = jnp.dot(p0_ref[...], w0_ref[...], preferred_element_type=f32)
    h0 = jnp.maximum(h0 * s0_ref[...] + b0_ref[...], 0.0)          # (HW, C) f32
    # h0 is the residual; it stays in f32 and never leaves VMEM.

    # ---- b1: 1x1 reduce + BN + ReLU (fused; no extra launch / HBM trip) -----
    h1 = jnp.dot(h0.astype(bf16), w1_ref[...], preferred_element_type=f32)
    h1 = jnp.maximum(h1 * s1_ref[...] + b1_ref[...], 0.0)          # (HW, C) f32

    # ---- b2: 3x3 halo conv done entirely in VMEM ----------------------------
    # h1 (row index p = h*W + w) is placed into a zero-padded row buffer; each
    # of the nine taps is a row-shifted window of that buffer (zero fill handles
    # the H border; a cheap column mask handles the W wrap) fed to the MXU.
    zero_band = jnp.zeros((PAD, C), f32)
    pad_ref[0:PAD, :] = zero_band                      # top halo (aligned store)
    pad_ref[PAD + HW:2 * PAD + HW, :] = zero_band      # bottom halo
    pad_ref[PAD:PAD + HW, :] = h1                      # interior (aligned store)

    col = lax.broadcasted_iota(jnp.int32, (HW, C), 0) % W          # w coordinate
    acc = jnp.zeros((HW, C), f32)
    for t in range(9):                                  # unrolled at trace time
        di, dj = t // 3, t % 3
        off = (di - 1) * W + (dj - 1)
        tap = pad_ref[PAD + off:PAD + off + HW, :]      # (HW, C) f32 shifted view
        if dj == 0:                                     # needs w-1 >= 0
            tap = jnp.where(col >= 1, tap, 0.0)
        elif dj == 2:                                   # needs w+1 < W
            tap = jnp.where(col <= W - 2, tap, 0.0)
        acc = acc + jnp.dot(tap.astype(bf16), w2_ref[t],
                            preferred_element_type=f32)
    h2 = jnp.maximum(acc * s2_ref[...] + b2_ref[...], 0.0)         # (HW, C) f32

    # ---- b3: 1x1 expand + BN + residual (f32) + ReLU + fused GAP ------------
    h3 = jnp.dot(h2.astype(bf16), w3_ref[...], preferred_element_type=f32)
    h3 = jnp.maximum(h3 * s3_ref[...] + b3_ref[...] + h0, 0.0)
    pooled = jnp.sum(h3, axis=0, keepdims=True) * (1.0 / HW)       # (1, C) f32
    # Lane/sublane-dense store: broadcast the pooled row over 8 sublanes.
    out_ref[...] = jnp.broadcast_to(pooled, out_ref.shape).astype(out_ref.dtype)


# ----------------------------------------------------------------------------
# pallas_call wrapper
# ----------------------------------------------------------------------------
def _backbone_pallas(p0, stem, b1, b2, b3, *, B, H, W):
    HW = H * W
    K0p, C = stem["w"].shape
    assert C % LANE == 0
    # TODO(synk): at real ResNet sizes (HW=3136, C>=512) this one-image-per-step
    # block should become row-band tiles with halo-row DMAs and partial-sum GAP
    # accumulation (and tn/tk raised to 256 on v6e/v7x); trivially VMEM-resident
    # at these shapes (<1 MiB/step against a 32 MiB scoped budget).
    assert HW % SUBLANE == 0, HW
    PAD = _round_up(W + 1, SUBLANE)                 # aligned interior store

    kernel = functools.partial(_backbone_kernel, H=H, W=W, PAD=PAD)
    weight_args = (stem["w"], stem["scale"], stem["bias"],
                   b1["w"], b1["scale"], b1["bias"],
                   b2["w"], b2["scale"], b2["bias"],
                   b3["w"], b3["scale"], b3["bias"])

    flops = 2 * B * HW * C * (K0p + C + 9 * C + C)
    bytes_accessed = (p0.size * p0.dtype.itemsize
                      + sum(a.size * a.dtype.itemsize for a in weight_args)
                      + B * SUBLANE * C * 4)

    vec_spec = pl.BlockSpec((1, C), lambda b: (0, 0))
    in_specs = [
        pl.BlockSpec((HW, K0p), lambda b: (b, 0)),       # stem patches, per image
        pl.BlockSpec((K0p, C), lambda b: (0, 0)),        # w0
        vec_spec, vec_spec,                              # s0, b0
        pl.BlockSpec((C, C), lambda b: (0, 0)),          # w1
        vec_spec, vec_spec,                              # s1, b1
        pl.BlockSpec((9, C, C), lambda b: (0, 0, 0)),    # w2 (tap-major)
        vec_spec, vec_spec,                              # s2, b2
        pl.BlockSpec((C, C), lambda b: (0, 0)),          # w3
        vec_spec, vec_spec,                              # s3, b3
    ]

    out = pl.pallas_call(
        kernel,
        out_shape=jax.ShapeDtypeStruct((B * SUBLANE, C), jnp.float32),
        grid_spec=pltpu.PrefetchScalarGridSpec(
            num_scalar_prefetch=0,
            grid=(B,),
            in_specs=in_specs,
            out_specs=pl.BlockSpec((SUBLANE, C), lambda b: (b, 0)),
            scratch_shapes=[pltpu.VMEM((HW + 2 * PAD, C), jnp.float32)],
        ),
        compiler_params=pltpu.CompilerParams(
            # Megacore: shard images across TensorCores (2 TCs on v7x).
            dimension_semantics=("parallel",),
        ),
        cost_estimate=pl.CostEstimate(flops=int(flops), transcendentals=0,
                                      bytes_accessed=int(bytes_accessed)),
    )(p0, *weight_args)
    return out.reshape(B, SUBLANE, C)[:, 0, :]           # (B, C) f32


# ----------------------------------------------------------------------------
# Glue: stem im2col (3 input channels only -> negligible bytes), params
# ----------------------------------------------------------------------------
def _im2col_3x3(x):
    """(B, H, W, C) -> (B*H*W, 9*C) SAME-padding stride-1 patches (tap-major)."""
    B, H, W, C = x.shape
    xp = jnp.pad(x, ((0, 0), (1, 1), (1, 1), (0, 0)))
    cols = [xp[:, i:i + H, j:j + W, :] for i in range(3) for j in range(3)]
    return jnp.concatenate(cols, axis=-1).reshape(B * H * W, 9 * C)


def _stem_patches(x, k_pad):
    # TODO(synk): at real sizes fold the stem into the kernel too; with Cin=3
    # the 9x replication here is ~50 KB, so it stays wrapper-side.
    p = _im2col_3x3(x)
    k = p.shape[1]
    if k < k_pad:
        p = jnp.pad(p, ((0, 0), (0, k_pad - k)))
    return p.astype(jnp.bfloat16)


def _init_conv_bn(key, kh, kw, cin, cout, *, tap_major=False, k_align=1):
    """Conv weight laid out for matmul + folded-BN scale/bias (deterministic)."""
    assert cout % LANE == 0
    k_w, k_s, k_b = jax.random.split(key, 3)
    k_real = kh * kw * cin
    k_pad = _round_up(k_real, k_align)
    w = jax.random.normal(k_w, (k_real, cout), jnp.float32) / jnp.sqrt(k_real)
    w = jnp.pad(w, ((0, k_pad - k_real), (0, 0))).astype(jnp.bfloat16)
    if tap_major:
        assert k_pad == k_real
        w = w.reshape(kh * kw, cin, cout)
    scale = 1.0 + 0.1 * jax.random.normal(k_s, (1, cout), jnp.float32)
    bias = 0.1 * jax.random.normal(k_b, (1, cout), jnp.float32)
    return {"w": w, "scale": scale, "bias": bias}


def _forward(params, x_nchw):
    x = jnp.transpose(x_nchw, (0, 2, 3, 1)).astype(jnp.float32)    # NCHW -> NHWC
    B, H, W, _ = x.shape
    p0 = _stem_patches(x, params["stem"]["w"].shape[0])
    return _backbone_pallas(p0, params["stem"], params["b1"],
                            params["b2"], params["b3"], B=B, H=H, W=W)


_forward_jit = jax.jit(_forward)


def _reference_forward(params, x_nchw):
    """Pure-JAX reference with identical bf16 cast points (no Pallas)."""
    x = jnp.transpose(x_nchw, (0, 2, 3, 1)).astype(jnp.float32)
    B, H, W, _ = x.shape
    HW = H * W
    st, bl1, bl2, bl3 = (params[k] for k in ("stem", "b1", "b2", "b3"))
    C = st["w"].shape[1]

    def bn_relu(z, p):
        return jnp.maximum(z * p["scale"] + p["bias"], 0.0)

    p0 = _stem_patches(x, st["w"].shape[0])
    h0 = bn_relu(jnp.dot(p0, st["w"], preferred_element_type=jnp.float32), st)
    h1 = bn_relu(jnp.dot(h0.astype(jnp.bfloat16), bl1["w"],
                         preferred_element_type=jnp.float32), bl1)
    p2 = _im2col_3x3(h1.astype(jnp.bfloat16).reshape(B, H, W, C))
    w2_flat = bl2["w"].reshape(9 * C, C)
    h2 = bn_relu(jnp.dot(p2, w2_flat, preferred_element_type=jnp.float32), bl2)
    h3 = jnp.dot(h2.astype(jnp.bfloat16), bl3["w"],
                 preferred_element_type=jnp.float32)
    h3 = jnp.maximum(h3 * bl3["scale"] + bl3["bias"] + h0, 0.0)
    return h3.reshape(B, HW, C).mean(axis=1)


class FeatureExtractor:
    """JAX/Pallas analogue of the PyTorch FeatureExtractor (frozen backbone).

    TODO(synk): pretrained torchvision ResNet50 (2048-d features) is not
    reproducible without a checkpoint; deterministic 128-channel backbone here.
    """

    def __init__(self, key, in_ch=3, width=LANE):
        assert width % LANE == 0
        self.feature_dim = width
        k0, k1, k2, k3 = jax.random.split(key, 4)
        self.params = {
            "stem": _init_conv_bn(k0, 3, 3, in_ch, width, k_align=8),
            "b1": _init_conv_bn(k1, 1, 1, width, width),
            "b2": _init_conv_bn(k2, 3, 3, width, width, tap_major=True),
            "b3": _init_conv_bn(k3, 1, 1, width, width),
        }

    def __call__(self, x_nchw):
        return _forward_jit(self.params, x_nchw)


# ----------------------------------------------------------------------------
# Main
# ----------------------------------------------------------------------------
if __name__ == "__main__":
    key = jax.random.PRNGKey(0)
    k_params, k_x = jax.random.split(key)

    model = FeatureExtractor(k_params, in_ch=3, width=128)

    # Small image batch, NCHW like the PyTorch module expects.
    x = jax.random.normal(k_x, (2, 3, 16, 16), jnp.float32)

    feats = jax.block_until_ready(model(x))
    assert feats.shape == (2, model.feature_dim), feats.shape
    assert feats.dtype == jnp.float32
    assert bool(jnp.all(jnp.isfinite(feats)))

    # Correctness gate: pure-JAX reference with the same bf16 cast points;
    # remaining differences are MXU accumulation order only.
    ref = jax.block_until_ready(jax.jit(_reference_forward)(model.params, x))
    err = float(jnp.max(jnp.abs(feats - ref)))
    assert err < 5e-2, f"kernel vs reference mismatch: max abs err = {err}"

    print("KERNEL_OK")
</pallas_src>

<mosaic_0001>
module attributes {stable_mosaic.version = 11 : i64} {
  func.func @_backbone_kernel(%arg0: i32, %arg1: memref<256x32xbf16, #tpu.memory_space<vmem>>, %arg2: memref<32x128xbf16, #tpu.memory_space<vmem>>, %arg3: memref<1x128xf32, #tpu.memory_space<vmem>>, %arg4: memref<1x128xf32, #tpu.memory_space<vmem>>, %arg5: memref<128x128xbf16, #tpu.memory_space<vmem>>, %arg6: memref<1x128xf32, #tpu.memory_space<vmem>>, %arg7: memref<1x128xf32, #tpu.memory_space<vmem>>, %arg8: memref<9x128x128xbf16, #tpu.memory_space<vmem>>, %arg9: memref<1x128xf32, #tpu.memory_space<vmem>>, %arg10: memref<1x128xf32, #tpu.memory_space<vmem>>, %arg11: memref<128x128xbf16, #tpu.memory_space<vmem>>, %arg12: memref<1x128xf32, #tpu.memory_space<vmem>>, %arg13: memref<1x128xf32, #tpu.memory_space<vmem>>, %arg14: memref<8x128xf32, #tpu.memory_space<vmem>>, %arg15: memref<304x128xf32, #tpu.memory_space<vmem>>) attributes {dimension_semantics = [#tpu.dimension_semantics<parallel>], iteration_bounds = array<i64: 2>, scalar_prefetch = 0 : i64, scratch_operands = 1 : i64, tpu.core_type = #tpu.core_type<tc>, window_params = [{transform_indices = @transform_0, window_bounds = array<i64: 256, 32>}, {pipeline_mode = #tpu.pipeline_mode<synchronous>, transform_indices = @transform_1, window_bounds = array<i64: 32, 128>}, {pipeline_mode = #tpu.pipeline_mode<synchronous>, transform_indices = @transform_2, window_bounds = array<i64: 1, 128>}, {pipeline_mode = #tpu.pipeline_mode<synchronous>, transform_indices = @transform_3, window_bounds = array<i64: 1, 128>}, {pipeline_mode = #tpu.pipeline_mode<synchronous>, transform_indices = @transform_4, window_bounds = array<i64: 128, 128>}, {pipeline_mode = #tpu.pipeline_mode<synchronous>, transform_indices = @transform_5, window_bounds = array<i64: 1, 128>}, {pipeline_mode = #tpu.pipeline_mode<synchronous>, transform_indices = @transform_6, window_bounds = array<i64: 1, 128>}, {pipeline_mode = #tpu.pipeline_mode<synchronous>, transform_indices = @transform_7, window_bounds = array<i64: 9, 128, 128>}, {pipeline_mode = #tpu.pipeline_mode<synchronous>, transform_indices = @transform_8, window_bounds = array<i64: 1, 128>}, {pipeline_mode = #tpu.pipeline_mode<synchronous>, transform_indices = @transform_9, window_bounds = array<i64: 1, 128>}, {pipeline_mode = #tpu.pipeline_mode<synchronous>, transform_indices = @transform_10, window_bounds = array<i64: 128, 128>}, {pipeline_mode = #tpu.pipeline_mode<synchronous>, transform_indices = @transform_11, window_bounds = array<i64: 1, 128>}, {pipeline_mode = #tpu.pipeline_mode<synchronous>, transform_indices = @transform_12, window_bounds = array<i64: 1, 128>}, {transform_indices = @transform_13, window_bounds = array<i64: 8, 128>}]} {
    %c0 = arith.constant 0 : index
    %c0_0 = arith.constant 0 : index
    %0 = vector.load %arg1[%c0, %c0_0] : memref<256x32xbf16, #tpu.memory_space<vmem>>, vector<256x32xbf16>
    %c0_1 = arith.constant 0 : index
    %c0_2 = arith.constant 0 : index
    %1 = vector.load %arg2[%c0_1, %c0_2] : memref<32x128xbf16, #tpu.memory_space<vmem>>, vector<32x128xbf16>
    %cst = arith.constant dense<0.000000e+00> : vector<256x128xf32>
    %2 = tpu.matmul %0, %1, %cst {dimension_numbers = #tpu.dot_dimension_numbers<[1], [0], [0], [1], [0, 0, 1, 1], [], []>} : vector<256x32xbf16>, vector<32x128xbf16>, vector<256x128xf32> -> vector<256x128xf32>
    %c0_3 = arith.constant 0 : index
    %c0_4 = arith.constant 0 : index
    %3 = vector.load %arg3[%c0_3, %c0_4] : memref<1x128xf32, #tpu.memory_space<vmem>>, vector<1x128xf32>
    %4 = vector.broadcast %3 : vector<1x128xf32> to vector<256x128xf32>
    %5 = arith.mulf %2, %4 : vector<256x128xf32>
    %c0_5 = arith.constant 0 : index
    %c0_6 = arith.constant 0 : index
    %6 = vector.load %arg4[%c0_5, %c0_6] : memref<1x128xf32, #tpu.memory_space<vmem>>, vector<1x128xf32>
    %7 = vector.broadcast %6 : vector<1x128xf32> to vector<256x128xf32>
    %8 = arith.addf %5, %7 : vector<256x128xf32>
    %cst_7 = arith.constant 0.000000e+00 : f32
    %9 = vector.broadcast %cst_7 : f32 to vector<256x128xf32>
    %10 = arith.maximumf %8, %9 : vector<256x128xf32>
    %11 = arith.truncf %10 : vector<256x128xf32> to vector<256x128xbf16>
    %c0_8 = arith.constant 0 : index
    %c0_9 = arith.constant 0 : index
    %12 = vector.load %arg5[%c0_8, %c0_9] : memref<128x128xbf16, #tpu.memory_space<vmem>>, vector<128x128xbf16>
    %cst_10 = arith.constant dense<0.000000e+00> : vector<256x128xf32>
    %13 = tpu.matmul %11, %12, %cst_10 {dimension_numbers = #tpu.dot_dimension_numbers<[1], [0], [0], [1], [0, 0, 1, 1], [], []>} : vector<256x128xbf16>, vector<128x128xbf16>, vector<256x128xf32> -> vector<256x128xf32>
    %c0_11 = arith.constant 0 : index
    %c0_12 = arith.constant 0 : index
    %14 = vector.load %arg6[%c0_11, %c0_12] : memref<1x128xf32, #tpu.memory_space<vmem>>, vector<1x128xf32>
    %15 = vector.broadcast %14 : vector<1x128xf32> to vector<256x128xf32>
    %16 = arith.mulf %13, %15 : vector<256x128xf32>
    %c0_13 = arith.constant 0 : index
    %c0_14 = arith.constant 0 : index
    %17 = vector.load %arg7[%c0_13, %c0_14] : memref<1x128xf32, #tpu.memory_space<vmem>>, vector<1x128xf32>
    %18 = vector.broadcast %17 : vector<1x128xf32> to vector<256x128xf32>
    %19 = arith.addf %16, %18 : vector<256x128xf32>
    %cst_15 = arith.constant 0.000000e+00 : f32
    %20 = vector.broadcast %cst_15 : f32 to vector<256x128xf32>
    %21 = arith.maximumf %19, %20 : vector<256x128xf32>
    %cst_16 = arith.constant 0.000000e+00 : f32
    %22 = vector.broadcast %cst_16 : f32 to vector<24x128xf32>
    %c0_17 = arith.constant 0 : index
    %c0_18 = arith.constant 0 : index
    %23 = vector.load %arg15[%c0_17, %c0_18] : memref<304x128xf32, #tpu.memory_space<vmem>>, vector<24x128xf32>
    tpu.vector_store %arg15[%c0_17, %c0_18], %22 {strides = array<i32>} : memref<304x128xf32, #tpu.memory_space<vmem>>, vector<24x128xf32>,
    %c280 = arith.constant 280 : index
    %c0_19 = arith.constant 0 : index
    %24 = vector.load %arg15[%c280, %c0_19] : memref<304x128xf32, #tpu.memory_space<vmem>>, vector<24x128xf32>
    tpu.vector_store %arg15[%c280, %c0_19], %22 {strides = array<i32>} : memref<304x128xf32, #tpu.memory_space<vmem>>, vector<24x128xf32>,
    %c24 = arith.constant 24 : index
    %c0_20 = arith.constant 0 : index
    %25 = vector.load %arg15[%c24, %c0_20] : memref<304x128xf32, #tpu.memory_space<vmem>>, vector<256x128xf32>
    tpu.vector_store %arg15[%c24, %c0_20], %21 {strides = array<i32>} : memref<304x128xf32, #tpu.memory_space<vmem>>, vector<256x128xf32>,
    %26 = tpu.iota {dimensions = array<i32: 0>} : vector<256x128xi32>
    %c16_i32 = arith.constant 16 : i32
    %c0_i32 = arith.constant 0 : i32
    %27 = arith.cmpi eq, %c16_i32, %c0_i32 : i32
    %c1_i32 = arith.constant 1 : i32
    %28 = arith.select %27, %c1_i32, %c16_i32 : i32
    %29 = vector.broadcast %28 : i32 to vector<256x128xi32>
    %30 = arith.remsi %26, %29 : vector<256x128xi32>
    %c0_i32_21 = arith.constant 0 : i32
    %31 = vector.broadcast %c0_i32_21 : i32 to vector<256x128xi32>
    %32 = arith.cmpi ne, %30, %31 : vector<256x128xi32>
    %c0_i32_22 = arith.constant 0 : i32
    %33 = vector.broadcast %c0_i32_22 : i32 to vector<256x128xi32>
    %34 = arith.cmpi slt, %30, %33 : vector<256x128xi32>
    %c0_i32_23 = arith.constant 0 : i32
    %35 = arith.cmpi slt, %28, %c0_i32_23 : i32
    %36 = vector.broadcast %35 : i1 to vector<256x128xi1>
    %37 = vector.broadcast %36 : vector<256x128xi1> to vector<256x128xi1>
    %38 = arith.xori %34, %37 : vector<256x128xi1>
    %39 = arith.andi %38, %32 : vector<256x128xi1>
    %40 = vector.broadcast %28 : i32 to vector<256x128xi32>
    %41 = arith.addi %30, %40 : vector<256x128xi32>
    %42 = arith.select %39, %41, %30 : vector<256x128xi1>, vector<256x128xi32>
    %cst_24 = arith.constant 0.000000e+00 : f32
    %43 = vector.broadcast %cst_24 : f32 to vector<256x128xf32>
    %c7 = arith.constant 7 : index
    %c0_25 = arith.constant 0 : index
    %44 = vector.load %arg15[%c7, %c0_25] : memref<304x128xf32, #tpu.memory_space<vmem>>, vector<256x128xf32>
    %c1_i32_26 = arith.constant 1 : i32
    %45 = vector.broadcast %c1_i32_26 : i32 to vector<256x128xi32>
    %46 = arith.cmpi sge, %42, %45 : vector<256x128xi32>
    %cst_27 = arith.constant 0.000000e+00 : f32
    %47 = vector.broadcast %cst_27 : f32 to vector<256x128xf32>
    %48 = arith.select %46, %44, %47 : vector<256x128xi1>, vector<256x128xf32>
    %49 = arith.truncf %48 : vector<256x128xf32> to vector<256x128xbf16>
    %c0_28 = arith.constant 0 : index
    %c0_29 = arith.constant 0 : index
    %c0_30 = arith.constant 0 : index
    %50 = vector.load %arg8[%c0_28, %c0_29, %c0_30] : memref<9x128x128xbf16, #tpu.memory_space<vmem>>, vector<1x128x128xbf16>
    %51 = vector.shape_cast %50 : vector<1x128x128xbf16> to vector<128x128xbf16>
    %cst_31 = arith.constant dense<0.000000e+00> : vector<256x128xf32>
    %52 = tpu.matmul %49, %51, %cst_31 {dimension_numbers = #tpu.dot_dimension_numbers<[1], [0], [0], [1], [0, 0, 1, 1], [], []>} : vector<256x128xbf16>, vector<128x128xbf16>, vector<256x128xf32> -> vector<256x128xf32>
    %53 = arith.addf %43, %52 : vector<256x128xf32>
    %c8 = arith.constant 8 : index
    %c0_32 = arith.constant 0 : index
    %54 = vector.load %arg15[%c8, %c0_32] : memref<304x128xf32, #tpu.memory_space<vmem>>, vector<256x128xf32>
    %55 = arith.truncf %54 : vector<256x128xf32> to vector<256x128xbf16>
    %c1 = arith.constant 1 : index
    %c0_33 = arith.constant 0 : index
    %c0_34 = arith.constant 0 : index
    %56 = vector.load %arg8[%c1, %c0_33, %c0_34] : memref<9x128x128xbf16, #tpu.memory_space<vmem>>, vector<1x128x128xbf16>
    %57 = vector.shape_cast %56 : vector<1x128x128xbf16> to vector<128x128xbf16>
    %cst_35 = arith.constant dense<0.000000e+00> : vector<256x128xf32>
    %58 = tpu.matmul %55, %57, %cst_35 {dimension_numbers = #tpu.dot_dimension_numbers<[1], [0], [0], [1], [0, 0, 1, 1], [], []>} : vector<256x128xbf16>, vector<128x128xbf16>, vector<256x128xf32> -> vector<256x128xf32>
    %59 = arith.addf %53, %58 : vector<256x128xf32>
    %c9 = arith.constant 9 : index
    %c0_36 = arith.constant 0 : index
    %60 = vector.load %arg15[%c9, %c0_36] : memref<304x128xf32, #tpu.memory_space<vmem>>, vector<256x128xf32>
    %c14_i32 = arith.constant 14 : i32
    %61 = vector.broadcast %c14_i32 : i32 to vector<256x128xi32>
    %62 = arith.cmpi sle, %42, %61 : vector<256x128xi32>
    %cst_37 = arith.constant 0.000000e+00 : f32
    %63 = vector.broadcast %cst_37 : f32 to vector<256x128xf32>
    %64 = arith.select %62, %60, %63 : vector<256x128xi1>, vector<256x128xf32>
    %65 = arith.truncf %64 : vector<256x128xf32> to vector<256x128xbf16>
    %c2 = arith.constant 2 : index
    %c0_38 = arith.constant 0 : index
    %c0_39 = arith.constant 0 : index
    %66 = vector.load %arg8[%c2, %c0_38, %c0_39] : memref<9x128x128xbf16, #tpu.memory_space<vmem>>, vector<1x128x128xbf16>
    %67 = vector.shape_cast %66 : vector<1x128x128xbf16> to vector<128x128xbf16>
    %cst_40 = arith.constant dense<0.000000e+00> : vector<256x128xf32>
    %68 = tpu.matmul %65, %67, %cst_40 {dimension_numbers = #tpu.dot_dimension_numbers<[1], [0], [0], [1], [0, 0, 1, 1], [], []>} : vector<256x128xbf16>, vector<128x128xbf16>, vector<256x128xf32> -> vector<256x128xf32>
    %69 = arith.addf %59, %68 : vector<256x128xf32>
    %c23 = arith.constant 23 : index
    %c0_41 = arith.constant 0 : index
    %70 = vector.load %arg15[%c23, %c0_41] : memref<304x128xf32, #tpu.memory_space<vmem>>, vector<256x128xf32>
    %c1_i32_42 = arith.constant 1 : i32
    %71 = vector.broadcast %c1_i32_42 : i32 to vector<256x128xi32>
    %72 = arith.cmpi sge, %42, %71 : vector<256x128xi32>
    %cst_43 = arith.constant 0.000000e+00 : f32
    %73 = vector.broadcast %cst_43 : f32 to vector<256x128xf32>
    %74 = arith.select %72, %70, %73 : vector<256x128xi1>, vector<256x128xf32>
    %75 = arith.truncf %74 : vector<256x128xf32> to vector<256x128xbf16>
    %c3 = arith.constant 3 : index
    %c0_44 = arith.constant 0 : index
    %c0_45 = arith.constant 0 : index
    %76 = vector.load %arg8[%c3, %c0_44, %c0_45] : memref<9x128x128xbf16, #tpu.memory_space<vmem>>, vector<1x128x128xbf16>
    %77 = vector.shape_cast %76 : vector<1x128x128xbf16> to vector<128x128xbf16>
    %cst_46 = arith.constant dense<0.000000e+00> : vector<256x128xf32>
    %78 = tpu.matmul %75, %77, %cst_46 {dimension_numbers = #tpu.dot_dimension_numbers<[1], [0], [0], [1], [0, 0, 1, 1], [], []>} : vector<256x128xbf16>, vector<128x128xbf16>, vector<256x128xf32> -> vector<256x128xf32>
    %79 = arith.addf %69, %78 : vector<256x128xf32>
    %c24_47 = arith.constant 24 : index
    %c0_48 = arith.constant 0 : index
    %80 = vector.load %arg15[%c24_47, %c0_48] : memref<304x128xf32, #tpu.memory_space<vmem>>, vector<256x128xf32>
    %81 = arith.truncf %80 : vector<256x128xf32> to vector<256x128xbf16>
    %c4 = arith.constant 4 : index
    %c0_49 = arith.constant 0 : index
    %c0_50 = arith.constant 0 : index
    %82 = vector.load %arg8[%c4, %c0_49, %c0_50] : memref<9x128x128xbf16, #tpu.memory_space<vmem>>, vector<1x128x128xbf16>
    %83 = vector.shape_cast %82 : vector<1x128x128xbf16> to vector<128x128xbf16>
    %cst_51 = arith.constant dense<0.000000e+00> : vector<256x128xf32>
    %84 = tpu.matmul %81, %83, %cst_51 {dimension_numbers = #tpu.dot_dimension_numbers<[1], [0], [0], [1], [0, 0, 1, 1], [], []>} : vector<256x128xbf16>, vector<128x128xbf16>, vector<256x128xf32> -> vector<256x128xf32>
    %85 = arith.addf %79, %84 : vector<256x128xf32>
    %c25 = arith.constant 25 : index
    %c0_52 = arith.constant 0 : index
    %86 = vector.load %arg15[%c25, %c0_52] : memref<304x128xf32, #tpu.memory_space<vmem>>, vector<256x128xf32>
    %c14_i32_53 = arith.constant 14 : i32
    %87 = vector.broadcast %c14_i32_53 : i32 to vector<256x128xi32>
    %88 = arith.cmpi sle, %42, %87 : vector<256x128xi32>
    %cst_54 = arith.constant 0.000000e+00 : f32
    %89 = vector.broadcast %cst_54 : f32 to vector<256x128xf32>
    %90 = arith.select %88, %86, %89 : vector<256x128xi1>, vector<256x128xf32>
    %91 = arith.truncf %90 : vector<256x128xf32> to vector<256x128xbf16>
    %c5 = arith.constant 5 : index
    %c0_55 = arith.constant 0 : index
    %c0_56 = arith.constant 0 : index
    %92 = vector.load %arg8[%c5, %c0_55, %c0_56] : memref<9x128x128xbf16, #tpu.memory_space<vmem>>, vector<1x128x128xbf16>
    %93 = vector.shape_cast %92 : vector<1x128x128xbf16> to vector<128x128xbf16>
    %cst_57 = arith.constant dense<0.000000e+00> : vector<256x128xf32>
    %94 = tpu.matmul %91, %93, %cst_57 {dimension_numbers = #tpu.dot_dimension_numbers<[1], [0], [0], [1], [0, 0, 1, 1], [], []>} : vector<256x128xbf16>, vector<128x128xbf16>, vector<256x128xf32> -> vector<256x128xf32>
    %95 = arith.addf %85, %94 : vector<256x128xf32>
    %c39 = arith.constant 39 : index
    %c0_58 = arith.constant 0 : index
    %96 = vector.load %arg15[%c39, %c0_58] : memref<304x128xf32, #tpu.memory_space<vmem>>, vector<256x128xf32>
    %c1_i32_59 = arith.constant 1 : i32
    %97 = vector.broadcast %c1_i32_59 : i32 to vector<256x128xi32>
    %98 = arith.cmpi sge, %42, %97 : vector<256x128xi32>
    %cst_60 = arith.constant 0.000000e+00 : f32
    %99 = vector.broadcast %cst_60 : f32 to vector<256x128xf32>
    %100 = arith.select %98, %96, %99 : vector<256x128xi1>, vector<256x128xf32>
    %101 = arith.truncf %100 : vector<256x128xf32> to vector<256x128xbf16>
    %c6 = arith.constant 6 : index
    %c0_61 = arith.constant 0 : index
    %c0_62 = arith.constant 0 : index
    %102 = vector.load %arg8[%c6, %c0_61, %c0_62] : memref<9x128x128xbf16, #tpu.memory_space<vmem>>, vector<1x128x128xbf16>
    %103 = vector.shape_cast %102 : vector<1x128x128xbf16> to vector<128x128xbf16>
    %cst_63 = arith.constant dense<0.000000e+00> : vector<256x128xf32>
    %104 = tpu.matmul %101, %103, %cst_63 {dimension_numbers = #tpu.dot_dimension_numbers<[1], [0], [0], [1], [0, 0, 1, 1], [], []>} : vector<256x128xbf16>, vector<128x128xbf16>, vector<256x128xf32> -> vector<256x128xf32>
    %105 = arith.addf %95, %104 : vector<256x128xf32>
    %c40 = arith.constant 40 : index
    %c0_64 = arith.constant 0 : index
    %106 = vector.load %arg15[%c40, %c0_64] : memref<304x128xf32, #tpu.memory_space<vmem>>, vector<256x128xf32>
    %107 = arith.truncf %106 : vector<256x128xf32> to vector<256x128xbf16>
    %c7_65 = arith.constant 7 : index
    %c0_66 = arith.constant 0 : index
    %c0_67 = arith.constant 0 : index
    %108 = vector.load %arg8[%c7_65, %c0_66, %c0_67] : memref<9x128x128xbf16, #tpu.memory_space<vmem>>, vector<1x128x128xbf16>
    %109 = vector.shape_cast %108 : vector<1x128x128xbf16> to vector<128x128xbf16>
    %cst_68 = arith.constant dense<0.000000e+00> : vector<256x128xf32>
    %110 = tpu.matmul %107, %109, %cst_68 {dimension_numbers = #tpu.dot_dimension_numbers<[1], [0], [0], [1], [0, 0, 1, 1], [], []>} : vector<256x128xbf16>, vector<128x128xbf16>, vector<256x128xf32> -> vector<256x128xf32>
    %111 = arith.addf %105, %110 : vector<256x128xf32>
    %c41 = arith.constant 41 : index
    %c0_69 = arith.constant 0 : index
    %112 = vector.load %arg15[%c41, %c0_69] : memref<304x128xf32, #tpu.memory_space<vmem>>, vector<256x128xf32>
    %c14_i32_70 = arith.constant 14 : i32
    %113 = vector.broadcast %c14_i32_70 : i32 to vector<256x128xi32>
    %114 = arith.cmpi sle, %42, %113 : vector<256x128xi32>
    %cst_71 = arith.constant 0.000000e+00 : f32
    %115 = vector.broadcast %cst_71 : f32 to vector<256x128xf32>
    %116 = arith.select %114, %112, %115 : vector<256x128xi1>, vector<256x128xf32>
    %117 = arith.truncf %116 : vector<256x128xf32> to vector<256x128xbf16>
    %c8_72 = arith.constant 8 : index
    %c0_73 = arith.constant 0 : index
    %c0_74 = arith.constant 0 : index
    %118 = vector.load %arg8[%c8_72, %c0_73, %c0_74] : memref<9x128x128xbf16, #tpu.memory_space<vmem>>, vector<1x128x128xbf16>
    %119 = vector.shape_cast %118 : vector<1x128x128xbf16> to vector<128x128xbf16>
    %cst_75 = arith.constant dense<0.000000e+00> : vector<256x128xf32>
    %120 = tpu.matmul %117, %119, %cst_75 {dimension_numbers = #tpu.dot_dimension_numbers<[1], [0], [0], [1], [0, 0, 1, 1], [], []>} : vector<256x128xbf16>, vector<128x128xbf16>, vector<256x128xf32> -> vector<256x128xf32>
    %121 = arith.addf %111, %120 : vector<256x128xf32>
    %c0_76 = arith.constant 0 : index
    %c0_77 = arith.constant 0 : index
    %122 = vector.load %arg9[%c0_76, %c0_77] : memref<1x128xf32, #tpu.memory_space<vmem>>, vector<1x128xf32>
    %123 = vector.broadcast %122 : vector<1x128xf32> to vector<256x128xf32>
    %124 = arith.mulf %121, %123 : vector<256x128xf32>
    %c0_78 = arith.constant 0 : index
    %c0_79 = arith.constant 0 : index
    %125 = vector.load %arg10[%c0_78, %c0_79] : memref<1x128xf32, #tpu.memory_space<vmem>>, vector<1x128xf32>
    %126 = vector.broadcast %125 : vector<1x128xf32> to vector<256x128xf32>
    %127 = arith.addf %124, %126 : vector<256x128xf32>
    %cst_80 = arith.constant 0.000000e+00 : f32
    %128 = vector.broadcast %cst_80 : f32 to vector<256x128xf32>
    %129 = arith.maximumf %127, %128 : vector<256x128xf32>
    %130 = arith.truncf %129 : vector<256x128xf32> to vector<256x128xbf16>
    %c0_81 = arith.constant 0 : index
    %c0_82 = arith.constant 0 : index
    %131 = vector.load %arg11[%c0_81, %c0_82] : memref<128x128xbf16, #tpu.memory_space<vmem>>, vector<128x128xbf16>
    %cst_83 = arith.constant dense<0.000000e+00> : vector<256x128xf32>
    %132 = tpu.matmul %130, %131, %cst_83 {dimension_numbers = #tpu.dot_dimension_numbers<[1], [0], [0], [1], [0, 0, 1, 1], [], []>} : vector<256x128xbf16>, vector<128x128xbf16>, vector<256x128xf32> -> vector<256x128xf32>
    %c0_84 = arith.constant 0 : index
    %c0_85 = arith.constant 0 : index
    %133 = vector.load %arg12[%c0_84, %c0_85] : memref<1x128xf32, #tpu.memory_space<vmem>>, vector<1x128xf32>
    %134 = vector.broadcast %133 : vector<1x128xf32> to vector<256x128xf32>
    %135 = arith.mulf %132, %134 : vector<256x128xf32>
    %c0_86 = arith.constant 0 : index
    %c0_87 = arith.constant 0 : index
    %136 = vector.load %arg13[%c0_86, %c0_87] : memref<1x128xf32, #tpu.memory_space<vmem>>, vector<1x128xf32>
    %137 = vector.broadcast %136 : vector<1x128xf32> to vector<256x128xf32>
    %138 = arith.addf %135, %137 : vector<256x128xf32>
    %139 = arith.addf %138, %10 : vector<256x128xf32>
    %cst_88 = arith.constant 0.000000e+00 : f32
    %140 = vector.broadcast %cst_88 : f32 to vector<256x128xf32>
    %141 = arith.maximumf %139, %140 : vector<256x128xf32>
    %cst_89 = arith.constant dense<0.000000e+00> : vector<128xf32>
    %142 = vector.multi_reduction <add>, %141, %cst_89 [0] : vector<256x128xf32> to vector<128xf32>
    %143 = vector.shape_cast %142 : vector<128xf32> to vector<1x128xf32>
    %cst_90 = arith.constant 3.906250e-03 : f32
    %144 = vector.broadcast %cst_90 : f32 to vector<1x128xf32>
    %145 = arith.mulf %143, %144 : vector<1x128xf32>
    %146 = vector.shape_cast %145 : vector<1x128xf32> to vector<1x128xf32>
    %147 = vector.broadcast %146 : vector<1x128xf32> to vector<8x128xf32>
    %c0_91 = arith.constant 0 : index
    %c0_92 = arith.constant 0 : index
    %148 = vector.load %arg14[%c0_91, %c0_92] : memref<8x128xf32, #tpu.memory_space<vmem>>, vector<8x128xf32>
    tpu.vector_store %arg14[%c0_91, %c0_92], %147 {strides = array<i32>} : memref<8x128xf32, #tpu.memory_space<vmem>>, vector<8x128xf32>,
    return
  }
  func.func @transform_0(%arg0: i32) -> (i32, i32) {
    %c0_i32 = arith.constant 0 : i32
    %c0_i32_0 = arith.constant 0 : i32
    return %arg0, %c0_i32 : i32, i32
  }
  func.func @transform_1(%arg0: i32) -> (i32, i32) {
    %c0_i32 = arith.constant 0 : i32
    %c0_i32_0 = arith.constant 0 : i32
    %c0_i32_1 = arith.constant 0 : i32
    return %c0_i32, %c0_i32_0 : i32, i32
  }
  func.func @transform_2(%arg0: i32) -> (i32, i32) {
    %c0_i32 = arith.constant 0 : i32
    %c0_i32_0 = arith.constant 0 : i32
    %c0_i32_1 = arith.constant 0 : i32
    return %c0_i32, %c0_i32_0 : i32, i32
  }
  func.func @transform_3(%arg0: i32) -> (i32, i32) {
    %c0_i32 = arith.constant 0 : i32
    %c0_i32_0 = arith.constant 0 : i32
    %c0_i32_1 = arith.constant 0 : i32
    return %c0_i32, %c0_i32_0 : i32, i32
  }
  func.func @transform_4(%arg0: i32) -> (i32, i32) {
    %c0_i32 = arith.constant 0 : i32
    %c0_i32_0 = arith.constant 0 : i32
    %c0_i32_1 = arith.constant 0 : i32
    return %c0_i32, %c0_i32_0 : i32, i32
  }
  func.func @transform_5(%arg0: i32) -> (i32, i32) {
    %c0_i32 = arith.constant 0 : i32
    %c0_i32_0 = arith.constant 0 : i32
    %c0_i32_1 = arith.constant 0 : i32
    return %c0_i32, %c0_i32_0 : i32, i32
  }
  func.func @transform_6(%arg0: i32) -> (i32, i32) {
    %c0_i32 = arith.constant 0 : i32
    %c0_i32_0 = arith.constant 0 : i32
    %c0_i32_1 = arith.constant 0 : i32
    return %c0_i32, %c0_i32_0 : i32, i32
  }
  func.func @transform_7(%arg0: i32) -> (i32, i32, i32) {
    %c0_i32 = arith.constant 0 : i32
    %c0_i32_0 = arith.constant 0 : i32
    %c0_i32_1 = arith.constant 0 : i32
    %c0_i32_2 = arith.constant 0 : i32
    return %c0_i32, %c0_i32_0, %c0_i32_1 : i32, i32, i32
  }
  func.func @transform_8(%arg0: i32) -> (i32, i32) {
    %c0_i32 = arith.constant 0 : i32
    %c0_i32_0 = arith.constant 0 : i32
    %c0_i32_1 = arith.constant 0 : i32
    return %c0_i32, %c0_i32_0 : i32, i32
  }
  func.func @transform_9(%arg0: i32) -> (i32, i32) {
    %c0_i32 = arith.constant 0 : i32
    %c0_i32_0 = arith.constant 0 : i32
    %c0_i32_1 = arith.constant 0 : i32
    return %c0_i32, %c0_i32_0 : i32, i32
  }
  func.func @transform_10(%arg0: i32) -> (i32, i32) {
    %c0_i32 = arith.constant 0 : i32
    %c0_i32_0 = arith.constant 0 : i32
    %c0_i32_1 = arith.constant 0 : i32
    return %c0_i32, %c0_i32_0 : i32, i32
  }
  func.func @transform_11(%arg0: i32) -> (i32, i32) {
    %c0_i32 = arith.constant 0 : i32
    %c0_i32_0 = arith.constant 0 : i32
    %c0_i32_1 = arith.constant 0 : i32
    return %c0_i32, %c0_i32_0 : i32, i32
  }
  func.func @transform_12(%arg0: i32) -> (i32, i32) {
    %c0_i32 = arith.constant 0 : i32
    %c0_i32_0 = arith.constant 0 : i32
    %c0_i32_1 = arith.constant 0 : i32
    return %c0_i32, %c0_i32_0 : i32, i32
  }
  func.func @transform_13(%arg0: i32) -> (i32, i32) {
    %c0_i32 = arith.constant 0 : i32
    %c0_i32_0 = arith.constant 0 : i32
    return %arg0, %c0_i32 : i32, i32
  }
}

</mosaic_0001>

<bundles_post_ra>
// kernel: _forward.1
= control target key start
LH: loop header
LB: loop body
LE: loop exit
PB: predicated region body
PF: predicated region fallthrough
CT: control target
= control target key end

     0   :  { %s7098_s25 = smov 0   ;;  %s8855_s0 = inlined_call_operand.vmem [shape: bf16[512,32], index: 0, kind: input, shape index: {}]   ;;  %s8856_s1 = inlined_call_operand.vmem [shape: bf16[32,128], index: 1, kind: input, shape index: {}]   ;;  %s8857_s2 = inlined_call_operand.vmem [shape: f32[1,128], index: 2, kind: input, shape index: {}]   ;;  %s8858_s3 = inlined_call_operand.vmem [shape: f32[1,128], index: 3, kind: input, shape index: {}]   ;;  %s8859_s4 = inlined_call_operand.vmem [shape: bf16[128,128], index: 4, kind: input, shape index: {}]   ;;  %s8860_s5 = inlined_call_operand.vmem [shape: f32[1,128], index: 5, kind: input, shape index: {}]   ;;  %s8861_s6 = inlined_call_operand.vmem [shape: f32[1,128], index: 6, kind: input, shape index: {}]   ;;  %s8862_s7 = inlined_call_operand.vmem [shape: bf16[9,128,128], index: 7, kind: input, shape index: {}]   ;;  %s8863_s8 = inlined_call_operand.vmem [shape: f32[1,128], index: 8, kind: input, shape index: {}]   ;;  %s8864_s9 = inlined_call_operand.vmem [shape: f32[1,128], index: 9, kind: input, shape index: {}]   ;;  %s8865_s10 = inlined_call_operand.vmem [shape: bf16[128,128], index: 10, kind: input, shape index: {}]   ;;  %s8866_s11 = inlined_call_operand.vmem [shape: f32[1,128], index: 11, kind: input, shape index: {}]   ;;  %s8867_s12 = inlined_call_operand.vmem [shape: f32[1,128], index: 12, kind: input, shape index: {}]   ;;  %s8868_s13 = inlined_call_operand.vmem [shape: f32[16,128], index: 13, kind: output, shape index: {}]  }
   0x1 LB: > { %s7104_s26 = sadd.s32 4294967295, %s7023_s25   ;;  %p5230_p0 = scmp.ge.s32.totalorder %s7023_s25, 1  ;;  %s7023_s25 = sphi %s7098_s25, %s23_s25  }
   0x2   : > { %p388_p1 = scmp.lt.s32.totalorder %s7023_s25, 3 }
   0x4   : > { %p389_p2 = pnand %p5230_p0, %p388_p1 }
   0x6   : > { %392 = sbr.rel (%p389_p2) target bundleno = 1325 (0x52d), region = 72 }
   0xd   : > { %v6910_v0 = vld [vmem:[%s8856_s1] sm:$0xff]   ;;  %s5231_s29 = sshll.u32 %s7104_s26, 5  ;;  %v6911_v1 = vld [vmem:[%s8856_s1 + $0x8] sm:$0xff]   ;;  %vm570_vm0 = vcmask 261120   ;;  %v6930_v4 = vld [vmem:[%s8859_s4 + $0x10] sm:$0xff]   ;;  %vm8938_vm3 = vmmov 1  }
   0xe   : > { %p432_p3 = scmp.lt.s32.totalorder %s5231_s29, 63  ;;  %6064 = vmatprep.subr.bf16.mxu0 %v6910_v0  ;;  %v6928_v2 = vld [vmem:[%s8859_s4] sm:$0xff]   ;;  %v6929_v3 = vld [vmem:[%s8859_s4 + $0x8] sm:$0xff]   ;;  %v6931_v8 = vld [vmem:[%s8859_s4 + $0x18] sm:$0xff]   ;;  %p437_p4 = scmp.lt.s32.totalorder %s7104_s26, 1 }
   0xf   : > { %6065 = vmatpush3.bf16.msra.mxu0 %v6910_v0  ;;  %6100 = vmatprep.subr.bf16.mxu1 %v6928_v2  ;;  %v6932_v9 = vld [vmem:[%s8859_s4 + $0x20] sm:$0xff]   ;;  %v6933_v23 = vld [vmem:[%s8859_s4 + $0x28] sm:$0xff]   ;;  %v6934_v24 = vld [vmem:[%s8859_s4 + $0x30] sm:$0xff]  }
  0x10   : > { %s9183_s29 = smov (!%p432_p3, %s5231_s29), 63  ;;  %6066 = vmatprep.subr.bf16.mxu0 %v6911_v1  ;;  %6101 = vmatpush3.bf16.msra.mxu1 %v6928_v2  ;;  %v6935_v25 = vld [vmem:[%s8859_s4 + $0x38] sm:$0xff]   ;;  %v6936_v26 = vld [vmem:[%s8862_s7 + $0xc0] sm:$0xff]   ;;  %v6937_v27 = vld [vmem:[%s8862_s7 + $0xc8] sm:$0xff]   ;;  %s9185_s26 = smov (!%p437_p4, %s7104_s26), 1 }
  0x11   : > { %s5232_s19 = sshll.u32 %s9183_s29, 2  ;;  %6102 = vmatprep.subr.bf16.mxu1 %v6929_v3  ;;  %v6940_v28 = vld [vmem:[%s8862_s7 + $0x40] sm:$0xff]   ;;  %v6938_v29 = vld [vmem:[%s8862_s7 + $0xd0] sm:$0xff]   ;;  %v6939_v30 = vld [vmem:[%s8862_s7 + $0xd8] sm:$0xff]   ;;  %s5233_s16 = sshll.u32 %s9185_s26, 3 }
  0x12   : > { %s7124_s22 = scalar_lea.vmem %s8855_s0, %s5232_s19  ;;  %v6941_v31 = vld [vmem:[%s8862_s7 + $0xe0] sm:$0xff]   ;;  %v6944_v32 = vld [vmem:[%s8862_s7 + $0xe8] sm:$0xff]   ;;  %s440_s19 = scalar_lea.vmem %s8868_s13, %s5233_s16 }
  0x13   : > { %6067 = vmatpush3.bf16.msra.mxu0 %v6911_v1  ;;  %v6912_v5 = vld [vmem:[%s7124_s22] sm:$0xff]   ;;  %v6913_v6 = vld [vmem:[%s7124_s22 + $0x8] sm:$0xff]   ;;  %v6914_v7 = vld [vmem:[%s7124_s22 + $0x10] sm:$0xff]  }
  0x14   : > { %6068 = vmatprep.mubr.msk.bf16.mxu0 %vm570_vm0, %v6912_v5  ;;  %6103 = vmatpush3.bf16.msra.mxu1 %v6929_v3  ;;  %v6915_v10 = vld [vmem:[%s7124_s22 + $0x18] sm:$0xff]   ;;  %v6916_v11 = vld [vmem:[%s7124_s22 + $0x20] sm:$0xff]   ;;  %v6917_v12 = vld [vmem:[%s7124_s22 + $0x28] sm:$0xff]  }
  0x15   : > { %6104 = vmatprep.subr.bf16.mxu1 %v6930_v4  ;;  %v6918_v13 = vld [vmem:[%s7124_s22 + $0x30] sm:$0xff]   ;;  %v6919_v14 = vld [vmem:[%s7124_s22 + $0x38] sm:$0xff]   ;;  %v6920_v15 = vld [vmem:[%s7124_s22 + $0x40] sm:$0xff]   ;;  %6292 = vmatprep.subr.bf16.mxu0 %v6936_v26 }
  0x16   : > { %6069 = vmatmul.mubr.msk.bf16.vlgmr.msra.gmra.mrb[0].mxu0 %vm570_vm0, %v6913_v6  ;;  %v6921_v16 = vld [vmem:[%s7124_s22 + $0x48] sm:$0xff]   ;;  %v6922_v17 = vld [vmem:[%s7124_s22 + $0x50] sm:$0xff]   ;;  %v6923_v18 = vld [vmem:[%s7124_s22 + $0x58] sm:$0xff]  }
  0x17   : > { %6072 = vmatprep.mubr.msk.bf16.mxu0 %vm570_vm0, %v6914_v7  ;;  %v6924_v19 = vld [vmem:[%s7124_s22 + $0x60] sm:$0xff]   ;;  %v6925_v20 = vld [vmem:[%s7124_s22 + $0x68] sm:$0xff]   ;;  %v6926_v21 = vld [vmem:[%s7124_s22 + $0x70] sm:$0xff]   ;;  %6293 = vmatpush3.bf16.msra.mxu0 %v6936_v26 }
  0x18   : > { %6105 = vmatpush3.bf16.msra.mxu1 %v6930_v4  ;;  %v6927_v22 = vld [vmem:[%s7124_s22 + $0x78] sm:$0xff]   ;;  %6294 = vmatprep.subr.bf16.mxu0 %v6937_v27  ;;  %v7200_v33 = vld [vmem:[%s8857_s2] ss:$0 sm:$0xff]  ;;  %v6942_v60 = vld [vmem:[%s8862_s7 + $0x48] sm:$0xff]  }
  0x19   : > { %6106 = vmatprep.subr.bf16.mxu1 %v6931_v8  ;;  %v7206_v36 = vld [vmem:[%s8858_s3] ss:$0 sm:$0xff]  ;;  %v6943_v3 = vld [vmem:[%s8862_s7 + $0x50] sm:$0xff]  }
  0x1b   : > { %6295 = vmatpush3.bf16.msra.mxu0 %v6937_v27 }
  0x1c   : > { %6107 = vmatpush3.bf16.msra.mxu1 %v6931_v8  ;;  %6296 = vmatprep.subr.bf16.mxu0 %v6938_v29 }
  0x1d   : > { %6108 = vmatprep.subr.bf16.mxu1 %v6932_v9 }
  0x1e   : > { %6073 = vmatmul.mubr.msk.bf16.gmra.mrb[4].mxu0 %vm570_vm0, %v6915_v10 }
  0x1f   : > { %6076 = vmatprep.mubr.msk.bf16.mxu0 %vm570_vm0, %v6916_v11  ;;  %6297 = vmatpush3.bf16.msra.mxu0 %v6938_v29 }
  0x20   : > { %6109 = vmatpush3.bf16.msra.mxu1 %v6932_v9  ;;  %6298 = vmatprep.subr.bf16.mxu0 %v6939_v30 }
  0x21   : > { %6110 = vmatprep.subr.bf16.mxu1 %v6933_v23 }
  0x23   : > { %6299 = vmatpush3.bf16.msra.mxu0 %v6939_v30 }
  0x24   : > { %6111 = vmatpush3.bf16.msra.mxu1 %v6933_v23  ;;  %6300 = vmatprep.subr.bf16.mxu0 %v6941_v31 }
  0x25   : > { %6112 = vmatprep.subr.bf16.mxu1 %v6934_v24 }
  0x26   : > { %6077 = vmatmul.mubr.msk.bf16.gmra.mrb[8].mxu0 %vm570_vm0, %v6917_v12 }
  0x27   : > { %6080 = vmatprep.mubr.msk.bf16.mxu0 %vm570_vm0, %v6918_v13  ;;  %6301 = vmatpush3.bf16.msra.mxu0 %v6941_v31 }
  0x28   : > { %6113 = vmatpush3.bf16.msra.mxu1 %v6934_v24  ;;  %6302 = vmatprep.subr.bf16.mxu0 %v6944_v32 }
  0x29   : > { %6114 = vmatprep.subr.bf16.mxu1 %v6935_v25 }
  0x2b   : > { %6303 = vmatpush3.bf16.msra.mxu0 %v6944_v32 }
  0x2c   : > { %6115 = vmatpush3.bf16.msra.mxu1 %v6935_v25 }
  0x2d   : > { %6148 = vmatprep.subr.bf16.mxu1 %v6940_v28 }
  0x2e   : > { %6081 = vmatmul.mubr.msk.bf16.gmra.mrb[12].mxu0 %vm570_vm0, %v6919_v14 }
  0x2f   : > { %6084 = vmatprep.mubr.msk.bf16.mxu0 %vm570_vm0, %v6920_v15 }
  0x36   : > { %6085 = vmatmul.mubr.msk.bf16.gmra.mrb[16].mxu0 %vm570_vm0, %v6921_v16 }
  0x37   : > { %6088 = vmatprep.mubr.msk.bf16.mxu0 %vm570_vm0, %v6922_v17 }
  0x3e   : > { %6089 = vmatmul.mubr.msk.bf16.gmra.mrb[20].mxu0 %vm570_vm0, %v6923_v18 }
  0x3f   : > { %6092 = vmatprep.mubr.msk.bf16.mxu0 %vm570_vm0, %v6924_v19 }
  0x46   : > { %6093 = vmatmul.mubr.msk.bf16.gmra.mrb[24].mxu0 %vm570_vm0, %v6925_v20 }
  0x47   : > { %6096 = vmatprep.mubr.msk.bf16.mxu0 %vm570_vm0, %v6926_v21 }
  0x4e   : > { %6097 = vmatmul.mubr.msk.bf16.gmra.mrb[28].mxu0 %vm570_vm0, %v6927_v22 }
  0xe9   : > { %v6070_v34 = vpop.f32.mrb[0].mxu0 }
  0xea   : > { %v789_v35 = vmul.f32 %v6070_v34, %v7200_v33  ;;  %v653_v37 = vpop.f32.mrb[1].mxu0 }
  0xeb   : > { %v787_v38 = vmul.f32 %v7200_v33, %v653_v37  ;;  %v6071_v39 = vpop.f32.mrb[2].mxu0 }
  0xec   : > { %v790_v40 = vmul.f32 %v6071_v39, %v7200_v33  ;;  %v656_v41 = vpop.f32.mrb[3].mxu0  ;;  %v7215_v44 = vadd.f32 %v7206_v36, %v789_v35 }
  0xed   : > { %v788_v42 = vmul.f32 %v7200_v33, %v656_v41  ;;  %v7212_v43 = vadd.f32 %v7206_v36, %v787_v38 }
  0xee   : > { %8957 = vst [vmem:[#allocation4_spill] sm:$0xff] %v7215_v44  ;;  %v7218_v45 = vadd.f32 %v7206_v36, %v790_v40  ;;  %v8899_v51 = vmax.f32 %v7215_v44, 0.0 }
  0xef   : > { %8956 = vst [vmem:[#allocation3_spill] sm:$0xff] %v7212_v43  ;;  %v7221_v46 = vadd.f32 %v7206_v36, %v788_v42  ;;  %v8900_v49 = vmax.f32 %v7212_v43, 0.0  ;;  %v8555_v43 = vld [vmem:[%s8863_s8] ss:$0 sm:$0xff] }
  0xf0   : > { %8958 = vst [vmem:[#allocation5_spill] sm:$0xff] %v7218_v45  ;;  %v8897_v47 = vmax.f32 %v7218_v45, 0.0 }
  0xf1   : > { %8959 = vst [vmem:[#allocation6_spill] sm:$0xff] %v7221_v46  ;;  %v6074_v48 = vpop.f32.mrb[4].mxu0  ;;  %v8898_v50 = vmax.f32 %v7221_v46, 0.0 }
  0xf2   : > { %v793_v52 = vmul.f32 %v6074_v48, %v7200_v33  ;;  %v669_v53 = vpop.f32.mrb[5].mxu0  ;;  %v891_v59 = vpack.c.bf16 %v8897_v47, %v8899_v51 }
  0xf3   : > { %v791_v54 = vmul.f32 %v7200_v33, %v669_v53  ;;  %v6075_v55 = vpop.f32.mrb[6].mxu0  ;;  %v890_v56 = vpack.c.bf16 %v8898_v50, %v8900_v49 }
  0xf4   : > { %v794_v57 = vmul.f32 %v6075_v55, %v7200_v33  ;;  %v672_v58 = vpop.f32.mrb[7].mxu0  ;;  %v7246_v63 = vadd.f32 %v7206_v36, %v793_v52 }
  0xf5   : > { %v7242_v61 = vadd.f32 %v7206_v36, %v791_v54  ;;  %v792_v62 = vmul.f32 %v7200_v33, %v672_v58  ;;  %6116 = vmatprep.mubr.bf16.mxu1 %v890_v56 }
  0xf6   : > { %8961 = vst [vmem:[#allocation8_spill] sm:$0xff] %v7246_v63  ;;  %v7249_v0 = vadd.f32 %v7206_v36, %v794_v57  ;;  %6117 = vmatmul.mubr.bf16.vlgmr.msra.gmra.mrb[0].mxu1 %v891_v59  ;;  %v8895_v7 = vmax.f32 %v7246_v63, 0.0 }
  0xf7   : > { %8960 = vst [vmem:[#allocation7_spill] sm:$0xff] %v7242_v61  ;;  %v7252_v1 = vadd.f32 %v7206_v36, %v792_v62  ;;  %6149 = vmatpush3.bf16.msra.mxu1 %v6940_v28  ;;  %v8896_v4 = vmax.f32 %v7242_v61, 0.0 }
  0xf8   : > { %8962 = vst [vmem:[#allocation9_spill] sm:$0xff] %v7249_v0  ;;  %v8893_v2 = vmax.f32 %v7249_v0, 0.0  ;;  %6150 = vmatprep.subr.bf16.mxu1 %v6942_v60 }
  0xf9   : > { %8963 = vst [vmem:[#allocation10_spill] sm:$0xff] %v7252_v1  ;;  %v8894_v5 = vmax.f32 %v7252_v1, 0.0  ;;  %v6078_v6 = vpop.f32.mrb[8].mxu0  ;;  %v9032_v1 = vmov 0 }
  0xfa   : > { %v797_v8 = vmul.f32 %v6078_v6, %v7200_v33  ;;  %v685_v9 = vpop.f32.mrb[9].mxu0  ;;  %v893_v15 = vpack.c.bf16 %v8893_v2, %v8895_v7 }
  0xfb   : > { %v795_v10 = vmul.f32 %v7200_v33, %v685_v9  ;;  %v6079_v11 = vpop.f32.mrb[10].mxu0  ;;  %v892_v12 = vpack.c.bf16 %v8894_v5, %v8896_v4  ;;  %6151 = vmatpush3.bf16.msra.mxu1 %v6942_v60 }
  0xfc   : > { %v798_v13 = vmul.f32 %v6079_v11, %v7200_v33  ;;  %v688_v14 = vpop.f32.mrb[11].mxu0  ;;  %6152 = vmatprep.subr.bf16.mxu1 %v6943_v3  ;;  %v7277_v18 = vadd.f32 %v7206_v36, %v797_v8 }
  0xfd   : > { %v7273_v16 = vadd.f32 %v7206_v36, %v795_v10  ;;  %v796_v17 = vmul.f32 %v7200_v33, %v688_v14  ;;  %6120 = vmatprep.mubr.bf16.mxu1 %v892_v12 }
  0xfe   : > { %8965 = vst [vmem:[#allocation12_spill] sm:$0xff] %v7277_v18  ;;  %v7280_v19 = vadd.f32 %v7206_v36, %v798_v13  ;;  %6121 = vmatmul.mubr.bf16.gmra.mrb[4].mxu1 %v893_v15  ;;  %v8891_v25 = vmax.f32 %v7277_v18, 0.0 }
  0xff   : > { %8964 = vst [vmem:[#allocation11_spill] sm:$0xff] %v7273_v16  ;;  %v7283_v20 = vadd.f32 %v7206_v36, %v796_v17  ;;  %6153 = vmatpush3.bf16.msra.mxu1 %v6943_v3  ;;  %v8892_v22 = vmax.f32 %v7273_v16, 0.0 }
 0x100   : > { %8966 = vst [vmem:[#allocation13_spill] sm:$0xff] %v7280_v19  ;;  %v8889_v21 = vmax.f32 %v7280_v19, 0.0  ;;  %v9026_v19 = vmov 0 }
 0x101   : > { %8967 = vst [vmem:[#allocation14_spill] sm:$0xff] %v7283_v20  ;;  %v8890_v23 = vmax.f32 %v7283_v20, 0.0  ;;  %v6082_v24 = vpop.f32.mrb[12].mxu0 }
 0x102   : > { %v801_v26 = vmul.f32 %v6082_v24, %v7200_v33  ;;  %v701_v27 = vpop.f32.mrb[13].mxu0  ;;  %v895_v34 = vpack.c.bf16 %v8889_v21, %v8891_v25 }
 0x103   : > { %v799_v28 = vmul.f32 %v7200_v33, %v701_v27  ;;  %v6083_v29 = vpop.f32.mrb[14].mxu0  ;;  %v894_v30 = vpack.c.bf16 %v8890_v23, %v8892_v22 }
 0x104   : > { %v802_v31 = vmul.f32 %v6083_v29, %v7200_v33  ;;  %v704_v32 = vpop.f32.mrb[15].mxu0  ;;  %v7305_v38 = vadd.f32 %v7206_v36, %v801_v26 }
 0x105   : > { %v7301_v35 = vadd.f32 %v7206_v36, %v799_v28  ;;  %v800_v37 = vmul.f32 %v7200_v33, %v704_v32  ;;  %6124 = vmatprep.mubr.bf16.mxu1 %v894_v30 }
 0x106   : > { %8969 = vst [vmem:[#allocation16_spill] sm:$0xff] %v7305_v38  ;;  %v7308_v39 = vadd.f32 %v7206_v36, %v802_v31  ;;  %6125 = vmatmul.mubr.bf16.gmra.mrb[8].mxu1 %v895_v34  ;;  %v8887_v53 = vmax.f32 %v7305_v38, 0.0 }
 0x107   : > { %8968 = vst [vmem:[#allocation15_spill] sm:$0xff] %v7301_v35  ;;  %v7311_v40 = vadd.f32 %v7206_v36, %v800_v37  ;;  %v8888_v42 = vmax.f32 %v7301_v35, 0.0 }
 0x108   : > { %8970 = vst [vmem:[#allocation17_spill] sm:$0xff] %v7308_v39  ;;  %v8885_v41 = vmax.f32 %v7308_v39, 0.0 }
 0x109   : > { %8971 = vst [vmem:[#allocation18_spill] sm:$0xff] %v7311_v40  ;;  %v8886_v48 = vmax.f32 %v7311_v40, 0.0  ;;  %v6086_v52 = vpop.f32.mrb[16].mxu0 }
 0x10a   : > { %v805_v54 = vmul.f32 %v6086_v52, %v7200_v33  ;;  %v717_v55 = vpop.f32.mrb[17].mxu0  ;;  %v897_v62 = vpack.c.bf16 %v8885_v41, %v8887_v53 }
 0x10b   : > { %v803_v56 = vmul.f32 %v7200_v33, %v717_v55  ;;  %v6087_v57 = vpop.f32.mrb[18].mxu0  ;;  %v896_v58 = vpack.c.bf16 %v8886_v48, %v8888_v42 }
 0x10c   : > { %v806_v59 = vmul.f32 %v6087_v57, %v7200_v33  ;;  %v720_v60 = vpop.f32.mrb[19].mxu0  ;;  %v7333_v8 = vadd.f32 %v7206_v36, %v805_v54 }
 0x10d   : > { %v7329_v3 = vadd.f32 %v7206_v36, %v803_v56  ;;  %v804_v6 = vmul.f32 %v7200_v33, %v720_v60  ;;  %6128 = vmatprep.mubr.bf16.mxu1 %v896_v58 }
 0x10e   : > { %8973 = vst [vmem:[#allocation20_spill] sm:$0xff] %v7333_v8  ;;  %v7336_v9 = vadd.f32 %v7206_v36, %v806_v59  ;;  %6129 = vmatmul.mubr.bf16.gmra.mrb[12].mxu1 %v897_v62  ;;  %v8883_v15 = vmax.f32 %v7333_v8, 0.0  ;;  %v9018_v8 = vmov 0 }
 0x10f   : > { %8972 = vst [vmem:[#allocation19_spill] sm:$0xff] %v7329_v3  ;;  %v7339_v10 = vadd.f32 %v7206_v36, %v804_v6  ;;  %v8884_v12 = vmax.f32 %v7329_v3, 0.0 }
 0x110   : > { %8974 = vst [vmem:[#allocation21_spill] sm:$0xff] %v7336_v9  ;;  %v8873_v11 = vmax.f32 %v7336_v9, 0.0 }
 0x111   : > { %8975 = vst [vmem:[#allocation22_spill] sm:$0xff] %v7339_v10  ;;  %v8882_v13 = vmax.f32 %v7339_v10, 0.0  ;;  %v6090_v14 = vpop.f32.mrb[20].mxu0 }
 0x112   : > { %v809_v17 = vmul.f32 %v6090_v14, %v7200_v33  ;;  %v733_v24 = vpop.f32.mrb[21].mxu0  ;;  %v899_v31 = vpack.c.bf16 %v8873_v11, %v8883_v15 }
 0x113   : > { %v807_v26 = vmul.f32 %v7200_v33, %v733_v24  ;;  %v6091_v27 = vpop.f32.mrb[22].mxu0  ;;  %v898_v28 = vpack.c.bf16 %v8882_v13, %v8884_v12 }
 0x114   : > { %v810_v29 = vmul.f32 %v6091_v27, %v7200_v33  ;;  %v736_v30 = vpop.f32.mrb[23].mxu0  ;;  %v7361_v37 = vadd.f32 %v7206_v36, %v809_v17 }
 0x115   : > { %v7357_v32 = vadd.f32 %v7206_v36, %v807_v26  ;;  %v808_v34 = vmul.f32 %v7200_v33, %v736_v30  ;;  %6132 = vmatprep.mubr.bf16.mxu1 %v898_v28 }
 0x116   : > { %8977 = vst [vmem:[#allocation24_spill] sm:$0xff] %v7361_v37  ;;  %v7364_v52 = vadd.f32 %v7206_v36, %v810_v29  ;;  %6133 = vmatmul.mubr.bf16.gmra.mrb[16].mxu1 %v899_v31  ;;  %v8871_v59 = vmax.f32 %v7361_v37, 0.0 }
 0x117   : > { %8976 = vst [vmem:[#allocation23_spill] sm:$0xff] %v7357_v32  ;;  %v7367_v54 = vadd.f32 %v7206_v36, %v808_v34  ;;  %v8872_v56 = vmax.f32 %v7357_v32, 0.0 }
 0x118   : > { %8978 = vst [vmem:[#allocation25_spill] sm:$0xff] %v7364_v52  ;;  %v8869_v55 = vmax.f32 %v7364_v52, 0.0  ;;  %v9010_v52 = vmov 0 }
 0x119   : > { %8979 = vst [vmem:[#allocation26_spill] sm:$0xff] %v7367_v54  ;;  %v8870_v57 = vmax.f32 %v7367_v54, 0.0  ;;  %v6094_v58 = vpop.f32.mrb[24].mxu0 }
 0x11a   : > { %v813_v60 = vmul.f32 %v6094_v58, %v7200_v33  ;;  %v749_v62 = vpop.f32.mrb[25].mxu0  ;;  %v901_v27 = vpack.c.bf16 %v8869_v55, %v8871_v59 }
 0x11b   : > { %v811_v6 = vmul.f32 %v7200_v33, %v749_v62  ;;  %v6095_v14 = vpop.f32.mrb[26].mxu0  ;;  %v900_v17 = vpack.c.bf16 %v8870_v57, %v8872_v56 }
 0x11c   : > { %v814_v24 = vmul.f32 %v6095_v14, %v7200_v33  ;;  %v752_v26 = vpop.f32.mrb[27].mxu0  ;;  %v7389_v30 = vadd.f32 %v7206_v36, %v813_v60 }
 0x11d   : > { %v7385_v28 = vadd.f32 %v7206_v36, %v811_v6  ;;  %v812_v29 = vmul.f32 %v7200_v33, %v752_v26  ;;  %6136 = vmatprep.mubr.bf16.mxu1 %v900_v17 }
 0x11e   : > { %8981 = vst [vmem:[#allocation28_spill] sm:$0xff] %v7389_v30  ;;  %v7392_v31 = vadd.f32 %v7206_v36, %v814_v24  ;;  %6137 = vmatmul.mubr.bf16.gmra.mrb[20].mxu1 %v901_v27  ;;  %v8876_v26 = vmax.f32 %v7389_v30, 0.0 }
 0x11f   : > { %8980 = vst [vmem:[#allocation27_spill] sm:$0xff] %v7385_v28  ;;  %v7395_v34 = vadd.f32 %v7206_v36, %v812_v29  ;;  %v8881_v62 = vmax.f32 %v7385_v28, 0.0 }
 0x120   : > { %8982 = vst [vmem:[#allocation29_spill] sm:$0xff] %v7392_v31  ;;  %v8875_v58 = vmax.f32 %v7392_v31, 0.0 }
 0x121   : > { %8983 = vst [vmem:[#allocation30_spill] sm:$0xff] %v7395_v34  ;;  %v8874_v6 = vmax.f32 %v7395_v34, 0.0  ;;  %v6098_v14 = vpop.f32.mrb[28].mxu0 }
 0x122   : > { %v817_v17 = vmul.f32 %v6098_v14, %v7200_v33  ;;  %v765_v60 = vpop.f32.mrb[29].mxu0  ;;  %v903_v59 = vpack.c.bf16 %v8875_v58, %v8876_v26 }
 0x123   : > { %v815_v55 = vmul.f32 %v7200_v33, %v765_v60  ;;  %v6099_v24 = vpop.f32.mrb[30].mxu0  ;;  %v902_v27 = vpack.c.bf16 %v8874_v6, %v8881_v62 }
 0x124   : > { %v818_v29 = vmul.f32 %v6099_v24, %v7200_v33  ;;  %v768_v57 = vpop.f32.mrb[31].mxu0  ;;  %v7417_v60 = vadd.f32 %v7206_v36, %v817_v17  ;;  %v6948_v17 = vld [vmem:[%s8862_s7 + $0x68] sm:$0xff]  }
 0x125   : > { %v7413_v56 = vadd.f32 %v7206_v36, %v815_v55  ;;  %v816_v14 = vmul.f32 %v7200_v33, %v768_v57  ;;  %6140 = vmatprep.mubr.bf16.mxu1 %v902_v27  ;;  %v6949_v27 = vld [vmem:[%s8862_s7 + $0x70] sm:$0xff]  }
 0x126   : > { %8985 = vst [vmem:[#allocation32_spill] sm:$0xff] %v7417_v60  ;;  %v7420_v11 = vadd.f32 %v7206_v36, %v818_v29  ;;  %6141 = vmatmul.mubr.bf16.gmra.mrb[24].mxu1 %v903_v59  ;;  %v8879_v26 = vmax.f32 %v7417_v60, 0.0  ;;  %v6946_v59 = vld [vmem:[%s8862_s7 + $0x60] sm:$0xff]   ;;  %v6951_v29 = vld [vmem:[%s8862_s7 + $0x78] sm:$0xff]   ;;  %v9002_v60 = vmov 0 }
 0x127   : > { %8984 = vst [vmem:[#allocation31_spill] sm:$0xff] %v7413_v56  ;;  %v7423_v24 = vadd.f32 %v7206_v36, %v816_v14  ;;  %v8880_v58 = vmax.f32 %v7413_v56, 0.0  ;;  %v6945_v36 = vld [vmem:[%s8862_s7 + $0x58] sm:$0xff]   ;;  %v7025_v14 = vmov 0.0  }
 0x128   : > { %8986 = vst [vmem:[#allocation33_spill] sm:$0xff] %v7420_v11  ;;  %v8877_v6 = vmax.f32 %v7420_v11, 0.0  ;;  %6154 = vmatprep.subr.bf16.mxu1 %v6945_v36  ;;  %1242 = vst [vmem:[#allocation2 + $0x8] sm:$0xff] %v7025_v14 }
 0x129   : > { %8987 = vst [vmem:[#allocation34_spill] sm:$0xff] %v7423_v24  ;;  %v8878_v55 = vmax.f32 %v7423_v24, 0.0  ;;  %6155 = vmatpush3.bf16.msra.mxu1 %v6945_v36  ;;  %1243 = vst [vmem:[#allocation2 + $0x10] sm:$0xff] %v7025_v14  ;;  %v6950_v36 = vld [vmem:[%s8862_s7 + $0xf8] sm:$0xff]  }
 0x12a   : > { %v905_v57 = vpack.c.bf16 %v8877_v6, %v8879_v26  ;;  %6156 = vmatprep.subr.bf16.mxu1 %v6946_v59  ;;  %1241 = vst [vmem:[#allocation2] sm:$0xff] %v7025_v14  ;;  %1244 = vst [vmem:[#allocation2 + $0x118] sm:$0xff] %v7025_v14 }
 0x12b   : > { %v904_v33 = vpack.c.bf16 %v8878_v55, %v8880_v58  ;;  %1245 = vst [vmem:[#allocation2 + $0x120] sm:$0xff] %v7025_v14  ;;  %1246 = vst [vmem:[#allocation2 + $0x128] sm:$0xff] %v7025_v14 }
 0x12d   : > { %6144 = vmatprep.mubr.bf16.mxu1 %v904_v33  ;;  %6157 = vmatpush3.bf16.msra.mxu1 %v6946_v59  ;;  %v6947_v33 = vld [vmem:[%s8862_s7 + $0xf0] sm:$0xff]   ;;  %v7461_v59 = vld [vmem:[%s8862_s7 + $0x100] sm:$0xff]  }
 0x12e   : > { %6145 = vmatmul.mubr.bf16.gmra.mrb[28].mxu1 %v905_v57  ;;  %6158 = vmatprep.subr.bf16.mxu1 %v6948_v17  ;;  %v7026_v57 = vmov 0.0|0.0  }
 0x12f   : > { %6164 = vmatprep.mubr.bf16.mxu1 %v7026_v57  ;;  %6304 = vmatprep.subr.bf16.mxu0 %v6947_v33 }
 0x130   : > { %6305 = vmatpush3.bf16.msra.mxu0 %v6947_v33  ;;  %v7475_v33 = vld [vmem:[%s8861_s6] ss:$0 sm:$0xff] }
 0x131   : > { %6159 = vmatpush3.bf16.msra.mxu1 %v6948_v17  ;;  %6306 = vmatprep.subr.bf16.mxu0 %v6950_v36  ;;  %v6956_v17 = vld [vmem:[%s8862_s7] sm:$0xff]  }
 0x132   : > { %6160 = vmatprep.subr.bf16.mxu1 %v6949_v27 }
 0x134   : > { %6307 = vmatpush3.bf16.msra.mxu0 %v6950_v36 }
 0x135   : > { %6161 = vmatpush3.bf16.msra.mxu1 %v6949_v27  ;;  %6340 = vmatprep.subr.bf16.mxu0 %v7461_v59  ;;  %v7470_v27 = vld [vmem:[%s8860_s5] ss:$0 sm:$0xff] }
 0x136   : > { %6162 = vmatprep.subr.bf16.mxu1 %v6951_v29 }
 0x139   : > { %6163 = vmatpush3.bf16.msra.mxu1 %v6951_v29  ;;  %v1279_v29 = vlaneseq }
 0x13a   : > { %6196 = vmatprep.subr.bf16.mxu1 %v6956_v17 }
 0x13b   : > { %v7481_v13 = vshrl.u32 %v1279_v29, 7 }
 0x13d   : > { %v1282_v42 = vadd.s32 16, %v7481_v13  ;;  %v1316_v29 = vand.u32 15, %v7481_v13 }
 0x13f   : > { %v1330_v25 = vand.u32 15, %v1282_v42  ;;  %vm7503_vm1 = vcmp.ge.s32.totalorder %v1316_v29, 1 }
 0x140   : > { %vm7522_vm4 = vmpackc.low %vm8938_vm3, %vm7503_vm1 }
 0x141   : > { %vm7514_vm2 = vcmp.ge.s32.totalorder %v1330_v25, 1 }
 0x142   : > { %vm7535_vm5 = vmpackc.low %vm8938_vm3, %vm7514_vm2 }
 0x1c9   : > { %v6118_v14 = vpop.f32.mrb[0].mxu1 }
 0x1ca   : > { %v1140_v57 = vmul.f32 %v6118_v14, %v7470_v27  ;;  %v1004_v36 = vpop.f32.mrb[1].mxu1 }
 0x1cb   : > { %v1138_v6 = vmul.f32 %v7470_v27, %v1004_v36  ;;  %v6119_v55 = vpop.f32.mrb[2].mxu1 }
 0x1cc   : > { %v1179_v26 = vadd.f32 %v7475_v33, %v1140_v57  ;;  %v1141_v58 = vmul.f32 %v6119_v55, %v7470_v27  ;;  %v1007_v62 = vpop.f32.mrb[3].mxu1 }
 0x1cd   : > { %v1177_v15 = vadd.f32 %v7475_v33, %v1138_v6  ;;  %v1139_v12 = vmul.f32 %v7470_v27, %v1007_v62 }
 0x1ce   : > { %v1211_v41 = vmax.f32 %v1179_v26, 0.0  ;;  %v1180_v48 = vadd.f32 %v7475_v33, %v1141_v58 }
 0x1cf   : > { %v1209_v53 = vmax.f32 %v1177_v15, 0.0  ;;  %v1178_v14 = vadd.f32 %v7475_v33, %v1139_v12 }
 0x1d0   : > { %1249 = vst [vmem:[#allocation2 + $0x28] sm:$0xff] %v1211_v41  ;;  %v1212_v36 = vmax.f32 %v1180_v48, 0.0  ;;  %v6958_v48 = vld [vmem:[%s8862_s7 + $0x8] sm:$0xff]  }
 0x1d1   : > { %1247 = vst [vmem:[#allocation2 + $0x18] sm:$0xff] %v1209_v53  ;;  %v1210_v57 = vmax.f32 %v1178_v14, 0.0  ;;  %v6122_v55 = vpop.f32.mrb[4].mxu1 }
 0x1d2   : > { %1250 = vst [vmem:[#allocation2 + $0x30] sm:$0xff] %v1212_v36  ;;  %v1144_v6 = vmul.f32 %v6122_v55, %v7470_v27  ;;  %v1020_v21 = vpop.f32.mrb[5].mxu1  ;;  %v7490_v62 = vpack.c.bf16 %v1212_v36, %v1211_v41 }
 0x1d3   : > { %1248 = vst [vmem:[#allocation2 + $0x20] sm:$0xff] %v1210_v57  ;;  %v1142_v15 = vmul.f32 %v7470_v27, %v1020_v21  ;;  %v6123_v58 = vpop.f32.mrb[6].mxu1  ;;  %v7493_v12 = vpack.c.bf16 %v1210_v57, %v1209_v53  ;;  %v1284_v57 = vadd.s32 32, %v7481_v13 }
 0x1d4   : > { %v1183_v26 = vadd.f32 %v7475_v33, %v1144_v6  ;;  %v1145_v14 = vmul.f32 %v6123_v58, %v7470_v27  ;;  %v1023_v23 = vpop.f32.mrb[7].mxu1  ;;  %v1286_v58 = vadd.s32 48, %v7481_v13 }
 0x1d5   : > { %v1181_v55 = vadd.f32 %v7475_v33, %v1142_v15  ;;  %v1143_v41 = vmul.f32 %v7470_v27, %v1023_v23  ;;  %6165 = vmatmul.mubr.bf16.vlgmr.msra.gmra.mrb[32].mxu1 %v7493_v12  ;;  %v6959_v23 = vld [vmem:[%s8862_s7 + $0x10] sm:$0xff]   ;;  %v1344_v5 = vand.u32 15, %v1284_v57  ;;  %v6961_v15 = vld [vmem:[%s8862_s7 + $0x18] sm:$0xff]  }
 0x1d6   : > { %v1215_v53 = vmax.f32 %v1183_v26, 0.0  ;;  %v1184_v36 = vadd.f32 %v7475_v33, %v1145_v14  ;;  %6168 = vmatprep.mubr.bf16.mxu1 %v7490_v62  ;;  %6197 = vmatpush3.bf16.msra.mxu1 %v6956_v17  ;;  %v7002_v17 = vld [vmem:[%s8862_s7 + $0x1d0] sm:$0xff]  }
 0x1d7   : > { %v1213_v6 = vmax.f32 %v1181_v55, 0.0  ;;  %v1182_v42 = vadd.f32 %v7475_v33, %v1143_v41  ;;  %6198 = vmatprep.subr.bf16.mxu1 %v6958_v48  ;;  %vm7561_vm6 = vcmp.ge.s32.totalorder %v1344_v5, 1  ;;  %v6954_v5 = vld [vmem:[%s8862_s7 + $0x110] sm:$0xff]  }
 0x1d8   : > { %1253 = vst [vmem:[#allocation2 + $0x48] sm:$0xff] %v1215_v53  ;;  %v1216_v29 = vmax.f32 %v1184_v36, 0.0  ;;  %v2677_v36 = vld [vmem:[#allocation2 + $0x17] sm:$0xff]  ;;  %vm7580_vm8 = vmpackc.low %vm8938_vm3, %vm7561_vm6 }
 0x1d9   : > { %1251 = vst [vmem:[#allocation2 + $0x38] sm:$0xff] %v1213_v6  ;;  %v1214_v26 = vmax.f32 %v1182_v42, 0.0  ;;  %v6126_v14 = vpop.f32.mrb[8].mxu1  ;;  %v2680_v55 = vld [vmem:[#allocation2 + $0x2f] sm:$0xff] }
 0x1da   : > { %1254 = vst [vmem:[#allocation2 + $0x50] sm:$0xff] %v1216_v29  ;;  %v1148_v25 = vmul.f32 %v6126_v14, %v7470_v27  ;;  %v1036_v41 = vpop.f32.mrb[9].mxu1  ;;  %v2678_v22 = vld [vmem:[#allocation2 + $0x1f] sm:$0xff]  ;;  %v2679_v2 = vld [vmem:[#allocation2 + $0x27] sm:$0xff]  ;;  %v7527_v7 = vpack.c.bf16 %v1216_v29, %v1215_v53  ;;  %6199 = vmatpush3.bf16.msra.mxu1 %v6958_v48  ;;  %v1358_v29 = vand.u32 15, %v1286_v58 }
 0x1db   : > { %1252 = vst [vmem:[#allocation2 + $0x40] sm:$0xff] %v1214_v26  ;;  %v1146_v21 = vmul.f32 %v7470_v27, %v1036_v41  ;;  %v6127_v42 = vpop.f32.mrb[10].mxu1  ;;  %v7530_v4 = vpack.c.bf16 %v2678_v22, %v2677_v36  ;;  %v7539_v14 = vpack.c.bf16 %v2680_v55, %v2679_v2  ;;  %v7541_v50 = vpack.c.bf16 %v1214_v26, %v1213_v6  ;;  %v6953_v22 = vld [vmem:[%s8862_s7 + $0x108] sm:$0xff]  }
 0x1dc   : > { %6200 = vmatprep.subr.bf16.mxu1 %v6959_v23  ;;  %v1187_v48 = vadd.f32 %v7475_v33, %v1148_v25  ;;  %v1149_v53 = vmul.f32 %v6127_v42, %v7470_v27  ;;  %v1039_v57 = vpop.f32.mrb[11].mxu1  ;;  %v1288_v25 = vadd.s32 64, %v7481_v13  ;;  %vm7569_vm7 = vcmp.ge.s32.totalorder %v1358_v29, 1 }
 0x1dd   : > { %v1185_v2 = vadd.f32 %v7475_v33, %v1146_v21  ;;  %v1147_v6 = vmul.f32 %v7470_v27, %v1039_v57  ;;  %6308 = vmatprep.mubr.msk.bf16.mxu0 %vm7522_vm4, %v7530_v4  ;;  %6169 = vmatmul.mubr.bf16.gmra.mrb[36].mxu1 %v7541_v50  ;;  %vm7593_vm9 = vmpackc.low %vm8938_vm3, %vm7569_vm7 }
 0x1de   : > { %v1219_v26 = vmax.f32 %v1187_v48, 0.0  ;;  %v1188_v55 = vadd.f32 %v7475_v33, %v1149_v53  ;;  %6309 = vmatmul.mubr.msk.bf16.vlgmr.msra.gmra.mrb[32].mxu0 %vm7535_vm5, %v7539_v14  ;;  %6172 = vmatprep.mubr.bf16.mxu1 %v7527_v7  ;;  %v1290_v48 = vadd.s32 80, %v7481_v13  ;;  %v1372_v49 = vand.u32 15, %v1288_v25 }
 0x1df   : > { %v1217_v41 = vmax.f32 %v1185_v2, 0.0  ;;  %v1186_v36 = vadd.f32 %v7475_v33, %v1147_v6  ;;  %6341 = vmatpush3.bf16.msra.mxu0 %v7461_v59  ;;  %6201 = vmatpush3.bf16.msra.mxu1 %v6959_v23  ;;  %v9003_v60 = vsel %vm7593_vm9, 4294967295, %v9002_v60  ;;  %v7004_v59 = vld [vmem:[%s8862_s7 + $0x1e0] sm:$0xff]  }
 0x1e0   : > { %1257 = vst [vmem:[#allocation2 + $0x68] sm:$0xff] %v1219_v26  ;;  %v1220_v21 = vmax.f32 %v1188_v55, 0.0  ;;  %6342 = vmatprep.subr.bf16.mxu0 %v6953_v22  ;;  %6202 = vmatprep.subr.bf16.mxu1 %v6961_v15  ;;  %v2681_v6 = vld [vmem:[#allocation2 + $0x37] sm:$0xff]  ;;  %v1386_v42 = vand.u32 15, %v1290_v48  ;;  %vm7622_vm10 = vcmp.ge.s32.totalorder %v1372_v49, 1  ;;  %v1294_v49 = vadd.s32 112, %v7481_v13 }
 0x1e1   : > { %1255 = vst [vmem:[#allocation2 + $0x58] sm:$0xff] %v1217_v41  ;;  %v1218_v53 = vmax.f32 %v1186_v36, 0.0  ;;  %v6130_v57 = vpop.f32.mrb[12].mxu1  ;;  %v2684_v23 = vld [vmem:[#allocation2 + $0x4f] sm:$0xff]  ;;  %vm7640_vm12 = vmpackc.low %vm8938_vm3, %vm7622_vm10 }
 0x1e2   : > { %1258 = vst [vmem:[#allocation2 + $0x70] sm:$0xff] %v1220_v21  ;;  %v1152_v29 = vmul.f32 %v6130_v57, %v7470_v27  ;;  %v1052_v2 = vpop.f32.mrb[13].mxu1  ;;  %v2682_v55 = vld [vmem:[#allocation2 + $0x3f] sm:$0xff]  ;;  %v2683_v51 = vld [vmem:[#allocation2 + $0x47] sm:$0xff]  ;;  %v7585_v11 = vpack.c.bf16 %v1220_v21, %v1219_v26  ;;  %vm7629_vm11 = vcmp.ge.s32.totalorder %v1386_v42, 1 }
 0x1e3   : > { %1256 = vst [vmem:[#allocation2 + $0x60] sm:$0xff] %v1218_v53  ;;  %v1150_v36 = vmul.f32 %v7470_v27, %v1052_v2  ;;  %v6131_v58 = vpop.f32.mrb[14].mxu1  ;;  %v7588_v24 = vpack.c.bf16 %v2682_v55, %v2681_v6  ;;  %v7597_v57 = vpack.c.bf16 %v2684_v23, %v2683_v51  ;;  %6343 = vmatpush3.bf16.msra.mxu0 %v6953_v22  ;;  %v6962_v26 = vld [vmem:[%s8862_s7 + $0x20] sm:$0xff]   ;;  %v6955_v6 = vld [vmem:[%s8862_s7 + $0x118] sm:$0xff]   ;;  %v1292_v23 = vadd.s32 96, %v7481_v13  ;;  %vm7653_vm13 = vmpackc.low %vm8938_vm3, %vm7629_vm11 }
 0x1e4   : > { %v7599_v56 = vpack.c.bf16 %v1218_v53, %v1217_v41  ;;  %v1191_v25 = vadd.f32 %v7475_v33, %v1152_v29  ;;  %v1153_v21 = vmul.f32 %v6131_v58, %v7470_v27  ;;  %v1055_v2 = vpop.f32.mrb[15].mxu1  ;;  %6344 = vmatprep.subr.bf16.mxu0 %v6954_v5  ;;  %6203 = vmatpush3.bf16.msra.mxu1 %v6961_v15  ;;  %v6964_v41 = vld [vmem:[%s8862_s7 + $0x28] sm:$0xff]   ;;  %v9011_v52 = vsel %vm7653_vm13, 4294967295, %v9010_v52 }
 0x1e5   : > { %v1189_v51 = vadd.f32 %v7475_v33, %v1150_v36  ;;  %v1151_v22 = vmul.f32 %v7470_v27, %v1055_v2  ;;  %6312 = vmatprep.mubr.msk.bf16.mxu0 %vm7580_vm8, %v7588_v24  ;;  %6204 = vmatprep.subr.bf16.mxu1 %v6962_v26  ;;  %v1414_v58 = vand.u32 15, %v1294_v49 }
 0x1e6   : > { %6173 = vmatmul.mubr.bf16.gmra.mrb[40].mxu1 %v7599_v56  ;;  %v1223_v48 = vmax.f32 %v1191_v25, 0.0  ;;  %v1192_v53 = vadd.f32 %v7475_v33, %v1153_v21  ;;  %6313 = vmatmul.mubr.msk.bf16.gmra.mrb[36].mxu0 %vm7593_vm9, %v7597_v57  ;;  %v6957_v25 = vld [vmem:[%s8862_s7 + $0x120] sm:$0xff]  }
 0x1e7   : > { %6176 = vmatprep.mubr.bf16.mxu1 %v7585_v11  ;;  %v1221_v29 = vmax.f32 %v1189_v51, 0.0  ;;  %v1190_v55 = vadd.f32 %v7475_v33, %v1151_v22  ;;  %6345 = vmatpush3.bf16.msra.mxu0 %v6954_v5  ;;  %v9008_v5 = vmov 0  ;;  %vm7689_vm15 = vcmp.ge.s32.totalorder %v1414_v58, 1 }
 0x1e8   : > { %1261 = vst [vmem:[#allocation2 + $0x88] sm:$0xff] %v1223_v48  ;;  %v1224_v36 = vmax.f32 %v1192_v53, 0.0  ;;  %6346 = vmatprep.subr.bf16.mxu0 %v6955_v6  ;;  %6205 = vmatpush3.bf16.msra.mxu1 %v6962_v26  ;;  %v9009_v5 = vsel %vm7640_vm12, 4294967295, %v9008_v5  ;;  %v2685_v53 = vld [vmem:[#allocation2 + $0x57] sm:$0xff]  ;;  %v1400_v26 = vand.u32 15, %v1292_v23  ;;  %vm7713_vm1 = vmpackc.low %vm8938_vm3, %vm7689_vm15 }
 0x1e9   : > { %1259 = vst [vmem:[#allocation2 + $0x78] sm:$0xff] %v1221_v29  ;;  %v1222_v21 = vmax.f32 %v1190_v55, 0.0  ;;  %v6134_v2 = vpop.f32.mrb[16].mxu1  ;;  %v2688_v42 = vld [vmem:[#allocation2 + $0x6f] sm:$0xff]  ;;  %6206 = vmatprep.subr.bf16.mxu1 %v6964_v41  ;;  %v9019_v8 = vsel %vm7713_vm1, 4294967295, %v9018_v8 }
 0x1ea   : > { %1262 = vst [vmem:[#allocation2 + $0x90] sm:$0xff] %v1224_v36  ;;  %v1156_v51 = vmul.f32 %v6134_v2, %v7470_v27  ;;  %v1068_v22 = vpop.f32.mrb[17].mxu1  ;;  %v2686_v31 = vld [vmem:[#allocation2 + $0x5f] sm:$0xff]  ;;  %v2687_v34 = vld [vmem:[#allocation2 + $0x67] sm:$0xff]  ;;  %v7645_v30 = vpack.c.bf16 %v1224_v36, %v1223_v48  ;;  %v6965_v48 = vld [vmem:[%s8862_s7 + $0x30] sm:$0xff]   ;;  %vm7682_vm14 = vcmp.ge.s32.totalorder %v1400_v26, 1 }
 0x1eb   : > { %1260 = vst [vmem:[#allocation2 + $0x80] sm:$0xff] %v1222_v21  ;;  %v1154_v15 = vmul.f32 %v7470_v27, %v1068_v22  ;;  %v6135_v55 = vpop.f32.mrb[18].mxu1  ;;  %v7648_v28 = vpack.c.bf16 %v2686_v31, %v2685_v53  ;;  %v7657_v2 = vpack.c.bf16 %v2688_v42, %v2687_v34  ;;  %v7659_v54 = vpack.c.bf16 %v1222_v21, %v1221_v29  ;;  %v6960_v22 = vld [vmem:[%s8862_s7 + $0x128] sm:$0xff]   ;;  %v6967_v29 = vld [vmem:[%s8862_s7 + $0x38] sm:$0xff]   ;;  %vm7700_vm0 = vmpackc.low %vm8938_vm3, %vm7682_vm14 }
 0x1ec   : > { %6347 = vmatpush3.bf16.msra.mxu0 %v6955_v6  ;;  %v1195_v23 = vadd.f32 %v7475_v33, %v1156_v51  ;;  %v1157_v31 = vmul.f32 %v6135_v55, %v7470_v27  ;;  %v1071_v36 = vpop.f32.mrb[19].mxu1  ;;  %6207 = vmatpush3.bf16.msra.mxu1 %v6964_v41  ;;  %v1296_v42 = vadd.s32 128, %v7481_v13  ;;  %v1298_v26 = vadd.s32 144, %v7481_v13 }
 0x1ed   : > { %6348 = vmatprep.subr.bf16.mxu0 %v6957_v25  ;;  %v1193_v34 = vadd.f32 %v7475_v33, %v1154_v15  ;;  %v1155_v6 = vmul.f32 %v7470_v27, %v1071_v36  ;;  %6316 = vmatprep.mubr.msk.bf16.mxu0 %vm7640_vm12, %v7648_v28 }
 0x1ee   : > { %6177 = vmatmul.mubr.bf16.gmra.mrb[44].mxu1 %v7659_v54  ;;  %v1227_v49 = vmax.f32 %v1195_v23, 0.0  ;;  %v1196_v21 = vadd.f32 %v7475_v33, %v1157_v31  ;;  %6317 = vmatmul.mubr.msk.bf16.gmra.mrb[40].mxu0 %vm7653_vm13, %v7657_v2  ;;  %v6963_v23 = vld [vmem:[%s8862_s7 + $0x130] sm:$0xff]   ;;  %v1442_v55 = vand.u32 15, %v1298_v26 }
 0x1ef   : > { %6180 = vmatprep.mubr.bf16.mxu1 %v7645_v30  ;;  %v1225_v51 = vmax.f32 %v1193_v34, 0.0  ;;  %v1194_v53 = vadd.f32 %v7475_v33, %v1155_v6  ;;  %6208 = vmatprep.subr.bf16.mxu1 %v6965_v48 }
 0x1f0   : > { %6349 = vmatpush3.bf16.msra.mxu0 %v6957_v25  ;;  %1265 = vst [vmem:[#allocation2 + $0xa8] sm:$0xff] %v1227_v49  ;;  %v1228_v15 = vmax.f32 %v1196_v21, 0.0  ;;  %6209 = vmatpush3.bf16.msra.mxu1 %v6965_v48  ;;  %v9016_v25 = vmov 0  ;;  %v2689_v21 = vld [vmem:[#allocation2 + $0x77] sm:$0xff]  ;;  %v1428_v48 = vand.u32 15, %v1296_v42  ;;  %vm7749_vm6 = vcmp.ge.s32.totalorder %v1442_v55, 1 }
 0x1f1   : > { %6350 = vmatprep.subr.bf16.mxu0 %v6960_v22  ;;  %1263 = vst [vmem:[#allocation2 + $0x98] sm:$0xff] %v1225_v51  ;;  %v1226_v31 = vmax.f32 %v1194_v53, 0.0  ;;  %v6138_v36 = vpop.f32.mrb[20].mxu1  ;;  %v9017_v25 = vsel %vm7700_vm0, 4294967295, %v9016_v25  ;;  %v2692_v58 = vld [vmem:[#allocation2 + $0x8f] sm:$0xff]  ;;  %6210 = vmatprep.subr.bf16.mxu1 %v6967_v29  ;;  %vm7775_vm10 = vmpackc.low %vm8938_vm3, %vm7749_vm6 }
 0x1f2   : > { %1266 = vst [vmem:[#allocation2 + $0xb0] sm:$0xff] %v1228_v15  ;;  %v1160_v34 = vmul.f32 %v6138_v36, %v7470_v27  ;;  %v1084_v6 = vpop.f32.mrb[21].mxu1  ;;  %v2690_v37 = vld [vmem:[#allocation2 + $0x7f] sm:$0xff]  ;;  %v2691_v32 = vld [vmem:[#allocation2 + $0x87] sm:$0xff]  ;;  %v7705_v9 = vpack.c.bf16 %v1228_v15, %v1227_v49  ;;  %vm7741_vm2 = vcmp.ge.s32.totalorder %v1428_v48, 1  ;;  %v1302_v48 = vadd.s32 176, %v7481_v13 }
 0x1f3   : > { %1264 = vst [vmem:[#allocation2 + $0xa0] sm:$0xff] %v1226_v31  ;;  %v1158_v41 = vmul.f32 %v7470_v27, %v1084_v6  ;;  %v6139_v53 = vpop.f32.mrb[22].mxu1  ;;  %v7708_v10 = vpack.c.bf16 %v2690_v37, %v2689_v21  ;;  %v7717_v36 = vpack.c.bf16 %v2692_v58, %v2691_v32  ;;  %v7719_v3 = vpack.c.bf16 %v1226_v31, %v1225_v51  ;;  %v7724_v49 = vld [vmem:[%s8862_s7 + $0x80] sm:$0xff]   ;;  %v6966_v32 = vld [vmem:[%s8862_s7 + $0x138] sm:$0xff]   ;;  %vm7762_vm7 = vmpackc.low %vm8938_vm3, %vm7741_vm2 }
 0x1f4   : > { %6351 = vmatpush3.bf16.msra.mxu0 %v6960_v22  ;;  %v1199_v37 = vadd.f32 %v7475_v33, %v1160_v34  ;;  %v1161_v42 = vmul.f32 %v6139_v53, %v7470_v27  ;;  %v1087_v15 = vpop.f32.mrb[23].mxu1  ;;  %6211 = vmatpush3.bf16.msra.mxu1 %v6967_v29  ;;  %v1300_v29 = vadd.s32 160, %v7481_v13  ;;  %v7757_v53 = vld [vmem:[%s8862_s7 + $0x140] sm:$0xff]   ;;  %v9027_v19 = vsel %vm7775_vm10, 4294967295, %v9026_v19 }
 0x1f5   : > { %6352 = vmatprep.subr.bf16.mxu0 %v6963_v23  ;;  %v1197_v51 = vadd.f32 %v7475_v33, %v1158_v41  ;;  %v1159_v22 = vmul.f32 %v7470_v27, %v1087_v15  ;;  %6320 = vmatprep.mubr.msk.bf16.mxu0 %vm7700_vm0, %v7708_v10 }
 0x1f6   : > { %6181 = vmatmul.mubr.bf16.gmra.mrb[48].mxu1 %v7719_v3  ;;  %v1231_v31 = vmax.f32 %v1199_v37, 0.0  ;;  %v1200_v58 = vadd.f32 %v7475_v33, %v1161_v42  ;;  %6321 = vmatmul.mubr.msk.bf16.gmra.mrb[44].mxu0 %vm7713_vm1, %v7717_v36  ;;  %v1456_v40 = vand.u32 15, %v1300_v29 }
 0x1f7   : > { %6184 = vmatprep.mubr.bf16.mxu1 %v7705_v9  ;;  %v1229_v34 = vmax.f32 %v1197_v51, 0.0  ;;  %v1198_v6 = vadd.f32 %v7475_v33, %v1159_v22  ;;  %6244 = vmatprep.subr.bf16.mxu1 %v7724_v49 }
 0x1f8   : > { %6353 = vmatpush3.bf16.msra.mxu0 %v6963_v23  ;;  %1269 = vst [vmem:[#allocation2 + $0xc8] sm:$0xff] %v1231_v31  ;;  %v1232_v21 = vmax.f32 %v1200_v58, 0.0  ;;  %v9024_v23 = vmov 0  ;;  %v2693_v22 = vld [vmem:[#allocation2 + $0x97] sm:$0xff]  ;;  %vm1748_vm11 = vcmp.ge.s32.totalorder %v1456_v40, 1  ;;  %v9030_v40 = vmov 0 }
 0x1f9   : > { %6354 = vmatprep.subr.bf16.mxu0 %v6966_v32  ;;  %1267 = vst [vmem:[#allocation2 + $0xb8] sm:$0xff] %v1229_v34  ;;  %v1230_v37 = vmax.f32 %v1198_v6, 0.0  ;;  %v6142_v42 = vpop.f32.mrb[24].mxu1  ;;  %v9025_v23 = vsel %vm7762_vm7, 4294967295, %v9024_v23  ;;  %v2696_v15 = vld [vmem:[#allocation2 + $0xaf] sm:$0xff]  ;;  %vm7805_vm15 = vmpackc.low %vm8938_vm3, %vm1748_vm11 }
 0x1fa   : > { %1270 = vst [vmem:[#allocation2 + $0xd0] sm:$0xff] %v1232_v21  ;;  %v1164_v55 = vmul.f32 %v6142_v42, %v7470_v27  ;;  %v1100_v51 = vpop.f32.mrb[25].mxu1  ;;  %v2694_v58 = vld [vmem:[#allocation2 + $0x9f] sm:$0xff]  ;;  %v2695_v39 = vld [vmem:[#allocation2 + $0xa7] sm:$0xff]  ;;  %v7767_v38 = vpack.c.bf16 %v1232_v21, %v1231_v31  ;;  %v9031_v40 = vsel %vm7805_vm15, 4294967295, %v9030_v40 }
 0x1fb   : > { %1268 = vst [vmem:[#allocation2 + $0xc0] sm:$0xff] %v1230_v37  ;;  %v1162_v6 = vmul.f32 %v7470_v27, %v1100_v51  ;;  %v6143_v26 = vpop.f32.mrb[26].mxu1  ;;  %v7770_v35 = vpack.c.bf16 %v2694_v58, %v2693_v22  ;;  %v7779_v42 = vpack.c.bf16 %v2696_v15, %v2695_v39  ;;  %v7781_v20 = vpack.c.bf16 %v1230_v37, %v1229_v34 }
 0x1fc   : > { %6355 = vmatpush3.bf16.msra.mxu0 %v6966_v32  ;;  %v1203_v31 = vadd.f32 %v7475_v33, %v1164_v55  ;;  %v1165_v29 = vmul.f32 %v6143_v26, %v7470_v27  ;;  %v1103_v21 = vpop.f32.mrb[27].mxu1  ;;  %v1470_v51 = vand.u32 15, %v1302_v48  ;;  %v1304_v34 = vadd.s32 192, %v7481_v13 }
 0x1fd   : > { %6388 = vmatprep.subr.bf16.mxu0 %v7757_v53  ;;  %v1201_v41 = vadd.f32 %v7475_v33, %v1162_v6  ;;  %v1163_v22 = vmul.f32 %v7470_v27, %v1103_v21  ;;  %6324 = vmatprep.mubr.msk.bf16.mxu0 %vm7762_vm7, %v7770_v35  ;;  %v1306_v58 = vadd.s32 208, %v7481_v13 }
 0x1fe   : > { %6185 = vmatmul.mubr.bf16.gmra.mrb[52].mxu1 %v7781_v20  ;;  %v1235_v39 = vmax.f32 %v1203_v31, 0.0  ;;  %v1204_v32 = vadd.f32 %v7475_v33, %v1165_v29  ;;  %6325 = vmatmul.mubr.msk.bf16.gmra.mrb[48].mxu0 %vm7775_vm10, %v7779_v42  ;;  %vm7799_vm14 = vcmp.ge.s32.totalorder %v1470_v51, 1 }
 0x1ff   : > { %6188 = vmatprep.mubr.bf16.mxu1 %v7767_v38  ;;  %v1233_v48 = vmax.f32 %v1201_v41, 0.0  ;;  %v1202_v37 = vadd.f32 %v7475_v33, %v1163_v22  ;;  %vm7818_vm2 = vmpackc.low %vm8938_vm3, %vm7799_vm14 }
 0x200   : > { %1273 = vst [vmem:[#allocation2 + $0xe8] sm:$0xff] %v1235_v39  ;;  %v1236_v15 = vmax.f32 %v1204_v32, 0.0  ;;  %v2697_v41 = vld [vmem:[#allocation2 + $0xb7] sm:$0xff]  ;;  %v1484_v32 = vand.u32 15, %v1304_v34  ;;  %v9033_v1 = vsel %vm7818_vm2, 4294967295, %v9032_v1 }
 0x201   : > { %1271 = vst [vmem:[#allocation2 + $0xd8] sm:$0xff] %v1233_v48  ;;  %v1234_v6 = vmax.f32 %v1202_v37, 0.0  ;;  %v6146_v26 = vpop.f32.mrb[28].mxu1  ;;  %v2700_v31 = vld [vmem:[#allocation2 + $0xcf] sm:$0xff] }
 0x202   : > { %1274 = vst [vmem:[#allocation2 + $0xf0] sm:$0xff] %v1236_v15  ;;  %v1168_v29 = vmul.f32 %v6146_v26, %v7470_v27  ;;  %v1116_v21 = vpop.f32.mrb[29].mxu1  ;;  %v2698_v51 = vld [vmem:[#allocation2 + $0xbf] sm:$0xff]  ;;  %v2699_v22 = vld [vmem:[#allocation2 + $0xc7] sm:$0xff]  ;;  %v7810_v18 = vpack.c.bf16 %v1236_v15, %v1235_v39  ;;  %vm1752_vm6 = vcmp.ge.s32.totalorder %v1484_v32, 1  ;;  %v9036_v32 = vmov 0 }
 0x203   : > { %1272 = vst [vmem:[#allocation2 + $0xe0] sm:$0xff] %v1234_v6  ;;  %v1166_v37 = vmul.f32 %v7470_v27, %v1116_v21  ;;  %v6147_v16 = vpop.f32.mrb[30].mxu1  ;;  %v7813_v0 = vpack.c.bf16 %v2698_v51, %v2697_v41  ;;  %v7822_v26 = vpack.c.bf16 %v2700_v31, %v2699_v22  ;;  %v7824_v63 = vpack.c.bf16 %v1234_v6, %v1233_v48  ;;  %v1696_v6 = vld [vmem:[#allocation2 + $0x7] sm:$0xff]  ;;  %v1697_v31 = vld [vmem:[#allocation2 + $0xf] sm:$0xff]  ;;  %vm7847_vm14 = vmpackc.low %vm8938_vm3, %vm1752_vm6 }
 0x204   : > { %v1207_v39 = vadd.f32 %v7475_v33, %v1168_v29  ;;  %v1169_v34 = vmul.f32 %v6147_v16, %v7470_v27  ;;  %v1119_v15 = vpop.f32.mrb[31].mxu1  ;;  %v1498_v21 = vand.u32 15, %v1306_v58  ;;  %v1308_v16 = vadd.s32 224, %v7481_v13 }
 0x205   : > { %v1205_v41 = vadd.f32 %v7475_v33, %v1166_v37  ;;  %v1167_v51 = vmul.f32 %v7470_v27, %v1119_v15  ;;  %6328 = vmatprep.mubr.msk.bf16.mxu0 %vm7805_vm15, %v7813_v0  ;;  %v1310_v37 = vadd.s32 240, %v7481_v13  ;;  %v9037_v32 = vsel %vm7847_vm14, 4294967295, %v9036_v32 }
 0x206   : > { %6189 = vmatmul.mubr.bf16.gmra.mrb[56].mxu1 %v7824_v63  ;;  %v1239_v55 = vmax.f32 %v1207_v39, 0.0  ;;  %v1208_v48 = vadd.f32 %v7475_v33, %v1169_v34  ;;  %6329 = vmatmul.mubr.msk.bf16.gmra.mrb[52].mxu0 %vm7818_vm2, %v7822_v26  ;;  %vm7841_vm11 = vcmp.ge.s32.totalorder %v1498_v21, 1  ;;  %v9042_v22 = vmov 0 }
 0x207   : > { %6192 = vmatprep.mubr.bf16.mxu1 %v7810_v18  ;;  %v1237_v58 = vmax.f32 %v1205_v41, 0.0  ;;  %v1206_v27 = vadd.f32 %v7475_v33, %v1167_v51  ;;  %v1512_v51 = vand.u32 15, %v1308_v16  ;;  %vm7858_vm2 = vmpackc.low %vm8938_vm3, %vm7841_vm11  ;;  %v1526_v44 = vand.u32 15, %v1310_v37 }
 0x208   : > { %1277 = vst [vmem:[#allocation2 + $0x108] sm:$0xff] %v1239_v55  ;;  %v1240_v29 = vmax.f32 %v1208_v48, 0.0  ;;  %v2701_v33 = vld [vmem:[#allocation2 + $0xd7] sm:$0xff]  ;;  %v5313_v48 = vpack.c.bf16 %v1697_v31, %v1696_v6 }
 0x209   : > { %1275 = vst [vmem:[#allocation2 + $0xf8] sm:$0xff] %v1237_v58  ;;  %v1238_v39 = vmax.f32 %v1206_v27, 0.0  ;;  %v2704_v34 = vld [vmem:[#allocation2 + $0xef] sm:$0xff]  ;;  %v9038_v27 = vmov 0  ;;  %vm1756_vm6 = vcmp.ge.s32.totalorder %v1512_v51, 1  ;;  %vm1758_vm11 = vcmp.ge.s32.totalorder %v1526_v44, 1 }
 0x20a   : > { %1278 = vst [vmem:[#allocation2 + $0x110] sm:$0xff] %v1240_v29  ;;  %v2702_v15 = vld [vmem:[#allocation2 + $0xdf] sm:$0xff]  ;;  %v2703_v41 = vld [vmem:[#allocation2 + $0xe7] sm:$0xff]  ;;  %v7851_v21 = vpack.c.bf16 %v1240_v29, %v1239_v55  ;;  %v9039_v27 = vsel %vm7858_vm2, 4294967295, %v9038_v27  ;;  %vm7876_vm15 = vmpackc.low %vm8938_vm3, %vm1756_vm6  ;;  %v9040_v55 = vmov 0  ;;  %vm9044_vm6 = vnez %v9031_v40 }
 0x20b   : > { %1276 = vst [vmem:[#allocation2 + $0x100] sm:$0xff] %v1238_v39  ;;  %v7853_v61 = vpack.c.bf16 %v2702_v15, %v2701_v33  ;;  %v7862_v45 = vpack.c.bf16 %v2704_v34, %v2703_v41  ;;  %v7864_v46 = vpack.c.bf16 %v1238_v39, %v1237_v58  ;;  %v9041_v55 = vsel %vm7876_vm15, 4294967295, %v9040_v55  ;;  %v6974_v44 = vld [vmem:[%s8862_s7 + $0x88] sm:$0xff]   ;;  %v6975_v39 = vld [vmem:[%s8862_s7 + $0x90] sm:$0xff]   ;;  %v3662_v15 = vld [vmem:[#allocation2 + $0x3f] sm:$0xff] }
 0x20c   : > { %v9050_v34 = vmov 0  ;;  %v2311_v33 = vld [vmem:[#allocation2 + $0x29] sm:$0xff] }
 0x20d   : > { %6332 = vmatprep.mubr.msk.bf16.mxu0 %vm7847_vm14, %v7853_v61  ;;  %vm7883_vm14 = vmpackc.low %vm8938_vm3, %vm1758_vm11  ;;  %vm9045_vm11 = vnez %v9033_v1  ;;  %vm9046_vm3 = vnez %v9037_v32 }
 0x20e   : > { %6193 = vmatmul.mubr.bf16.gmra.mrb[60].mxu1 %v7864_v46  ;;  %6333 = vmatmul.mubr.msk.bf16.gmra.mrb[56].mxu0 %vm7858_vm2, %v7862_v45  ;;  %v9043_v22 = vsel %vm7883_vm14, 4294967295, %v9042_v22 }
 0x20f   : > { %6212 = vmatprep.mubr.msk.bf16.mxu1 %vm7522_vm4, %v5313_v48  ;;  %v8035_v48 = vld [vmem:[%s8862_s7 + $0x208] sm:$0xff]  }
 0x210   : > { %v2705_v58 = vld [vmem:[#allocation2 + $0xf7] sm:$0xff] }
 0x211   : > { %v2708_v16 = vld [vmem:[#allocation2 + $0x10f] sm:$0xff] }
 0x212   : > { %v2706_v6 = vld [vmem:[#allocation2 + $0xff] sm:$0xff]  ;;  %v2707_v31 = vld [vmem:[#allocation2 + $0x107] sm:$0xff] }
 0x213   : > { %v7880_v29 = vpack.c.bf16 %v2706_v6, %v2705_v58  ;;  %v5502_v37 = vpack.c.bf16 %v2708_v16, %v2707_v31  ;;  %v1291_v16 = vadd.s32 88, %v7481_v13  ;;  %v3325_v58 = vld [vmem:[#allocation2 + $0x39] sm:$0xff]  ;;  %v3326_v6 = vld [vmem:[#allocation2 + $0x41] sm:$0xff]  ;;  %v1293_v31 = vadd.s32 104, %v7481_v13 }
 0x215   : > { %6336 = vmatprep.mubr.msk.bf16.mxu0 %vm7876_vm15, %v7880_v29 }
 0x216   : > { %6213 = vmatmul.mubr.msk.bf16.vlgmr.msra.gmra.mrb[32].mxu1 %vm7535_vm5, %v7530_v4  ;;  %6337 = vmatmul.mubr.msk.bf16.gmra.mrb[60].mxu0 %vm7883_vm14, %v5502_v37  ;;  %v6969_v4 = vld [vmem:[%s8862_s7 + $0x148] sm:$0xff]  }
 0x217   : > { %6216 = vmatprep.mubr.msk.bf16.mxu1 %vm7580_vm8, %v7539_v14  ;;  %6356 = vmatprep.mubr.bf16.mxu0 %v7493_v12  ;;  %v6977_v12 = vld [vmem:[%s8862_s7 + $0x98] sm:$0xff]   ;;  %v6970_v14 = vld [vmem:[%s8862_s7 + $0x150] sm:$0xff]   ;;  %v7001_v37 = vld [vmem:[%s8862_s7 + $0x1c8] sm:$0xff]  }
 0x218   : > { %6245 = vmatpush3.bf16.msra.mxu1 %v7724_v49 }
 0x219   : > { %6246 = vmatprep.subr.bf16.mxu1 %v6974_v44 }
 0x21c   : > { %6247 = vmatpush3.bf16.msra.mxu1 %v6974_v44  ;;  %v8059_v44 = vpack.c.bf16 %v3326_v6, %v3325_v58  ;;  %v9064_v58 = vmov 0 }
 0x21d   : > { %6248 = vmatprep.subr.bf16.mxu1 %v6975_v39 }
 0x21e   : > { %6217 = vmatmul.mubr.msk.bf16.gmra.mrb[36].mxu1 %vm7593_vm9, %v7588_v24  ;;  %6357 = vmatmul.mubr.bf16.vlgmr.msra.gmra.mrb[32].mxu0 %v7490_v62  ;;  %v6978_v24 = vld [vmem:[%s8862_s7 + $0xa0] sm:$0xff]   ;;  %v6971_v62 = vld [vmem:[%s8862_s7 + $0x158] sm:$0xff]  }
 0x21f   : > { %6220 = vmatprep.mubr.msk.bf16.mxu1 %vm7640_vm12, %v7597_v57  ;;  %6389 = vmatpush3.bf16.msra.mxu0 %v7757_v53  ;;  %v6973_v57 = vld [vmem:[%s8862_s7 + $0x160] sm:$0xff]  }
 0x220   : > { %6360 = vmatprep.mubr.bf16.mxu0 %v7541_v50  ;;  %6390 = vmatprep.subr.bf16.mxu0 %v6969_v4  ;;  %v6980_v50 = vld [vmem:[%s8862_s7 + $0xa8] sm:$0xff]  }
 0x221   : > { %6249 = vmatpush3.bf16.msra.mxu1 %v6975_v39  ;;  %v3322_v53 = vld [vmem:[#allocation2 + $0x21] sm:$0xff]  ;;  %v2315_v39 = vld [vmem:[#allocation2 + $0x49] sm:$0xff] }
 0x222   : > { %6250 = vmatprep.subr.bf16.mxu1 %v6977_v12 }
 0x223   : > { %6391 = vmatpush3.bf16.msra.mxu0 %v6969_v4  ;;  %v3666_v4 = vld [vmem:[#allocation2 + $0x5f] sm:$0xff] }
 0x224   : > { %6392 = vmatprep.subr.bf16.mxu0 %v6970_v14 }
 0x225   : > { %6251 = vmatpush3.bf16.msra.mxu1 %v6977_v12  ;;  %v1393_v12 = vand.u32 15, %v1291_v16  ;;  %v2323_v16 = vld [vmem:[#allocation2 + $0x89] sm:$0xff] }
 0x226   : > { %6221 = vmatmul.mubr.msk.bf16.gmra.mrb[40].mxu1 %vm7653_vm13, %v7648_v28  ;;  %6252 = vmatprep.subr.bf16.mxu1 %v6978_v24  ;;  %v6981_v28 = vld [vmem:[%s8862_s7 + $0xb0] sm:$0xff]  }
 0x227   : > { %6361 = vmatmul.mubr.bf16.gmra.mrb[36].mxu0 %v7527_v7  ;;  %6224 = vmatprep.mubr.msk.bf16.mxu1 %vm7700_vm0, %v7657_v2  ;;  %v6976_v7 = vld [vmem:[%s8862_s7 + $0x168] sm:$0xff]   ;;  %v6979_v2 = vld [vmem:[%s8862_s7 + $0x170] sm:$0xff]  }
 0x228   : > { %6364 = vmatprep.mubr.bf16.mxu0 %v7599_v56  ;;  %6393 = vmatpush3.bf16.msra.mxu0 %v6970_v14  ;;  %v6983_v56 = vld [vmem:[%s8862_s7 + $0xb8] sm:$0xff]   ;;  %v6985_v14 = vld [vmem:[%s8862_s7 + $0x188] sm:$0xff]  }
 0x229   : > { %6394 = vmatprep.subr.bf16.mxu0 %v6971_v62  ;;  %6253 = vmatpush3.bf16.msra.mxu1 %v6978_v24 }
 0x22a   : > { %6254 = vmatprep.subr.bf16.mxu1 %v6980_v50 }
 0x22c   : > { %6395 = vmatpush3.bf16.msra.mxu0 %v6971_v62  ;;  %v1407_v62 = vand.u32 15, %v1293_v31 }
 0x22d   : > { %6396 = vmatprep.subr.bf16.mxu0 %v6973_v57  ;;  %6255 = vmatpush3.bf16.msra.mxu1 %v6980_v50  ;;  %v8079_v50 = vld [vmem:[%s8862_s7 + $0x218] sm:$0xff]  }
 0x22e   : > { %6225 = vmatmul.mubr.msk.bf16.gmra.mrb[44].mxu1 %vm7713_vm1, %v7708_v10  ;;  %6256 = vmatprep.subr.bf16.mxu1 %v6981_v28  ;;  %v7967_v10 = vld [vmem:[%s8862_s7 + $0x200] sm:$0xff]  }
 0x22f   : > { %6365 = vmatmul.mubr.bf16.gmra.mrb[40].mxu0 %v7585_v11  ;;  %6228 = vmatprep.mubr.msk.bf16.mxu1 %vm7762_vm7, %v7717_v36  ;;  %v6982_v11 = vld [vmem:[%s8862_s7 + $0x178] sm:$0xff]   ;;  %v9048_v36 = vmov 0 }
 0x230   : > { %6368 = vmatprep.mubr.bf16.mxu0 %v7659_v54  ;;  %6397 = vmatpush3.bf16.msra.mxu0 %v6973_v57  ;;  %v7984_v54 = vld [vmem:[%s8862_s7 + $0x180] sm:$0xff]   ;;  %v1295_v57 = vadd.s32 120, %v7481_v13 }
 0x231   : > { %6398 = vmatprep.subr.bf16.mxu0 %v6976_v7  ;;  %6257 = vmatpush3.bf16.msra.mxu1 %v6981_v28  ;;  %v3329_v28 = vld [vmem:[#allocation2 + $0x59] sm:$0xff] }
 0x232   : > { %6258 = vmatprep.subr.bf16.mxu1 %v6983_v56 }
 0x234   : > { %6399 = vmatpush3.bf16.msra.mxu0 %v6976_v7  ;;  %v3330_v7 = vld [vmem:[#allocation2 + $0x61] sm:$0xff] }
 0x235   : > { %6400 = vmatprep.subr.bf16.mxu0 %v6979_v2  ;;  %6259 = vmatpush3.bf16.msra.mxu1 %v6983_v56  ;;  %v6986_v56 = vld [vmem:[%s8862_s7 + $0x190] sm:$0xff]  }
 0x236   : > { %6229 = vmatmul.mubr.msk.bf16.gmra.mrb[48].mxu1 %vm7775_vm10, %v7770_v35  ;;  %6628 = vmatprep.subr.bf16.mxu1 %v7967_v10  ;;  %v1281_v35 = vadd.s32 8, %v7481_v13 }
 0x237   : > { %6369 = vmatmul.mubr.bf16.gmra.mrb[44].mxu0 %v7645_v30  ;;  %6232 = vmatprep.mubr.msk.bf16.mxu1 %vm9044_vm6, %v7779_v42  ;;  %v2308_v30 = vld [vmem:[#allocation2 + $0x11] sm:$0xff]  ;;  %v1289_v42 = vadd.s32 72, %v7481_v13 }
 0x238   : > { %6372 = vmatprep.mubr.bf16.mxu0 %v7719_v3  ;;  %6401 = vmatpush3.bf16.msra.mxu0 %v6979_v2  ;;  %v1323_v3 = vand.u32 15, %v1281_v35  ;;  %v1297_v2 = vadd.s32 136, %v7481_v13  ;;  %v3668_v35 = vld [vmem:[#allocation2 + $0x6f] sm:$0xff] }
 0x239   : > { %6402 = vmatprep.subr.bf16.mxu0 %v6982_v11  ;;  %v1379_v51 = vand.u32 15, %v1289_v42  ;;  %v6988_v42 = vld [vmem:[%s8862_s7 + $0x1a0] sm:$0xff]  }
 0x23c   : > { %6403 = vmatpush3.bf16.msra.mxu0 %v6982_v11  ;;  %v2320_v11 = vld [vmem:[#allocation2 + $0x71] sm:$0xff] }
 0x23d   : > { %6436 = vmatprep.subr.bf16.mxu0 %v7984_v54 }
 0x23e   : > { %6233 = vmatmul.mubr.msk.bf16.gmra.mrb[52].mxu1 %vm9045_vm11, %v7813_v0  ;;  %v1283_v0 = vadd.s32 24, %v7481_v13  ;;  %vm9047_vm11 = vmmov 1  }
 0x23f   : > { %6373 = vmatmul.mubr.bf16.gmra.mrb[48].mxu0 %v7705_v9  ;;  %6236 = vmatprep.mubr.msk.bf16.mxu1 %vm9046_vm3, %v7822_v26  ;;  %vm2340_vm3 = vcmp.le.s32.totalorder %v1323_v3, 14  ;;  %v2307_v9 = vld [vmem:[#allocation2 + $0x9] sm:$0xff]  ;;  %v2312_v26 = vld [vmem:[#allocation2 + $0x31] sm:$0xff]  ;;  %v8108_v3 = vpack.c.bf16 %v3330_v7, %v3329_v28  ;;  %v1305_v28 = vadd.s32 200, %v7481_v13 }
 0x240   : > { %6376 = vmatprep.mubr.bf16.mxu0 %v7781_v20  ;;  %v1285_v20 = vadd.s32 40, %v7481_v13  ;;  %vm8007_vm6 = vmpackc.low %vm2340_vm3, %vm9047_vm11  ;;  %v8030_v41 = vpack.c.bf16 %v2312_v26, %v2311_v33  ;;  %v1301_v26 = vadd.s32 168, %v7481_v13  ;;  %v8149_v33 = vld [vmem:[%s8862_s7 + $0x230] sm:$0xff]  }
 0x241   : > { %v9049_v36 = vsel %vm8007_vm6, 4294967295, %v9048_v36  ;;  %v6994_v7 = vld [vmem:[%s8862_s7 + $0x1b0] sm:$0xff]  }
 0x242   : > { %v1351_v49 = vand.u32 15, %v1285_v20  ;;  %v7003_v20 = vld [vmem:[%s8862_s7 + $0x1d8] sm:$0xff]  }
 0x244   : > { %vm2344_vm3 = vcmp.le.s32.totalorder %v1351_v49, 14  ;;  %v8128_v49 = vld [vmem:[%s8862_s7 + $0x228] sm:$0xff]  }
 0x246   : > { %6237 = vmatmul.mubr.msk.bf16.gmra.mrb[56].mxu1 %vm7858_vm2, %v7853_v61  ;;  %v1337_v61 = vand.u32 15, %v1283_v0  ;;  %v2319_v0 = vld [vmem:[#allocation2 + $0x69] sm:$0xff] }
 0x247   : > { %6377 = vmatmul.mubr.bf16.gmra.mrb[52].mxu0 %v7767_v38  ;;  %6240 = vmatprep.mubr.msk.bf16.mxu1 %vm7876_vm15, %v7862_v45  ;;  %v5385_v38 = vpack.c.bf16 %v2308_v30, %v2307_v9  ;;  %v1287_v45 = vadd.s32 56, %v7481_v13  ;;  %v1421_v9 = vand.u32 15, %v1295_v57  ;;  %v8115_v30 = vpack.c.bf16 %v2320_v11, %v2319_v0  ;;  %v3338_v57 = vld [vmem:[#allocation2 + $0xa1] sm:$0xff]  ;;  %v2327_v0 = vld [vmem:[#allocation2 + $0xa9] sm:$0xff] }
 0x248   : > { %6380 = vmatprep.mubr.bf16.mxu0 %v7824_v63  ;;  %vm2342_vm15 = vcmp.le.s32.totalorder %v1337_v61, 14  ;;  %v3321_v63 = vld [vmem:[#allocation2 + $0x19] sm:$0xff] }
 0x249   : > { %vm8021_vm2 = vmpackc.low %vm2342_vm15, %vm9047_vm11  ;;  %v6987_v61 = vld [vmem:[%s8862_s7 + $0x198] sm:$0xff]  }
 0x24a   : > { %v9051_v34 = vsel %vm8021_vm2, 4294967295, %v9050_v34 }
 0x24e   : > { %6241 = vmatmul.mubr.msk.bf16.gmra.mrb[60].mxu1 %vm7883_vm14, %v7880_v29  ;;  %vm8026_vm14 = vmpackc.low %vm2344_vm3, %vm9047_vm11  ;;  %vm2348_vm3 = vcmp.le.s32.totalorder %v1379_v51, 14  ;;  %v2316_v29 = vld [vmem:[#allocation2 + $0x51] sm:$0xff] }
 0x24f   : > { %6381 = vmatmul.mubr.bf16.gmra.mrb[56].mxu0 %v7810_v18  ;;  %6260 = vmatprep.mubr.msk.bf16.mxu1 %vm8007_vm6, %v5385_v38  ;;  %v5553_v18 = vpack.c.bf16 %v3322_v53, %v3321_v63  ;;  %vm8062_vm10 = vmpackc.low %vm2348_vm3, %vm9047_vm11  ;;  %v8070_v24 = vpack.c.bf16 %v2316_v29, %v2315_v39  ;;  %vm2352_vm3 = vcmp.le.s32.totalorder %v1407_v62, 14  ;;  %v1435_v38 = vand.u32 15, %v1297_v2  ;;  %v3333_v63 = vld [vmem:[#allocation2 + $0x79] sm:$0xff]  ;;  %v3334_v53 = vld [vmem:[#allocation2 + $0x81] sm:$0xff] }
 0x250   : > { %6384 = vmatprep.mubr.bf16.mxu0 %v7864_v46  ;;  %v1365_v46 = vand.u32 15, %v1287_v45  ;;  %vm8111_vm7 = vmpackc.low %vm2352_vm3, %vm9047_vm11  ;;  %v1299_v45 = vadd.s32 152, %v7481_v13  ;;  %v8156_v51 = vpack.c.bf16 %v3334_v53, %v3333_v63  ;;  %v1463_v29 = vand.u32 15, %v1301_v26  ;;  %v6991_v39 = vld [vmem:[%s8862_s7 + $0x1a8] sm:$0xff]   ;;  %v3337_v62 = vld [vmem:[#allocation2 + $0x99] sm:$0xff] }
 0x251   : > { %vm2356_vm3 = vcmp.le.s32.totalorder %v1435_v38, 14  ;;  %v9066_v2 = vmov 0  ;;  %v8199_v11 = vpack.c.bf16 %v3338_v57, %v3337_v62  ;;  %v6997_v63 = vld [vmem:[%s8862_s7 + $0x1b8] sm:$0xff]   ;;  %v1307_v53 = vadd.s32 216, %v7481_v13  ;;  %v3342_v26 = vld [vmem:[#allocation2 + $0xc1] sm:$0xff] }
 0x252   : > { %vm2346_vm15 = vcmp.le.s32.totalorder %v1365_v46, 14  ;;  %v9062_v46 = vmov 0  ;;  %vm8159_vm0 = vmpackc.low %vm2356_vm3, %vm9047_vm11  ;;  %v1449_v6 = vand.u32 15, %v1299_v45  ;;  %vm2360_vm3 = vcmp.le.s32.totalorder %v1463_v29, 14  ;;  %v3682_v62 = vld [vmem:[#allocation2 + $0xdf] sm:$0xff] }
 0x253   : > { %v9065_v58 = vsel %vm8159_vm0, 4294967295, %v9064_v58  ;;  %vm8202_vm12 = vmpackc.low %vm2360_vm3, %vm9047_vm11  ;;  %v1491_v45 = vand.u32 15, %v1305_v28  ;;  %v1505_v57 = vand.u32 15, %v1307_v53 }
 0x255   : > { %vm2364_vm3 = vcmp.le.s32.totalorder %v1491_v45, 14  ;;  %v2336_v45 = vld [vmem:[#allocation2 + $0xf1] sm:$0xff] }
 0x256   : > { %6261 = vmatmul.mubr.msk.bf16.vlgmr.msra.gmra.mrb[32].mxu1 %vm8021_vm2, %v5553_v18 }
 0x257   : > { %6385 = vmatmul.mubr.bf16.gmra.mrb[60].mxu0 %v7851_v21  ;;  %6264 = vmatprep.mubr.msk.bf16.mxu1 %vm8026_vm14, %v8030_v41  ;;  %v8052_v21 = vld [vmem:[%s8862_s7 + $0x210] sm:$0xff]  }
 0x258   : > { %6404 = vmatprep.mubr.msk.bf16.mxu0 %vm8007_vm6, %v5553_v18  ;;  %6636 = vmatpush3.bf16.msra.mxu1 %v7967_v10  ;;  %vm8055_vm6 = vmpackc.low %vm2346_vm15, %vm9047_vm11  ;;  %vm2350_vm15 = vcmp.le.s32.totalorder %v1393_v12, 14  ;;  %v2324_v18 = vld [vmem:[#allocation2 + $0x91] sm:$0xff] }
 0x259   : > { %6629 = vmatprep.subr.bf16.mxu1 %v8035_v48  ;;  %v8163_v31 = vpack.c.bf16 %v2324_v18, %v2323_v16  ;;  %v8176_v12 = vld [vmem:[%s8862_s7 + $0x238] sm:$0xff]   ;;  %v1309_v18 = vadd.s32 232, %v7481_v13  ;;  %v7000_v16 = vld [vmem:[%s8862_s7 + $0x1c0] sm:$0xff]  }
 0x25c   : > { %6637 = vmatpush3.bf16.msra.mxu1 %v8035_v48 }
 0x25d   : > { %6630 = vmatprep.subr.bf16.mxu1 %v8052_v21 }
 0x25e   : > { %6265 = vmatmul.mubr.msk.bf16.gmra.mrb[36].mxu1 %vm8055_vm6, %v8059_v44 }
 0x25f   : > { %6405 = vmatmul.mubr.msk.bf16.vlgmr.msra.gmra.mrb[32].mxu0 %vm8021_vm2, %v8030_v41  ;;  %6268 = vmatprep.mubr.msk.bf16.mxu1 %vm8062_vm10, %v8070_v24  ;;  %vm8104_vm2 = vmpackc.low %vm2350_vm15, %vm9047_vm11  ;;  %vm2354_vm15 = vcmp.le.s32.totalorder %v1421_v9, 14  ;;  %v7007_v9 = vld [vmem:[%s8862_s7 + $0x1f8] sm:$0xff]  }
 0x260   : > { %6437 = vmatpush3.bf16.msra.mxu0 %v7984_v54  ;;  %6408 = vmatprep.mubr.msk.bf16.mxu0 %vm8026_vm14, %v8059_v44  ;;  %v8101_v54 = vld [vmem:[%s8862_s7 + $0x220] sm:$0xff]   ;;  %vm8152_vm1 = vmpackc.low %vm2354_vm15, %vm9047_vm11  ;;  %vm2358_vm15 = vcmp.le.s32.totalorder %v1449_v6, 14  ;;  %v2332_v6 = vld [vmem:[#allocation2 + $0xd1] sm:$0xff] }
 0x261   : > { %6438 = vmatprep.subr.bf16.mxu0 %v6985_v14  ;;  %6638 = vmatpush3.bf16.msra.mxu1 %v8052_v21  ;;  %v9063_v46 = vsel %vm8152_vm1, 4294967295, %v9062_v46  ;;  %vm8195_vm13 = vmpackc.low %vm2358_vm15, %vm9047_vm11 }
 0x262   : > { %6631 = vmatprep.subr.bf16.mxu1 %v8079_v50  ;;  %v9067_v2 = vsel %vm8195_vm13, 4294967295, %v9066_v2 }
 0x264   : > { %6439 = vmatpush3.bf16.msra.mxu0 %v6985_v14  ;;  %v1303_v14 = vadd.s32 184, %v7481_v13 }
 0x265   : > { %6440 = vmatprep.subr.bf16.mxu0 %v6986_v56  ;;  %6639 = vmatpush3.bf16.msra.mxu1 %v8079_v50 }
 0x266   : > { %6269 = vmatmul.mubr.msk.bf16.gmra.mrb[40].mxu1 %vm8104_vm2, %v8108_v3  ;;  %6632 = vmatprep.subr.bf16.mxu1 %v8101_v54 }
 0x267   : > { %6409 = vmatmul.mubr.msk.bf16.gmra.mrb[36].mxu0 %vm8055_vm6, %v8070_v24  ;;  %6272 = vmatprep.mubr.msk.bf16.mxu1 %vm8111_vm7, %v8115_v30 }
 0x268   : > { %6412 = vmatprep.mubr.msk.bf16.mxu0 %vm8062_vm10, %v8108_v3  ;;  %6441 = vmatpush3.bf16.msra.mxu0 %v6986_v56  ;;  %v2328_v56 = vld [vmem:[#allocation2 + $0xb1] sm:$0xff] }
 0x269   : > { %6442 = vmatprep.subr.bf16.mxu0 %v6987_v61  ;;  %6640 = vmatpush3.bf16.msra.mxu1 %v8101_v54  ;;  %v8206_v38 = vpack.c.bf16 %v2328_v56, %v2327_v0  ;;  %v1311_v56 = vadd.s32 248, %v7481_v13  ;;  %v3345_v0 = vld [vmem:[#allocation2 + $0xd9] sm:$0xff] }
 0x26a   : > { %6633 = vmatprep.subr.bf16.mxu1 %v8128_v49  ;;  %v3349_v13 = vld [vmem:[#allocation2 + $0xf9] sm:$0xff] }
 0x26c   : > { %6443 = vmatpush3.bf16.msra.mxu0 %v6987_v61  ;;  %v1477_v61 = vand.u32 15, %v1303_v14  ;;  %v2331_v14 = vld [vmem:[#allocation2 + $0xc9] sm:$0xff] }
 0x26d   : > { %6444 = vmatprep.subr.bf16.mxu0 %v6988_v42  ;;  %6641 = vmatpush3.bf16.msra.mxu1 %v8128_v49  ;;  %v8241_v28 = vpack.c.bf16 %v2332_v6, %v2331_v14  ;;  %v3350_v14 = vld [vmem:[#allocation2 + $0x101] sm:$0xff] }
 0x26e   : > { %6273 = vmatmul.mubr.msk.bf16.gmra.mrb[44].mxu1 %vm8152_vm1, %v8156_v51  ;;  %6634 = vmatprep.subr.bf16.mxu1 %v8149_v33  ;;  %vm2362_vm15 = vcmp.le.s32.totalorder %v1477_v61, 14  ;;  %v3346_v61 = vld [vmem:[#allocation2 + $0xe1] sm:$0xff] }
 0x26f   : > { %6413 = vmatmul.mubr.msk.bf16.gmra.mrb[40].mxu0 %vm8104_vm2, %v8115_v30  ;;  %6276 = vmatprep.mubr.msk.bf16.mxu1 %vm8159_vm0, %v8163_v31  ;;  %vm8230_vm9 = vmpackc.low %vm2362_vm15, %vm9047_vm11  ;;  %vm2366_vm15 = vcmp.le.s32.totalorder %v1505_v57, 14  ;;  %v8261_v53 = vpack.c.bf16 %v3346_v61, %v3345_v0  ;;  %v3352_v0 = vld [vmem:[#allocation2 + $0x111] sm:$0xff]  ;;  %v3659_v61 = vld [vmem:[#allocation2 + $0x27] sm:$0xff] }
 0x270   : > { %6416 = vmatprep.mubr.msk.bf16.mxu0 %vm8111_vm7, %v8156_v51  ;;  %6445 = vmatpush3.bf16.msra.mxu0 %v6988_v42  ;;  %v3341_v42 = vld [vmem:[#allocation2 + $0xb9] sm:$0xff] }
 0x271   : > { %6446 = vmatprep.subr.bf16.mxu0 %v6991_v39  ;;  %6642 = vmatpush3.bf16.msra.mxu1 %v8149_v33  ;;  %v3689_v57 = vld [vmem:[#allocation2 + $0x117] sm:$0xff] }
 0x272   : > { %6635 = vmatprep.subr.bf16.mxu1 %v8176_v12 }
 0x274   : > { %6447 = vmatpush3.bf16.msra.mxu0 %v6991_v39  ;;  %v8234_v39 = vpack.c.bf16 %v3342_v26, %v3341_v42  ;;  %v2335_v42 = vld [vmem:[#allocation2 + $0xe9] sm:$0xff] }
 0x275   : > { %6448 = vmatprep.subr.bf16.mxu0 %v6994_v7  ;;  %6643 = vmatpush3.bf16.msra.mxu1 %v8176_v12  ;;  %v8268_v6 = vpack.c.bf16 %v2336_v45, %v2335_v42  ;;  %v3660_v45 = vld [vmem:[#allocation2 + $0x2f] sm:$0xff]  ;;  %v3687_v26 = vld [vmem:[#allocation2 + $0x107] sm:$0xff] }
 0x276   : > { %6277 = vmatmul.mubr.msk.bf16.gmra.mrb[48].mxu1 %vm8195_vm13, %v8199_v11 }
 0x277   : > { %6417 = vmatmul.mubr.msk.bf16.gmra.mrb[44].mxu0 %vm8152_vm1, %v8163_v31  ;;  %6280 = vmatprep.mubr.msk.bf16.mxu1 %vm8202_vm12, %v8206_v38  ;;  %vm8257_vm1 = vmpackc.low %vm2366_vm15, %vm9047_vm11 }
 0x278   : > { %6420 = vmatprep.mubr.msk.bf16.mxu0 %vm8159_vm0, %v8199_v11  ;;  %6449 = vmatpush3.bf16.msra.mxu0 %v6994_v7  ;;  %vm8237_vm0 = vmpackc.low %vm2364_vm3, %vm9047_vm11  ;;  %v1519_v7 = vand.u32 15, %v1309_v18  ;;  %v1533_v18 = vand.u32 15, %v1311_v56  ;;  %v3351_v56 = vld [vmem:[#allocation2 + $0x109] sm:$0xff] }
 0x279   : > { %6450 = vmatprep.subr.bf16.mxu0 %v6997_v63  ;;  %v8301_v42 = vpack.c.bf16 %v3352_v0, %v3351_v56  ;;  %v3671_v0 = vld [vmem:[#allocation2 + $0x87] sm:$0xff] }
 0x27a   : > { %vm2368_vm3 = vcmp.le.s32.totalorder %v1519_v7, 14  ;;  %vm2370_vm15 = vcmp.le.s32.totalorder %v1533_v18, 14  ;;  %v8287_v7 = vpack.c.bf16 %v3350_v14, %v3349_v13  ;;  %v5625_v18 = vpack.c.bf16 %v3660_v45, %v3659_v61  ;;  %v3664_v13 = vld [vmem:[#allocation2 + $0x4f] sm:$0xff]  ;;  %v3661_v14 = vld [vmem:[#allocation2 + $0x37] sm:$0xff]  ;;  %v3674_v61 = vld [vmem:[#allocation2 + $0x9f] sm:$0xff] }
 0x27b   : > { %v5628_v56 = vpack.c.bf16 %v3662_v15, %v3661_v14  ;;  %v3675_v45 = vld [vmem:[#allocation2 + $0xa7] sm:$0xff]  ;;  %v3680_v15 = vld [vmem:[#allocation2 + $0xcf] sm:$0xff] }
 0x27c   : > { %6451 = vmatpush3.bf16.msra.mxu0 %v6997_v63  ;;  %v3684_v14 = vld [vmem:[#allocation2 + $0xef] sm:$0xff] }
 0x27d   : > { %6484 = vmatprep.subr.bf16.mxu0 %v7000_v16 }
 0x27e   : > { %6281 = vmatmul.mubr.msk.bf16.gmra.mrb[52].mxu1 %vm8230_vm9, %v8234_v39 }
 0x27f   : > { %6421 = vmatmul.mubr.msk.bf16.gmra.mrb[48].mxu0 %vm8195_vm13, %v8206_v38  ;;  %6284 = vmatprep.mubr.msk.bf16.mxu1 %vm8237_vm0, %v8241_v28  ;;  %vm8264_vm13 = vmpackc.low %vm2368_vm3, %vm9047_vm11 }
 0x280   : > { %6424 = vmatprep.mubr.msk.bf16.mxu0 %vm8202_vm12, %v8234_v39  ;;  %vm8283_vm3 = vmpackc.low %vm2370_vm15, %vm9047_vm11  ;;  %vm9093_vm11 = vnez %v9039_v27  ;;  %vm9094_vm15 = vnez %v9041_v55  ;;  %v4004_v55 = vld [vmem:[#allocation2 + $0x60] sm:$0xff] }
 0x286   : > { %6285 = vmatmul.mubr.msk.bf16.gmra.mrb[56].mxu1 %vm8257_vm1, %v8261_v53 }
 0x287   : > { %6425 = vmatmul.mubr.msk.bf16.gmra.mrb[52].mxu0 %vm8230_vm9, %v8241_v28  ;;  %6288 = vmatprep.mubr.msk.bf16.mxu1 %vm8264_vm13, %v8268_v6 }
 0x288   : > { %6428 = vmatprep.mubr.msk.bf16.mxu0 %vm8237_vm0, %v8261_v53 }
 0x28e   : > { %6289 = vmatmul.mubr.msk.bf16.gmra.mrb[60].mxu1 %vm8283_vm3, %v8287_v7 }
 0x28f   : > { %6429 = vmatmul.mubr.msk.bf16.gmra.mrb[56].mxu0 %vm8257_vm1, %v8268_v6  ;;  %6552 = vmatprep.mubr.msk.bf16.mxu1 %vm8026_vm14, %v8070_v24  ;;  %v3663_v24 = vld [vmem:[#allocation2 + $0x47] sm:$0xff]  ;;  %vm9086_vm14 = vnez %v9017_v25  ;;  %v3678_v25 = vld [vmem:[#allocation2 + $0xbf] sm:$0xff] }
 0x290   : > { %6432 = vmatprep.mubr.msk.bf16.mxu0 %vm8264_vm13, %v8287_v7 }
 0x296   : > { %6553 = vmatmul.mubr.msk.bf16.vlgmr.msra.gmra.mrb[64].mxu1 %vm8055_vm6, %v8108_v3  ;;  %v5631_v3 = vpack.c.bf16 %v3664_v13, %v3663_v24  ;;  %vm9088_vm6 = vnez %v9025_v23  ;;  %v3677_v24 = vld [vmem:[#allocation2 + $0xb7] sm:$0xff]  ;;  %v4334_v23 = vld [vmem:[#allocation2 + $0x121] sm:$0xff] }
 0x297   : > { %6433 = vmatmul.mubr.msk.bf16.gmra.mrb[60].mxu0 %vm8283_vm3, %v8301_v42  ;;  %6556 = vmatprep.mubr.msk.bf16.mxu1 %vm8062_vm10, %v8115_v30  ;;  %v3667_v30 = vld [vmem:[#allocation2 + $0x67] sm:$0xff]  ;;  %vm9084_vm10 = vnez %v9067_v2  ;;  %v3676_v2 = vld [vmem:[#allocation2 + $0xaf] sm:$0xff]  ;;  %v5652_v13 = vpack.c.bf16 %v3678_v25, %v3677_v24 }
 0x298   : > { %6452 = vmatprep.mubr.msk.bf16.mxu0 %vm7522_vm4, %v5625_v18  ;;  %vm9080_vm4 = vnez %v9063_v46  ;;  %v3672_v46 = vld [vmem:[#allocation2 + $0x8f] sm:$0xff]  ;;  %v3679_v18 = vld [vmem:[#allocation2 + $0xc7] sm:$0xff] }
 0x299   : > { %v5655_v29 = vpack.c.bf16 %v3680_v15, %v3679_v18  ;;  %v4022_v18 = vld [vmem:[#allocation2 + $0xf0] sm:$0xff]  ;;  %v4019_v15 = vld [vmem:[#allocation2 + $0xd8] sm:$0xff] }
 0x29e   : > { %6557 = vmatmul.mubr.msk.bf16.gmra.mrb[68].mxu1 %vm8104_vm2, %v8156_v51  ;;  %v3665_v51 = vld [vmem:[#allocation2 + $0x57] sm:$0xff]  ;;  %vm9085_vm2 = vnez %v9011_v52 }
 0x29f   : > { %6453 = vmatmul.mubr.msk.bf16.vlgmr.msra.gmra.mrb[32].mxu0 %vm7535_vm5, %v5628_v56  ;;  %6560 = vmatprep.mubr.msk.bf16.mxu1 %vm8111_vm7, %v8163_v31  ;;  %v5634_v47 = vpack.c.bf16 %v3666_v4, %v3665_v51  ;;  %v5637_v31 = vpack.c.bf16 %v3668_v35, %v3667_v30  ;;  %vm9081_vm5 = vnez %v9003_v60  ;;  %vm9083_vm7 = vnez %v9009_v5  ;;  %v7006_v5 = vld [vmem:[%s8862_s7 + $0x1f0] sm:$0xff]   ;;  %v3997_v30 = vld [vmem:[#allocation2 + $0x28] sm:$0xff] }
 0x2a0   : > { %6485 = vmatpush3.bf16.msra.mxu0 %v7000_v16  ;;  %6456 = vmatprep.mubr.msk.bf16.mxu0 %vm7580_vm8, %v5631_v3  ;;  %vm9082_vm8 = vnez %v9065_v58  ;;  %v3670_v16 = vld [vmem:[#allocation2 + $0x7f] sm:$0xff]  ;;  %v7005_v58 = vld [vmem:[%s8862_s7 + $0x1e8] sm:$0xff]   ;;  %v3681_v56 = vld [vmem:[#allocation2 + $0xd7] sm:$0xff] }
 0x2a1   : > { %6486 = vmatprep.subr.bf16.mxu0 %v7001_v37  ;;  %v3998_v4 = vld [vmem:[#allocation2 + $0x30] sm:$0xff] }
 0x2a2   : > { %v4029_v35 = vpack.c.bf16 %v3998_v4, %v3997_v30  ;;  %v4002_v51 = vld [vmem:[#allocation2 + $0x50] sm:$0xff] }
 0x2a4   : > { %6487 = vmatpush3.bf16.msra.mxu0 %v7001_v37  ;;  %v5658_v37 = vpack.c.bf16 %v3682_v62, %v3681_v56 }
 0x2a5   : > { %6488 = vmatprep.subr.bf16.mxu0 %v7002_v17 }
 0x2a6   : > { %6561 = vmatmul.mubr.msk.bf16.gmra.mrb[72].mxu1 %vm9080_vm4, %v8199_v11  ;;  %v3669_v11 = vld [vmem:[#allocation2 + $0x77] sm:$0xff]  ;;  %vm9096_vm4 = vnez %v9049_v36 }
 0x2a7   : > { %6457 = vmatmul.mubr.msk.bf16.gmra.mrb[36].mxu0 %vm9081_vm5, %v5634_v47  ;;  %6564 = vmatprep.mubr.msk.bf16.mxu1 %vm9082_vm8, %v8206_v38  ;;  %v5640_v60 = vpack.c.bf16 %v3670_v16, %v3669_v11  ;;  %v5643_v38 = vpack.c.bf16 %v3672_v46, %v3671_v0  ;;  %v3999_v47 = vld [vmem:[#allocation2 + $0x38] sm:$0xff]  ;;  %v4005_v0 = vld [vmem:[#allocation2 + $0x68] sm:$0xff]  ;;  %v4010_v11 = vld [vmem:[#allocation2 + $0x90] sm:$0xff]  ;;  %vm9097_vm5 = vnez %v9051_v34 }
 0x2a8   : > { %6460 = vmatprep.mubr.msk.bf16.mxu0 %vm9083_vm7, %v5637_v31  ;;  %6489 = vmatpush3.bf16.msra.mxu0 %v7002_v17  ;;  %v3690_v17 = vld [vmem:[#allocation2 + $0x11f] sm:$0xff]  ;;  %v4001_v31 = vld [vmem:[#allocation2 + $0x48] sm:$0xff] }
 0x2a9   : > { %6490 = vmatprep.subr.bf16.mxu0 %v7003_v20  ;;  %v4031_v27 = vpack.c.bf16 %v4002_v51, %v4001_v31  ;;  %v4003_v16 = vld [vmem:[#allocation2 + $0x58] sm:$0xff]  ;;  %v7009_v31 = vld [vmem:[%s8865_s10 + $0x8] sm:$0xff]  }
 0x2ac   : > { %6491 = vmatpush3.bf16.msra.mxu0 %v7003_v20 }
 0x2ad   : > { %6492 = vmatprep.subr.bf16.mxu0 %v7004_v59 }
 0x2ae   : > { %6565 = vmatmul.mubr.msk.bf16.gmra.mrb[76].mxu1 %vm9084_vm10, %v8234_v39  ;;  %v3673_v39 = vld [vmem:[#allocation2 + $0x97] sm:$0xff] }
 0x2af   : > { %6461 = vmatmul.mubr.msk.bf16.gmra.mrb[40].mxu0 %vm9085_vm2, %v5640_v60  ;;  %6568 = vmatprep.mubr.msk.bf16.mxu1 %vm8202_vm12, %v8241_v28  ;;  %v5646_v52 = vpack.c.bf16 %v3674_v61, %v3673_v39  ;;  %v5649_v28 = vpack.c.bf16 %v3676_v2, %v3675_v45  ;;  %vm9087_vm12 = vnez %v9019_v8  ;;  %v4333_v8 = vld [vmem:[#allocation2 + $0x119] sm:$0xff]  ;;  %v4013_v2 = vld [vmem:[#allocation2 + $0xa8] sm:$0xff] }
 0x2b0   : > { %6464 = vmatprep.mubr.msk.bf16.mxu0 %vm9086_vm14, %v5643_v38  ;;  %6493 = vmatpush3.bf16.msra.mxu0 %v7004_v59  ;;  %v4006_v59 = vld [vmem:[#allocation2 + $0x70] sm:$0xff]  ;;  %v4007_v60 = vld [vmem:[#allocation2 + $0x78] sm:$0xff]  ;;  %v4009_v38 = vld [vmem:[#allocation2 + $0x88] sm:$0xff] }
 0x2b1   : > { %6494 = vmatprep.subr.bf16.mxu0 %v7005_v58  ;;  %v4033_v46 = vpack.c.bf16 %v4006_v59, %v4005_v0  ;;  %v4011_v61 = vld [vmem:[#allocation2 + $0x98] sm:$0xff]  ;;  %v4016_v39 = vld [vmem:[#allocation2 + $0xc0] sm:$0xff] }
 0x2b4   : > { %6495 = vmatpush3.bf16.msra.mxu0 %v7005_v58 }
 0x2b5   : > { %6496 = vmatprep.subr.bf16.mxu0 %v7006_v5 }
 0x2b6   : > { %6569 = vmatmul.mubr.msk.bf16.gmra.mrb[80].mxu1 %vm8230_vm9, %v8261_v53  ;;  %vm9089_vm9 = vnez %v9027_v19  ;;  %v5766_v53 = vpack.c.bf16 %v4334_v23, %v4333_v8  ;;  %v3686_v19 = vld [vmem:[#allocation2 + $0xff] sm:$0xff]  ;;  %v4026_v8 = vld [vmem:[#allocation2 + $0x110] sm:$0xff] }
 0x2b7   : > { %6465 = vmatmul.mubr.msk.bf16.gmra.mrb[44].mxu0 %vm9087_vm12, %v5646_v52  ;;  %6572 = vmatprep.mubr.msk.bf16.mxu1 %vm8237_vm0, %v8268_v6  ;;  %vm9090_vm0 = vnez %v9031_v40  ;;  %v3683_v6 = vld [vmem:[#allocation2 + $0xe7] sm:$0xff]  ;;  %v3688_v40 = vld [vmem:[#allocation2 + $0x10f] sm:$0xff]  ;;  %v4015_v52 = vld [vmem:[#allocation2 + $0xb8] sm:$0xff] }
 0x2b8   : > { %6468 = vmatprep.mubr.msk.bf16.mxu0 %vm9088_vm6, %v5649_v28  ;;  %6497 = vmatpush3.bf16.msra.mxu0 %v7006_v5  ;;  %v5661_v63 = vpack.c.bf16 %v3684_v14, %v3683_v6  ;;  %v5667_v3 = vpack.c.bf16 %v3688_v40, %v3687_v26  ;;  %v4012_v5 = vld [vmem:[#allocation2 + $0xa0] sm:$0xff]  ;;  %v4017_v28 = vld [vmem:[#allocation2 + $0xc8] sm:$0xff]  ;;  %v4023_v23 = vld [vmem:[#allocation2 + $0xf8] sm:$0xff] }
 0x2b9   : > { %6498 = vmatprep.subr.bf16.mxu0 %v7007_v9  ;;  %v4036_v45 = vpack.c.bf16 %v4012_v5, %v4011_v61  ;;  %v7012_v5 = vld [vmem:[%s8865_s10 + $0x20] sm:$0xff]  }
 0x2bc   : > { %6499 = vmatpush3.bf16.msra.mxu0 %v7007_v9  ;;  %v4038_v9 = vpack.c.bf16 %v4016_v39, %v4015_v52 }
 0x2bd   : > { %6532 = vmatprep.subr.bf16.mxu0 %v7967_v10 }
 0x2be   : > { %6573 = vmatmul.mubr.msk.bf16.gmra.mrb[84].mxu1 %vm8257_vm1, %v8287_v7  ;;  %vm9091_vm1 = vnez %v9033_v1  ;;  %v3685_v7 = vld [vmem:[#allocation2 + $0xf7] sm:$0xff]  ;;  %v5670_v1 = vpack.c.bf16 %v3690_v17, %v3689_v57 }
 0x2bf   : > { %6469 = vmatmul.mubr.msk.bf16.gmra.mrb[48].mxu0 %vm9089_vm9, %v5652_v13  ;;  %6576 = vmatprep.mubr.msk.bf16.mxu1 %vm8264_vm13, %v8301_v42  ;;  %vm9092_vm13 = vnez %v9037_v32  ;;  %v5664_v42 = vpack.c.bf16 %v3686_v19, %v3685_v7  ;;  %v4000_v32 = vld [vmem:[#allocation2 + $0x40] sm:$0xff]  ;;  %v4021_v13 = vld [vmem:[#allocation2 + $0xe8] sm:$0xff] }
 0x2c0   : > { %6472 = vmatprep.mubr.msk.bf16.mxu0 %vm9090_vm0, %v5655_v29  ;;  %v4030_v20 = vpack.c.bf16 %v4000_v32, %v3999_v47  ;;  %v4041_v29 = vpack.c.bf16 %v4022_v18, %v4021_v13 }
 0x2c6   : > { %6577 = vmatmul.mubr.msk.bf16.gmra.mrb[88].mxu1 %vm8283_vm3, %v5766_v53  ;;  %vm9095_vm3 = vnez %v9043_v22  ;;  %v4032_v22 = vpack.c.bf16 %v4004_v55, %v4003_v16  ;;  %v4025_v53 = vld [vmem:[#allocation2 + $0x108] sm:$0xff] }
 0x2c7   : > { %6473 = vmatmul.mubr.msk.bf16.gmra.mrb[52].mxu0 %vm9091_vm1, %v5658_v37  ;;  %v4043_v6 = vpack.c.bf16 %v4026_v8, %v4025_v53 }
 0x2c8   : > { %6476 = vmatprep.mubr.msk.bf16.mxu0 %vm9092_vm13, %v5661_v63 }
 0x2cf   : > { %6477 = vmatmul.mubr.msk.bf16.gmra.mrb[56].mxu0 %vm9093_vm11, %v5664_v42 }
 0x2d0   : > { %6480 = vmatprep.mubr.msk.bf16.mxu0 %vm9094_vm15, %v5667_v3 }
 0x2d7   : > { %6481 = vmatmul.mubr.msk.bf16.gmra.mrb[60].mxu0 %vm9095_vm3, %v5670_v1 }
 0x2d8   : > { %6500 = vmatprep.mubr.bf16.mxu0 %v4029_v35  ;;  %v7008_v35 = vld [vmem:[%s8865_s10] sm:$0xff]  }
 0x2d9   : > { %6580 = vmatprep.subr.bf16.mxu1 %v7008_v35 }
 0x2da   : > { %6581 = vmatpush3.bf16.msra.mxu1 %v7008_v35 }
 0x2db   : > { %6582 = vmatprep.subr.bf16.mxu1 %v7009_v31 }
 0x2de   : > { %6583 = vmatpush3.bf16.msra.mxu1 %v7009_v31 }
 0x2df   : > { %6501 = vmatmul.mubr.bf16.vlgmr.msra.gmra.mrb[32].mxu0 %v4030_v20 }
 0x2e0   : > { %6533 = vmatpush3.bf16.msra.mxu0 %v7967_v10  ;;  %6504 = vmatprep.mubr.bf16.mxu0 %v4031_v27  ;;  %v4008_v10 = vld [vmem:[#allocation2 + $0x80] sm:$0xff] }
 0x2e1   : > { %6534 = vmatprep.subr.bf16.mxu0 %v8035_v48  ;;  %v4034_v58 = vpack.c.bf16 %v4008_v10, %v4007_v60  ;;  %v7011_v60 = vld [vmem:[%s8865_s10 + $0x18] sm:$0xff]  }
 0x2e4   : > { %6535 = vmatpush3.bf16.msra.mxu0 %v8035_v48  ;;  %v4035_v48 = vpack.c.bf16 %v4010_v11, %v4009_v38 }
 0x2e5   : > { %6536 = vmatprep.subr.bf16.mxu0 %v8052_v21 }
 0x2e7   : > { %6505 = vmatmul.mubr.bf16.gmra.mrb[36].mxu0 %v4032_v22  ;;  %v7010_v22 = vld [vmem:[%s8865_s10 + $0x10] sm:$0xff]  }
 0x2e8   : > { %6508 = vmatprep.mubr.bf16.mxu0 %v4033_v46  ;;  %6537 = vmatpush3.bf16.msra.mxu0 %v8052_v21  ;;  %v4014_v21 = vld [vmem:[#allocation2 + $0xb0] sm:$0xff] }
 0x2e9   : > { %6538 = vmatprep.subr.bf16.mxu0 %v8079_v50  ;;  %6584 = vmatprep.subr.bf16.mxu1 %v7010_v22 }
 0x2ea   : > { %6585 = vmatpush3.bf16.msra.mxu1 %v7010_v22 }
 0x2eb   : > { %6586 = vmatprep.subr.bf16.mxu1 %v7011_v60 }
 0x2ec   : > { %6539 = vmatpush3.bf16.msra.mxu0 %v8079_v50  ;;  %v4037_v50 = vpack.c.bf16 %v4014_v21, %v4013_v2  ;;  %v7013_v2 = vld [vmem:[%s8865_s10 + $0x28] sm:$0xff]  }
 0x2ed   : > { %6540 = vmatprep.subr.bf16.mxu0 %v8101_v54 }
 0x2ee   : > { %6587 = vmatpush3.bf16.msra.mxu1 %v7011_v60 }
 0x2ef   : > { %6509 = vmatmul.mubr.bf16.gmra.mrb[40].mxu0 %v4034_v58  ;;  %6588 = vmatprep.subr.bf16.mxu1 %v7012_v5 }
 0x2f0   : > { %6512 = vmatprep.mubr.bf16.mxu0 %v4035_v48  ;;  %6541 = vmatpush3.bf16.msra.mxu0 %v8101_v54  ;;  %v4018_v54 = vld [vmem:[#allocation2 + $0xd0] sm:$0xff] }
 0x2f1   : > { %6542 = vmatprep.subr.bf16.mxu0 %v8128_v49  ;;  %v4039_v25 = vpack.c.bf16 %v4018_v54, %v4017_v28  ;;  %v7014_v28 = vld [vmem:[%s8865_s10 + $0x30] sm:$0xff]  }
 0x2f2   : > { %6589 = vmatpush3.bf16.msra.mxu1 %v7012_v5 }
 0x2f3   : > { %6590 = vmatprep.subr.bf16.mxu1 %v7013_v2 }
 0x2f4   : > { %6543 = vmatpush3.bf16.msra.mxu0 %v8128_v49  ;;  %v4020_v49 = vld [vmem:[#allocation2 + $0xe0] sm:$0xff] }
 0x2f5   : > { %6544 = vmatprep.subr.bf16.mxu0 %v8149_v33  ;;  %v4040_v24 = vpack.c.bf16 %v4020_v49, %v4019_v15  ;;  %v7015_v15 = vld [vmem:[%s8865_s10 + $0x38] sm:$0xff]  }
 0x2f6   : > { %6591 = vmatpush3.bf16.msra.mxu1 %v7013_v2 }
 0x2f7   : > { %6513 = vmatmul.mubr.bf16.gmra.mrb[44].mxu0 %v4036_v45  ;;  %6592 = vmatprep.subr.bf16.mxu1 %v7014_v28 }
 0x2f8   : > { %6516 = vmatprep.mubr.bf16.mxu0 %v4037_v50  ;;  %6545 = vmatpush3.bf16.msra.mxu0 %v8149_v33  ;;  %v4024_v33 = vld [vmem:[#allocation2 + $0x100] sm:$0xff] }
 0x2f9   : > { %6546 = vmatprep.subr.bf16.mxu0 %v8176_v12  ;;  %v4042_v62 = vpack.c.bf16 %v4024_v33, %v4023_v23 }
 0x2fa   : > { %6593 = vmatpush3.bf16.msra.mxu1 %v7014_v28 }
 0x2fb   : > { %6594 = vmatprep.subr.bf16.mxu1 %v7015_v15 }
 0x2fc   : > { %6547 = vmatpush3.bf16.msra.mxu0 %v8176_v12  ;;  %v7016_v12 = vld [vmem:[#allocation2 + $0x8] sm:$0xff] }
 0x2fd   : > { %v4044_v14 = vpack.c.bf16 %v7016_v12, %v7016_v12 }
 0x2fe   : > { %6595 = vmatpush3.bf16.msra.mxu1 %v7015_v15 }
 0x2ff   : > { %6517 = vmatmul.mubr.bf16.gmra.mrb[48].mxu0 %v4038_v9 }
 0x300   : > { %6520 = vmatprep.mubr.bf16.mxu0 %v4039_v25 }
 0x307   : > { %6521 = vmatmul.mubr.bf16.gmra.mrb[52].mxu0 %v4040_v24 }
 0x308   : > { %6524 = vmatprep.mubr.bf16.mxu0 %v4041_v29 }
 0x30f   : > { %6525 = vmatmul.mubr.bf16.gmra.mrb[56].mxu0 %v4042_v62 }
 0x310   : > { %6528 = vmatprep.mubr.bf16.mxu0 %v4043_v6 }
 0x317   : > { %6529 = vmatmul.mubr.bf16.gmra.mrb[60].mxu0 %v4044_v14 }
 0x318   : > { %6548 = vmatprep.mubr.msk.bf16.mxu0 %vm9096_vm4, %v8030_v41 }
 0x31f   : > { %6549 = vmatmul.mubr.msk.bf16.vlgmr.msra.gmra.mrb[32].mxu0 %vm9097_vm5, %v8059_v44 }
 0x329   : > { %v8419_v56 = vpop.f32.mrb[32].mxu1 }
 0x32a   : > { %9098 = vst [vmem:[#allocation35_spill] sm:$0xff] %v8419_v56  ;;  %v8421_v37 = vpop.f32.mrb[33].mxu1 }
 0x32b   : > { %9099 = vst [vmem:[#allocation36_spill] sm:$0xff] %v8421_v37  ;;  %v8423_v63 = vpop.f32.mrb[34].mxu1 }
 0x32c   : > { %9100 = vst [vmem:[#allocation37_spill] sm:$0xff] %v8423_v63  ;;  %v8425_v19 = vpop.f32.mrb[35].mxu1 }
 0x32d   : > { %9101 = vst [vmem:[#allocation38_spill] sm:$0xff] %v8425_v19 }
 0x331   : > { %v8427_v26 = vpop.f32.mrb[36].mxu1 }
 0x332   : > { %v8429_v40 = vpop.f32.mrb[37].mxu1 }
 0x333   : > { %v8431_v7 = vpop.f32.mrb[38].mxu1 }
 0x334   : > { %v8433_v36 = vpop.f32.mrb[39].mxu1 }
 0x339   : > { %v8435_v41 = vpop.f32.mrb[40].mxu1 }
 0x33a   : > { %v8437_v34 = vpop.f32.mrb[41].mxu1 }
 0x33b   : > { %v8439_v44 = vpop.f32.mrb[42].mxu1 }
 0x33c   : > { %v8441_v42 = vpop.f32.mrb[43].mxu1 }
 0x341   : > { %v8443_v3 = vpop.f32.mrb[44].mxu1 }
 0x342   : > { %v8445_v57 = vpop.f32.mrb[45].mxu1 }
 0x343   : > { %v8447_v17 = vpop.f32.mrb[46].mxu1 }
 0x344   : > { %v8449_v4 = vpop.f32.mrb[47].mxu1 }
 0x349   : > { %v8451_v1 = vpop.f32.mrb[48].mxu1 }
 0x34a   : > { %v8453_v30 = vpop.f32.mrb[49].mxu1 }
 0x34b   : > { %v8458_v32 = vpop.f32.mrb[50].mxu1 }
 0x34c   : > { %v8460_v51 = vpop.f32.mrb[51].mxu1 }
 0x351   : > { %v8462_v47 = vpop.f32.mrb[52].mxu1 }
 0x352   : > { %v8464_v20 = vpop.f32.mrb[53].mxu1 }
 0x353   : > { %v8469_v27 = vpop.f32.mrb[54].mxu1 }
 0x354   : > { %v8471_v55 = vpop.f32.mrb[55].mxu1 }
 0x359   : > { %v8473_v59 = vpop.f32.mrb[56].mxu1 }
 0x35a   : > { %v8475_v16 = vpop.f32.mrb[57].mxu1 }
 0x35b   : > { %v8480_v0 = vpop.f32.mrb[58].mxu1 }
 0x35c   : > { %v8482_v46 = vpop.f32.mrb[59].mxu1 }
 0x361   : > { %v8484_v10 = vpop.f32.mrb[60].mxu1 }
 0x362   : > { %v8486_v11 = vpop.f32.mrb[61].mxu1 }
 0x363   : > { %v8491_v58 = vpop.f32.mrb[62].mxu1 }
 0x364   : > { %9102 = vst [vmem:[#allocation39_spill] sm:$0xff] %v8491_v58  ;;  %v8493_v38 = vpop.f32.mrb[63].mxu1 }
 0x365   : > { %9103 = vst [vmem:[#allocation40_spill] sm:$0xff] %v8493_v38 }
 0x369   : > { %v6554_v48 = vpop.f32.mrb[64].mxu1 }
 0x36a   : > { %v4498_v21 = vpop.f32.mrb[65].mxu1 }
 0x36b   : > { %v6555_v61 = vpop.f32.mrb[66].mxu1 }
 0x36c   : > { %v4501_v45 = vpop.f32.mrb[67].mxu1 }
 0x371   : > { %v6558_v50 = vpop.f32.mrb[68].mxu1 }
 0x372   : > { %v4514_v39 = vpop.f32.mrb[69].mxu1 }
 0x373   : > { %v8501_v54 = vpop.f32.mrb[70].mxu1 }
 0x374   : > { %v8503_v52 = vpop.f32.mrb[71].mxu1 }
 0x379   : > { %v8505_v9 = vpop.f32.mrb[72].mxu1 }
 0x37a   : > { %v8510_v25 = vpop.f32.mrb[73].mxu1 }
 0x37b   : > { %v8512_v49 = vpop.f32.mrb[74].mxu1 }
 0x37c   : > { %v8514_v18 = vpop.f32.mrb[75].mxu1 }
 0x381   : > { %v8519_v24 = vpop.f32.mrb[76].mxu1 }
 0x382   : > { %v8521_v13 = vpop.f32.mrb[77].mxu1 }
 0x383   : > { %v8523_v29 = vpop.f32.mrb[78].mxu1 }
 0x384   : > { %v8525_v33 = vpop.f32.mrb[79].mxu1 }
 0x389   : > { %v8527_v8 = vpop.f32.mrb[80].mxu1 }
 0x38a   : > { %v8529_v23 = vpop.f32.mrb[81].mxu1 }
 0x38b   : > { %v8531_v62 = vpop.f32.mrb[82].mxu1 }
 0x38c   : > { %v8533_v53 = vpop.f32.mrb[83].mxu1 }
 0x391   : > { %v8535_v6 = vpop.f32.mrb[84].mxu1 }
 0x392   : > { %v8537_v12 = vpop.f32.mrb[85].mxu1 }
 0x393   : > { %v8539_v14 = vpop.f32.mrb[86].mxu1 }
 0x394   : > { %v8541_v35 = vpop.f32.mrb[87].mxu1 }
 0x399   : > { %v8543_v31 = vpop.f32.mrb[88].mxu1 }
 0x39a   : > { %9104 = vst [vmem:[#allocation41_spill] sm:$0xff] %v8543_v31  ;;  %v8545_v22 = vpop.f32.mrb[89].mxu1 }
 0x39b   : > { %9105 = vst [vmem:[#allocation42_spill] sm:$0xff] %v8545_v22  ;;  %v8547_v60 = vpop.f32.mrb[90].mxu1 }
 0x39c   : > { %9106 = vst [vmem:[#allocation43_spill] sm:$0xff] %v8547_v60  ;;  %v8549_v5 = vpop.f32.mrb[91].mxu1 }
 0x39d   : > { %9107 = vst [vmem:[#allocation44_spill] sm:$0xff] %v8549_v5 }
 0x3ba   : > { %v6506_v2 = vpop.f32.mrb[36].mxu0 }
 0x3bb   : > { %v6648_v28 = vadd.f32 %v6506_v2, %v8427_v26  ;;  %v4160_v15 = vpop.f32.mrb[37].mxu0  ;;  %v8563_v26 = vld [vmem:[%s8864_s9] ss:$0 sm:$0xff] }
 0x3bc   : > { %v6650_v19 = vadd.f32 %v4160_v15, %v8429_v40  ;;  %v6507_v63 = vpop.f32.mrb[38].mxu0 }
 0x3bd   : > { %v6649_v37 = vadd.f32 %v6648_v28, %v6554_v48  ;;  %v6652_v56 = vadd.f32 %v6507_v63, %v8431_v7  ;;  %v4163_v22 = vpop.f32.mrb[39].mxu0 }
 0x3be   : > { %v6651_v38 = vadd.f32 %v6650_v19, %v4498_v21  ;;  %v6654_v60 = vadd.f32 %v4163_v22, %v8433_v36 }
 0x3bf   : > { %v4654_v2 = vmul.f32 %v6649_v37, %v8555_v43  ;;  %v6653_v5 = vadd.f32 %v6652_v56, %v6555_v61 }
 0x3c0   : > { %v4652_v31 = vmul.f32 %v6651_v38, %v8555_v43  ;;  %v6655_v58 = vadd.f32 %v6654_v60, %v4501_v45 }
 0x3c1   : > { %v4655_v40 = vmul.f32 %v6653_v5, %v8555_v43  ;;  %v4693_v48 = vadd.f32 %v8563_v26, %v4654_v2 }
 0x3c2   : > { %v4653_v63 = vmul.f32 %v6655_v58, %v8555_v43  ;;  %v6510_v19 = vpop.f32.mrb[40].mxu0  ;;  %v4691_v7 = vadd.f32 %v8563_v26, %v4652_v31 }
 0x3c3   : > { %v6656_v36 = vadd.f32 %v6510_v19, %v8435_v41  ;;  %v4176_v21 = vpop.f32.mrb[41].mxu0  ;;  %v4694_v22 = vadd.f32 %v8563_v26, %v4655_v40  ;;  %v4725_v5 = vmax.f32 %v4693_v48, 0.0 }
 0x3c4   : > { %v6658_v37 = vadd.f32 %v4176_v21, %v8437_v34  ;;  %v6511_v56 = vpop.f32.mrb[42].mxu0  ;;  %v4692_v38 = vadd.f32 %v8563_v26, %v4653_v63  ;;  %v4723_v31 = vmax.f32 %v4691_v7, 0.0 }
 0x3c5   : > { %v6657_v61 = vadd.f32 %v6656_v36, %v6558_v50  ;;  %v6660_v45 = vadd.f32 %v6511_v56, %v8439_v44  ;;  %v4179_v60 = vpop.f32.mrb[43].mxu0  ;;  %v4726_v28 = vmax.f32 %v4694_v22, 0.0 }
 0x3c6   : > { %v6659_v58 = vadd.f32 %v6658_v37, %v4514_v39  ;;  %v6662_v15 = vadd.f32 %v4179_v60, %v8441_v42  ;;  %v4724_v2 = vmax.f32 %v4692_v38, 0.0 }
 0x3c7   : > { %v4658_v41 = vmul.f32 %v6657_v61, %v8555_v43  ;;  %v6661_v40 = vadd.f32 %v6660_v45, %v8501_v54  ;;  %v8579_v19 = vpack.c.bf16 %v4726_v28, %v4725_v5 }
 0x3c8   : > { %v4656_v34 = vmul.f32 %v6659_v58, %v8555_v43  ;;  %v6663_v50 = vadd.f32 %v6662_v15, %v8503_v52  ;;  %v8583_v63 = vpack.c.bf16 %v4724_v2, %v4723_v31 }
 0x3c9   : > { %v4659_v44 = vmul.f32 %v6661_v40, %v8555_v43  ;;  %v4697_v39 = vadd.f32 %v8563_v26, %v4658_v41 }
 0x3ca   : > { %v4657_v42 = vmul.f32 %v6663_v50, %v8555_v43  ;;  %v6514_v48 = vpop.f32.mrb[44].mxu0  ;;  %v4695_v7 = vadd.f32 %v8563_v26, %v4656_v34 }
 0x3cb   : > { %v6664_v36 = vadd.f32 %v6514_v48, %v8443_v3  ;;  %v4192_v54 = vpop.f32.mrb[45].mxu0  ;;  %v4698_v21 = vadd.f32 %v8563_v26, %v4659_v44  ;;  %v4729_v45 = vmax.f32 %v4697_v39, 0.0 }
 0x3cc   : > { %v6666_v22 = vadd.f32 %v4192_v54, %v8445_v57  ;;  %v6515_v37 = vpop.f32.mrb[46].mxu0  ;;  %v4696_v52 = vadd.f32 %v8563_v26, %v4657_v42  ;;  %v4727_v3 = vmax.f32 %v4695_v7, 0.0 }
 0x3cd   : > { %v6665_v56 = vadd.f32 %v6664_v36, %v8505_v9  ;;  %v6668_v38 = vadd.f32 %v6515_v37, %v8447_v17  ;;  %v4195_v61 = vpop.f32.mrb[47].mxu0  ;;  %v4730_v60 = vmax.f32 %v4698_v21, 0.0 }
 0x3ce   : > { %v6667_v5 = vadd.f32 %v6666_v22, %v8510_v25  ;;  %v6670_v28 = vadd.f32 %v4195_v61, %v8449_v4  ;;  %v4728_v58 = vmax.f32 %v4696_v52, 0.0 }
 0x3cf   : > { %v4662_v15 = vmul.f32 %v6665_v56, %v8555_v43  ;;  %v6669_v57 = vadd.f32 %v6668_v38, %v8512_v49  ;;  %v8599_v31 = vpack.c.bf16 %v4730_v60, %v4729_v45 }
 0x3d0   : > { %v4660_v2 = vmul.f32 %v6667_v5, %v8555_v43  ;;  %v6671_v9 = vadd.f32 %v6670_v28, %v8514_v18  ;;  %v8603_v17 = vpack.c.bf16 %v4728_v58, %v4727_v3 }
 0x3d1   : > { %v4663_v41 = vmul.f32 %v6669_v57, %v8555_v43  ;;  %v4701_v25 = vadd.f32 %v8563_v26, %v4662_v15 }
 0x3d2   : > { %v4661_v4 = vmul.f32 %v6671_v9, %v8555_v43  ;;  %v6518_v40 = vpop.f32.mrb[48].mxu0  ;;  %v4699_v34 = vadd.f32 %v8563_v26, %v4660_v2 }
 0x3d3   : > { %v6672_v50 = vadd.f32 %v6518_v40, %v8451_v1  ;;  %v4208_v49 = vpop.f32.mrb[49].mxu0  ;;  %v4702_v44 = vadd.f32 %v8563_v26, %v4663_v41  ;;  %v4733_v54 = vmax.f32 %v4701_v25, 0.0 }
 0x3d4   : > { %v6674_v39 = vadd.f32 %v4208_v49, %v8453_v30  ;;  %v6519_v42 = vpop.f32.mrb[50].mxu0  ;;  %v4700_v18 = vadd.f32 %v8563_v26, %v4661_v4  ;;  %v4731_v1 = vmax.f32 %v4699_v34, 0.0 }
 0x3d5   : > { %v6673_v48 = vadd.f32 %v6672_v50, %v8519_v24  ;;  %v6676_v7 = vadd.f32 %v6519_v42, %v8458_v32  ;;  %v4211_v36 = vpop.f32.mrb[51].mxu0  ;;  %v4734_v21 = vmax.f32 %v4702_v44, 0.0 }
 0x3d6   : > { %v6675_v22 = vadd.f32 %v6674_v39, %v8521_v13  ;;  %v6678_v37 = vadd.f32 %v4211_v36, %v8460_v51  ;;  %v4732_v52 = vmax.f32 %v4700_v18, 0.0 }
 0x3d7   : > { %v4666_v56 = vmul.f32 %v6673_v48, %v8555_v43  ;;  %v6677_v30 = vadd.f32 %v6676_v7, %v8523_v29  ;;  %v8619_v38 = vpack.c.bf16 %v4734_v21, %v4733_v54 }
 0x3d8   : > { %v4664_v61 = vmul.f32 %v6675_v22, %v8555_v43  ;;  %v6679_v24 = vadd.f32 %v6678_v37, %v8525_v33  ;;  %v8623_v32 = vpack.c.bf16 %v4732_v52, %v4731_v1 }
 0x3d9   : > { %v4667_v45 = vmul.f32 %v6677_v30, %v8555_v43  ;;  %v4705_v13 = vadd.f32 %v8563_v26, %v4666_v56 }
 0x3da   : > { %v4665_v51 = vmul.f32 %v6679_v24, %v8555_v43  ;;  %v6522_v60 = vpop.f32.mrb[52].mxu0  ;;  %v4703_v5 = vadd.f32 %v8563_v26, %v4664_v61 }
 0x3db   : > { %v6680_v28 = vadd.f32 %v6522_v60, %v8462_v47  ;;  %v4224_v29 = vpop.f32.mrb[53].mxu0  ;;  %v4706_v3 = vadd.f32 %v8563_v26, %v4667_v45  ;;  %v4737_v41 = vmax.f32 %v4705_v13, 0.0 }
 0x3dc   : > { %v6682_v58 = vadd.f32 %v4224_v29, %v8464_v20  ;;  %v6523_v15 = vpop.f32.mrb[54].mxu0  ;;  %v4704_v33 = vadd.f32 %v8563_v26, %v4665_v51  ;;  %v4735_v47 = vmax.f32 %v4703_v5, 0.0 }
 0x3dd   : > { %v6681_v57 = vadd.f32 %v6680_v28, %v8527_v8  ;;  %v6684_v2 = vadd.f32 %v6523_v15, %v8469_v27  ;;  %v4227_v9 = vpop.f32.mrb[55].mxu0  ;;  %v4738_v25 = vmax.f32 %v4706_v3, 0.0  ;;  %v9108_v15 = vld [vmem:[#allocation39_spill] sm:$0xff] }
 0x3de   : > { %v6683_v4 = vadd.f32 %v6682_v58, %v8529_v23  ;;  %v6686_v40 = vadd.f32 %v4227_v9, %v8471_v55  ;;  %v4736_v34 = vmax.f32 %v4704_v33, 0.0 }
 0x3df   : > { %v4670_v50 = vmul.f32 %v6681_v57, %v8555_v43  ;;  %v6685_v20 = vadd.f32 %v6684_v2, %v8531_v62  ;;  %v8639_v49 = vpack.c.bf16 %v4738_v25, %v4737_v41  ;;  %v9109_v57 = vld [vmem:[#allocation41_spill] sm:$0xff] }
 0x3e0   : > { %v4668_v44 = vmul.f32 %v6683_v4, %v8555_v43  ;;  %v6687_v8 = vadd.f32 %v6686_v40, %v8533_v53  ;;  %v8643_v27 = vpack.c.bf16 %v4736_v34, %v4735_v47  ;;  %v9110_v4 = vld [vmem:[#allocation40_spill] sm:$0xff]  ;;  %v9111_v47 = vld [vmem:[#allocation42_spill] sm:$0xff] }
 0x3e1   : > { %v4671_v39 = vmul.f32 %v6685_v20, %v8555_v43  ;;  %v4709_v23 = vadd.f32 %v8563_v26, %v4670_v50 }
 0x3e2   : > { %v4669_v55 = vmul.f32 %v6687_v8, %v8555_v43  ;;  %v6526_v42 = vpop.f32.mrb[56].mxu0  ;;  %v4707_v18 = vadd.f32 %v8563_v26, %v4668_v44  ;;  %v9112_v44 = vld [vmem:[#allocation43_spill] sm:$0xff] }
 0x3e3   : > { %v6688_v48 = vadd.f32 %v6526_v42, %v8473_v59  ;;  %v4240_v62 = vpop.f32.mrb[57].mxu0  ;;  %v4710_v7 = vadd.f32 %v8563_v26, %v4671_v39  ;;  %v4741_v1 = vmax.f32 %v4709_v23, 0.0  ;;  %v9113_v23 = vld [vmem:[#allocation44_spill] sm:$0xff] }
 0x3e4   : > { %v6690_v36 = vadd.f32 %v4240_v62, %v8475_v16  ;;  %v6527_v54 = vpop.f32.mrb[58].mxu0  ;;  %v4708_v53 = vadd.f32 %v8563_v26, %v4669_v55  ;;  %v4739_v59 = vmax.f32 %v4707_v18, 0.0 }
 0x3e5   : > { %v6689_v21 = vadd.f32 %v6688_v48, %v8535_v6  ;;  %v6692_v22 = vadd.f32 %v6527_v54, %v8480_v0  ;;  %v4243_v37 = vpop.f32.mrb[59].mxu0  ;;  %v4742_v52 = vmax.f32 %v4710_v7, 0.0 }
 0x3e6   : > { %v6691_v56 = vadd.f32 %v6690_v36, %v8537_v12  ;;  %v6694_v30 = vadd.f32 %v4243_v37, %v8482_v46  ;;  %v4740_v61 = vmax.f32 %v4708_v53, 0.0  ;;  %v9114_v53 = vld [vmem:[#allocation35_spill] sm:$0xff] }
 0x3e7   : > { %v4674_v24 = vmul.f32 %v6689_v21, %v8555_v43  ;;  %v6693_v16 = vadd.f32 %v6692_v22, %v8539_v14  ;;  %v8659_v45 = vpack.c.bf16 %v4742_v52, %v4741_v1  ;;  %v9115_v1 = vld [vmem:[#allocation36_spill] sm:$0xff] }
 0x3e8   : > { %v4672_v13 = vmul.f32 %v6691_v56, %v8555_v43  ;;  %v6695_v6 = vadd.f32 %v6694_v30, %v8541_v35  ;;  %v8663_v0 = vpack.c.bf16 %v4740_v61, %v4739_v59 }
 0x3e9   : > { %v4675_v51 = vmul.f32 %v6693_v16, %v8555_v43  ;;  %v4713_v12 = vadd.f32 %v8563_v26, %v4674_v24  ;;  %v9116_v24 = vld [vmem:[#allocation37_spill] sm:$0xff] }
 0x3ea   : > { %v4673_v46 = vmul.f32 %v6695_v6, %v8555_v43  ;;  %v6530_v60 = vpop.f32.mrb[60].mxu0  ;;  %v4711_v5 = vadd.f32 %v8563_v26, %v4672_v13 }
 0x3eb   : > { %v6696_v28 = vadd.f32 %v6530_v60, %v8484_v10  ;;  %v4256_v14 = vpop.f32.mrb[61].mxu0  ;;  %v4714_v29 = vadd.f32 %v8563_v26, %v4675_v51  ;;  %v4745_v41 = vmax.f32 %v4713_v12, 0.0 }
 0x3ec   : > { %v6698_v3 = vadd.f32 %v4256_v14, %v8486_v11  ;;  %v6531_v58 = vpop.f32.mrb[62].mxu0  ;;  %v4712_v35 = vadd.f32 %v8563_v26, %v4673_v46  ;;  %v4743_v10 = vmax.f32 %v4711_v5, 0.0  ;;  %v9117_v46 = vld [vmem:[#allocation38_spill] sm:$0xff] }
 0x3ed   : > { %v6700_v33 = vadd.f32 %v6531_v58, %v9108_v15  ;;  %v6697_v2 = vadd.f32 %v6696_v28, %v9109_v57  ;;  %v4259_v9 = vpop.f32.mrb[63].mxu0  ;;  %v4746_v25 = vmax.f32 %v4714_v29, 0.0 }
 0x3ee   : > { %v6702_v40 = vadd.f32 %v4259_v9, %v9110_v4  ;;  %v6699_v34 = vadd.f32 %v6698_v3, %v9111_v47  ;;  %v4744_v50 = vmax.f32 %v4712_v35, 0.0 }
 0x3ef   : > { %v4678_v20 = vmul.f32 %v6697_v2, %v8555_v43  ;;  %v6701_v11 = vadd.f32 %v6700_v33, %v9112_v44  ;;  %v4764_v8 = vpack.c.bf16 %v4746_v25, %v4745_v41 }
 0x3f0   : > { %v4676_v39 = vmul.f32 %v6699_v34, %v8555_v43  ;;  %v6703_v55 = vadd.f32 %v6702_v40, %v9113_v23  ;;  %v4763_v42 = vpack.c.bf16 %v4744_v50, %v4743_v10  ;;  %v9118_v40 = vld [vmem:[#allocation3_spill] sm:$0xff]  ;;  %v9120_v50 = vld [vmem:[#allocation4_spill] sm:$0xff] }
 0x3f1   : > { %v4717_v18 = vadd.f32 %v8563_v26, %v4678_v20  ;;  %v4679_v48 = vmul.f32 %v6701_v11, %v8555_v43  ;;  %v9119_v47 = vmax.f32 %v9118_v40, 0.0  ;;  %v9121_v20 = vmax.f32 %v9120_v50, 0.0  ;;  %v9122_v11 = vld [vmem:[#allocation6_spill] sm:$0xff]  ;;  %v9134_v40 = vld [vmem:[#allocation11_spill] sm:$0xff]  ;;  %v9136_v50 = vld [vmem:[#allocation12_spill] sm:$0xff] }
 0x3f2   : > { %v4715_v62 = vadd.f32 %v8563_v26, %v4676_v39  ;;  %v4677_v7 = vmul.f32 %v6703_v55, %v8555_v43  ;;  %v6550_v36 = vpop.f32.mrb[32].mxu0  ;;  %v9124_v55 = vld [vmem:[#allocation5_spill] sm:$0xff] }
 0x3f3   : > { %v4718_v54 = vadd.f32 %v8563_v26, %v4679_v48  ;;  %v6644_v21 = vadd.f32 %v6550_v36, %v9114_v53  ;;  %v4482_v22 = vpop.f32.mrb[33].mxu0  ;;  %v4749_v30 = vmax.f32 %v4717_v18, 0.0 }
 0x3f4   : > { %v4716_v37 = vadd.f32 %v8563_v26, %v4677_v7  ;;  %v6645_v52 = vadd.f32 %v4482_v22, %v9115_v1  ;;  %v6551_v56 = vpop.f32.mrb[34].mxu0  ;;  %v4747_v6 = vmax.f32 %v4715_v62, 0.0 }
 0x3f5   : > { %v4750_v59 = vmax.f32 %v4718_v54, 0.0  ;;  %v4650_v61 = vmul.f32 %v6644_v21, %v8555_v43  ;;  %v6646_v16 = vadd.f32 %v6551_v56, %v9116_v24  ;;  %v4485_v13 = vpop.f32.mrb[35].mxu0  ;;  %v9126_v24 = vld [vmem:[#allocation7_spill] sm:$0xff] }
 0x3f6   : > { %v4748_v51 = vmax.f32 %v4716_v37, 0.0  ;;  %v4648_v12 = vmul.f32 %v6645_v52, %v8555_v43  ;;  %v6647_v60 = vadd.f32 %v4485_v13, %v9117_v46 }
 0x3f7   : > { %v4689_v5 = vadd.f32 %v8563_v26, %v4650_v61  ;;  %v4651_v28 = vmul.f32 %v6646_v16, %v8555_v43  ;;  %v4766_v14 = vpack.c.bf16 %v4750_v59, %v4749_v30  ;;  %v9127_v16 = vmax.f32 %v9126_v24, 0.0 }
 0x3f8   : > { %v4687_v29 = vadd.f32 %v8563_v26, %v4648_v12  ;;  %v4649_v3 = vmul.f32 %v6647_v60, %v8555_v43  ;;  %v4765_v58 = vpack.c.bf16 %v4748_v51, %v4747_v6  ;;  %v8712_v43 = vld [vmem:[%s8866_s11] ss:$0 sm:$0xff]  ;;  %v9128_v12 = vld [vmem:[#allocation8_spill] sm:$0xff] }
 0x3f9   : > { %v4690_v35 = vadd.f32 %v8563_v26, %v4651_v28  ;;  %v4721_v33 = vmax.f32 %v4689_v5, 0.0  ;;  %v9129_v46 = vmax.f32 %v9128_v12, 0.0 }
 0x3fa   : > { %v4688_v15 = vadd.f32 %v8563_v26, %v4649_v3  ;;  %v4719_v2 = vmax.f32 %v4687_v29, 0.0 }
 0x3fb   : > { %v4722_v57 = vmax.f32 %v4690_v35, 0.0 }
 0x3fc   : > { %v4720_v9 = vmax.f32 %v4688_v15, 0.0 }
 0x3fd   : > { %v4752_v41 = vpack.c.bf16 %v4722_v57, %v4721_v33  ;;  %v9132_v57 = vld [vmem:[#allocation9_spill] sm:$0xff] }
 0x3fe   : > { %v4751_v25 = vpack.c.bf16 %v4720_v9, %v4719_v2  ;;  %v9133_v2 = vmax.f32 %v9132_v57, 0.0 }
 0x400   : > { %6596 = vmatprep.mubr.bf16.mxu1 %v4751_v25 }
 0x401   : > { %6597 = vmatmul.mubr.bf16.vlgmr.msra.gmra.mrb[92].mxu1 %v4752_v41 }
 0x402   : > { %6600 = vmatprep.mubr.bf16.mxu1 %v8583_v63 }
 0x409   : > { %6601 = vmatmul.mubr.bf16.gmra.mrb[96].mxu1 %v8579_v19  ;;  %v8717_v19 = vld [vmem:[%s8867_s12] ss:$0 sm:$0xff] }
 0x40a   : > { %6604 = vmatprep.mubr.bf16.mxu1 %v8603_v17 }
 0x411   : > { %6605 = vmatmul.mubr.bf16.gmra.mrb[100].mxu1 %v8599_v31 }
 0x412   : > { %6608 = vmatprep.mubr.bf16.mxu1 %v8623_v32 }
 0x419   : > { %6609 = vmatmul.mubr.bf16.gmra.mrb[104].mxu1 %v8619_v38 }
 0x41a   : > { %6612 = vmatprep.mubr.bf16.mxu1 %v8643_v27 }
 0x421   : > { %6613 = vmatmul.mubr.bf16.gmra.mrb[108].mxu1 %v8639_v49 }
 0x422   : > { %6616 = vmatprep.mubr.bf16.mxu1 %v8663_v0 }
 0x429   : > { %6617 = vmatmul.mubr.bf16.gmra.mrb[112].mxu1 %v8659_v45 }
 0x42a   : > { %6620 = vmatprep.mubr.bf16.mxu1 %v4763_v42  ;;  %v9125_v42 = vmax.f32 %v9124_v55, 0.0 }
 0x431   : > { %6621 = vmatmul.mubr.bf16.gmra.mrb[116].mxu1 %v4764_v8  ;;  %v9123_v8 = vmax.f32 %v9122_v11, 0.0 }
 0x432   : > { %6624 = vmatprep.mubr.bf16.mxu1 %v4765_v58 }
 0x439   : > { %6625 = vmatmul.mubr.bf16.gmra.mrb[120].mxu1 %v4766_v14  ;;  %v9130_v14 = vld [vmem:[#allocation10_spill] sm:$0xff] }
 0x43a   : > { %v9131_v29 = vmax.f32 %v9130_v14, 0.0 }
 0x4d4   : > { %v6598_v26 = vpop.f32.mrb[92].mxu1 }
 0x4d5   : > { %v5001_v63 = vmul.f32 %v6598_v26, %v8712_v43  ;;  %v4865_v31 = vpop.f32.mrb[93].mxu1 }
 0x4d6   : > { %v4999_v17 = vmul.f32 %v8712_v43, %v4865_v31  ;;  %v6599_v38 = vpop.f32.mrb[94].mxu1 }
 0x4d7   : > { %v5040_v32 = vadd.f32 %v8717_v19, %v5001_v63  ;;  %v5002_v49 = vmul.f32 %v6599_v38, %v8712_v43  ;;  %v4868_v27 = vpop.f32.mrb[95].mxu1 }
 0x4d8   : > { %v5038_v45 = vadd.f32 %v8717_v19, %v4999_v17  ;;  %v5000_v0 = vmul.f32 %v8712_v43, %v4868_v27 }
 0x4d9   : > { %v5041_v4 = vadd.f32 %v8717_v19, %v5002_v49  ;;  %v5072_v44 = vadd.f32 %v5040_v32, %v9121_v20  ;;  %v9137_v20 = vmax.f32 %v9136_v50, 0.0 }
 0x4da   : > { %v5070_v34 = vadd.f32 %v5038_v45, %v9119_v47  ;;  %v5039_v10 = vadd.f32 %v8717_v19, %v5000_v0  ;;  %v9135_v47 = vmax.f32 %v9134_v40, 0.0 }
 0x4db   : > { %v5073_v18 = vadd.f32 %v5041_v4, %v9125_v42  ;;  %v5104_v21 = vmax.f32 %v5072_v44, 0.0 }
 0x4dc   : > { %v5071_v39 = vadd.f32 %v5039_v10, %v9123_v8  ;;  %v6602_v23 = vpop.f32.mrb[96].mxu1  ;;  %v5102_v7 = vmax.f32 %v5070_v34, 0.0 }
 0x4dd   : > { %v5005_v48 = vmul.f32 %v6602_v23, %v8712_v43  ;;  %v4881_v62 = vpop.f32.mrb[97].mxu1  ;;  %v5105_v59 = vmax.f32 %v5073_v18, 0.0  ;;  %v9140_v18 = vld [vmem:[#allocation13_spill] sm:$0xff] }
 0x4de   : > { %v5103_v36 = vmax.f32 %v5071_v39, 0.0  ;;  %v5003_v54 = vmul.f32 %v8712_v43, %v4881_v62  ;;  %v6603_v53 = vpop.f32.mrb[98].mxu1  ;;  %v9138_v39 = vld [vmem:[#allocation14_spill] sm:$0xff] }
 0x4df   : > { %v5006_v22 = vmul.f32 %v6603_v53, %v8712_v43  ;;  %v4884_v37 = vpop.f32.mrb[99].mxu1  ;;  %v5044_v52 = vadd.f32 %v8717_v19, %v5005_v48  ;;  %v9139_v23 = vmax.f32 %v9138_v39, 0.0  ;;  %v9141_v48 = vmax.f32 %v9140_v18, 0.0 }
 0x4e0   : > { %v5134_v1 = vadd.f32 %v5103_v36, %v5102_v7  ;;  %v5042_v56 = vadd.f32 %v8717_v19, %v5003_v54  ;;  %v5004_v30 = vmul.f32 %v8712_v43, %v4884_v37 }
 0x4e1   : > { %v5045_v6 = vadd.f32 %v8717_v19, %v5006_v22  ;;  %v5076_v60 = vadd.f32 %v5044_v52, %v9129_v46 }
 0x4e2   : > { %v5135_v61 = vadd.f32 %v5134_v1, %v5104_v21  ;;  %v5074_v13 = vadd.f32 %v5042_v56, %v9127_v16  ;;  %v5043_v51 = vadd.f32 %v8717_v19, %v5004_v30 }
 0x4e3   : > { %v5077_v9 = vadd.f32 %v5045_v6, %v9133_v2  ;;  %v5108_v38 = vmax.f32 %v5076_v60, 0.0  ;;  %v9144_v60 = vld [vmem:[#allocation16_spill] sm:$0xff] }
 0x4e4   : > { %v5106_v5 = vmax.f32 %v5074_v13, 0.0  ;;  %v5136_v28 = vadd.f32 %v5135_v61, %v5105_v59  ;;  %v5075_v3 = vadd.f32 %v5043_v51, %v9131_v29  ;;  %v6606_v58 = vpop.f32.mrb[100].mxu1  ;;  %v9142_v13 = vld [vmem:[#allocation15_spill] sm:$0xff] }
 0x4e5   : > { %v5009_v35 = vmul.f32 %v6606_v58, %v8712_v43  ;;  %v4897_v15 = vpop.f32.mrb[101].mxu1  ;;  %v5109_v0 = vmax.f32 %v5077_v9, 0.0  ;;  %v9143_v6 = vmax.f32 %v9142_v13, 0.0  ;;  %v9148_v9 = vld [vmem:[#allocation17_spill] sm:$0xff] }
 0x4e6   : > { %v5137_v33 = vadd.f32 %v5136_v28, %v5106_v5  ;;  %v5107_v41 = vmax.f32 %v5075_v3, 0.0  ;;  %v5007_v25 = vmul.f32 %v8712_v43, %v4897_v15  ;;  %v6607_v26 = vpop.f32.mrb[102].mxu1  ;;  %v9145_v5 = vmax.f32 %v9144_v60, 0.0  ;;  %v9146_v3 = vld [vmem:[#allocation18_spill] sm:$0xff] }
 0x4e7   : > { %v5048_v63 = vadd.f32 %v8717_v19, %v5009_v35  ;;  %v5010_v31 = vmul.f32 %v6607_v26, %v8712_v43  ;;  %v4900_v17 = vpop.f32.mrb[103].mxu1  ;;  %v9147_v58 = vmax.f32 %v9146_v3, 0.0 }
 0x4e8   : > { %v5138_v32 = vadd.f32 %v5137_v33, %v5107_v41  ;;  %v5046_v49 = vadd.f32 %v8717_v19, %v5007_v25  ;;  %v5008_v27 = vmul.f32 %v8712_v43, %v4900_v17  ;;  %v9149_v41 = vmax.f32 %v9148_v9, 0.0 }
 0x4e9   : > { %v5049_v45 = vadd.f32 %v8717_v19, %v5010_v31  ;;  %v5080_v44 = vadd.f32 %v5048_v63, %v9137_v20 }
 0x4ea   : > { %v5139_v4 = vadd.f32 %v5138_v32, %v5108_v38  ;;  %v5078_v34 = vadd.f32 %v5046_v49, %v9135_v47  ;;  %v5047_v10 = vadd.f32 %v8717_v19, %v5008_v27 }
 0x4eb   : > { %v5081_v62 = vadd.f32 %v5049_v45, %v9141_v48  ;;  %v5112_v37 = vmax.f32 %v5080_v44, 0.0  ;;  %v9152_v44 = vld [vmem:[#allocation20_spill] sm:$0xff] }
 0x4ec   : > { %v5110_v11 = vmax.f32 %v5078_v34, 0.0  ;;  %v5140_v8 = vadd.f32 %v5139_v4, %v5109_v0  ;;  %v5079_v55 = vadd.f32 %v5047_v10, %v9139_v23  ;;  %v6610_v42 = vpop.f32.mrb[104].mxu1  ;;  %v9150_v34 = vld [vmem:[#allocation19_spill] sm:$0xff] }
 0x4ed   : > { %v5013_v7 = vmul.f32 %v6610_v42, %v8712_v43  ;;  %v4913_v36 = vpop.f32.mrb[105].mxu1  ;;  %v5113_v24 = vmax.f32 %v5081_v62, 0.0  ;;  %v9151_v10 = vmax.f32 %v9150_v34, 0.0  ;;  %v9156_v62 = vld [vmem:[#allocation21_spill] sm:$0xff] }
 0x4ee   : > { %v5141_v54 = vadd.f32 %v5140_v8, %v5110_v11  ;;  %v5111_v53 = vmax.f32 %v5079_v55, 0.0  ;;  %v5011_v21 = vmul.f32 %v8712_v43, %v4913_v36  ;;  %v6611_v22 = vpop.f32.mrb[106].mxu1  ;;  %v9153_v11 = vmax.f32 %v9152_v44, 0.0  ;;  %v9154_v55 = vld [vmem:[#allocation22_spill] sm:$0xff] }
 0x4ef   : > { %v5014_v1 = vmul.f32 %v6611_v22, %v8712_v43  ;;  %v4916_v52 = vpop.f32.mrb[107].mxu1  ;;  %v5052_v30 = vadd.f32 %v8717_v19, %v5013_v7  ;;  %v9155_v42 = vmax.f32 %v9154_v55, 0.0  ;;  %v9157_v7 = vmax.f32 %v9156_v62, 0.0 }
 0x4f0   : > { %v5142_v56 = vadd.f32 %v5141_v54, %v5111_v53  ;;  %v5050_v59 = vadd.f32 %v8717_v19, %v5011_v21  ;;  %v5012_v61 = vmul.f32 %v8712_v43, %v4916_v52 }
 0x4f1   : > { %v5053_v12 = vadd.f32 %v8717_v19, %v5014_v1  ;;  %v5084_v28 = vadd.f32 %v5052_v30, %v9145_v5 }
 0x4f2   : > { %v5143_v16 = vadd.f32 %v5142_v56, %v5112_v37  ;;  %v5082_v51 = vadd.f32 %v5050_v59, %v9143_v6  ;;  %v5051_v46 = vadd.f32 %v8717_v19, %v5012_v61 }
 0x4f3   : > { %v5085_v25 = vadd.f32 %v5053_v12, %v9149_v41  ;;  %v5116_v49 = vmax.f32 %v5084_v28, 0.0  ;;  %v9160_v28 = vld [vmem:[#allocation24_spill] sm:$0xff] }
 0x4f4   : > { %v5114_v14 = vmax.f32 %v5082_v51, 0.0  ;;  %v5144_v29 = vadd.f32 %v5143_v16, %v5113_v24  ;;  %v5083_v35 = vadd.f32 %v5051_v46, %v9147_v58  ;;  %v6614_v15 = vpop.f32.mrb[108].mxu1  ;;  %v9158_v51 = vld [vmem:[#allocation23_spill] sm:$0xff] }
 0x4f5   : > { %v5017_v33 = vmul.f32 %v6614_v15, %v8712_v43  ;;  %v4929_v57 = vpop.f32.mrb[109].mxu1  ;;  %v5117_v40 = vmax.f32 %v5085_v25, 0.0  ;;  %v9159_v12 = vmax.f32 %v9158_v51, 0.0  ;;  %v9164_v25 = vld [vmem:[#allocation25_spill] sm:$0xff] }
 0x4f6   : > { %v5145_v2 = vadd.f32 %v5144_v29, %v5114_v14  ;;  %v5115_v26 = vmax.f32 %v5083_v35, 0.0  ;;  %v5015_v63 = vmul.f32 %v8712_v43, %v4929_v57  ;;  %v6615_v31 = vpop.f32.mrb[110].mxu1  ;;  %v9161_v14 = vmax.f32 %v9160_v28, 0.0  ;;  %v9162_v35 = vld [vmem:[#allocation26_spill] sm:$0xff] }
 0x4f7   : > { %v5056_v17 = vadd.f32 %v8717_v19, %v5017_v33  ;;  %v5018_v38 = vmul.f32 %v6615_v31, %v8712_v43  ;;  %v4932_v32 = vpop.f32.mrb[111].mxu1  ;;  %v9163_v15 = vmax.f32 %v9162_v35, 0.0 }
 0x4f8   : > { %v5146_v27 = vadd.f32 %v5145_v2, %v5115_v26  ;;  %v5054_v45 = vadd.f32 %v8717_v19, %v5015_v63  ;;  %v5016_v0 = vmul.f32 %v8712_v43, %v4932_v32  ;;  %v9165_v26 = vmax.f32 %v9164_v25, 0.0 }
 0x4f9   : > { %v5057_v4 = vadd.f32 %v8717_v19, %v5018_v38  ;;  %v5088_v8 = vadd.f32 %v5056_v17, %v9153_v11 }
 0x4fa   : > { %v5147_v47 = vadd.f32 %v5146_v27, %v5116_v49  ;;  %v5086_v50 = vadd.f32 %v5054_v45, %v9151_v10  ;;  %v5055_v20 = vadd.f32 %v8717_v19, %v5016_v0 }
 0x4fb   : > { %v5089_v36 = vadd.f32 %v5057_v4, %v9157_v7  ;;  %v5120_v52 = vmax.f32 %v5088_v8, 0.0  ;;  %v9168_v8 = vld [vmem:[#allocation28_spill] sm:$0xff] }
 0x4fc   : > { %v5118_v39 = vmax.f32 %v5086_v50, 0.0  ;;  %v5148_v23 = vadd.f32 %v5147_v47, %v5117_v40  ;;  %v5087_v18 = vadd.f32 %v5055_v20, %v9155_v42  ;;  %v6618_v48 = vpop.f32.mrb[112].mxu1  ;;  %v9166_v50 = vld [vmem:[#allocation27_spill] sm:$0xff] }
 0x4fd   : > { %v5021_v54 = vmul.f32 %v6618_v48, %v8712_v43  ;;  %v4945_v53 = vpop.f32.mrb[113].mxu1  ;;  %v5121_v13 = vmax.f32 %v5089_v36, 0.0  ;;  %v9167_v20 = vmax.f32 %v9166_v50, 0.0  ;;  %v9172_v36 = vld [vmem:[#allocation29_spill] sm:$0xff] }
 0x4fe   : > { %v5149_v21 = vadd.f32 %v5148_v23, %v5118_v39  ;;  %v5119_v22 = vmax.f32 %v5087_v18, 0.0  ;;  %v5019_v37 = vmul.f32 %v8712_v43, %v4945_v53  ;;  %v6619_v1 = vpop.f32.mrb[114].mxu1  ;;  %v9169_v39 = vmax.f32 %v9168_v8, 0.0  ;;  %v9170_v18 = vld [vmem:[#allocation30_spill] sm:$0xff] }
 0x4ff   : > { %v5022_v56 = vmul.f32 %v6619_v1, %v8712_v43  ;;  %v4948_v30 = vpop.f32.mrb[115].mxu1  ;;  %v5060_v61 = vadd.f32 %v8717_v19, %v5021_v54  ;;  %v9171_v48 = vmax.f32 %v9170_v18, 0.0  ;;  %v9173_v54 = vmax.f32 %v9172_v36, 0.0 }
 0x500   : > { %v5150_v59 = vadd.f32 %v5149_v21, %v5119_v22  ;;  %v5058_v24 = vadd.f32 %v8717_v19, %v5019_v37  ;;  %v5020_v16 = vmul.f32 %v8712_v43, %v4948_v30 }
 0x501   : > { %v5061_v60 = vadd.f32 %v8717_v19, %v5022_v56  ;;  %v5092_v29 = vadd.f32 %v5060_v61, %v9161_v14 }
 0x502   : > { %v5151_v6 = vadd.f32 %v5150_v59, %v5120_v52  ;;  %v5090_v46 = vadd.f32 %v5058_v24, %v9159_v12  ;;  %v5059_v5 = vadd.f32 %v8717_v19, %v5020_v16 }
 0x503   : > { %v5093_v63 = vadd.f32 %v5061_v60, %v9165_v26  ;;  %v5124_v45 = vmax.f32 %v5092_v29, 0.0  ;;  %v9176_v29 = vld [vmem:[#allocation32_spill] sm:$0xff] }
 0x504   : > { %v5122_v3 = vmax.f32 %v5090_v46, 0.0  ;;  %v5152_v58 = vadd.f32 %v5151_v6, %v5121_v13  ;;  %v5091_v33 = vadd.f32 %v5059_v5, %v9163_v15  ;;  %v6622_v57 = vpop.f32.mrb[116].mxu1  ;;  %v9174_v46 = vld [vmem:[#allocation31_spill] sm:$0xff] }
 0x505   : > { %v5025_v2 = vmul.f32 %v6622_v57, %v8712_v43  ;;  %v4961_v9 = vpop.f32.mrb[117].mxu1  ;;  %v5125_v34 = vmax.f32 %v5093_v63, 0.0  ;;  %v9175_v60 = vmax.f32 %v9174_v46, 0.0 }
 0x506   : > { %v5153_v41 = vadd.f32 %v5152_v58, %v5122_v3  ;;  %v5123_v31 = vmax.f32 %v5091_v33, 0.0  ;;  %v5023_v17 = vmul.f32 %v8712_v43, %v4961_v9  ;;  %v6623_v38 = vpop.f32.mrb[118].mxu1  ;;  %v9177_v3 = vmax.f32 %v9176_v29, 0.0  ;;  %v9178_v33 = vld [vmem:[#allocation34_spill] sm:$0xff]  ;;  %v9180_v9 = vld [vmem:[#allocation33_spill] sm:$0xff] }
 0x507   : > { %v5064_v32 = vadd.f32 %v8717_v19, %v5025_v2  ;;  %v5026_v49 = vmul.f32 %v6623_v38, %v8712_v43  ;;  %v4964_v27 = vpop.f32.mrb[119].mxu1  ;;  %v9179_v57 = vmax.f32 %v9178_v33, 0.0 }
 0x508   : > { %v5154_v0 = vadd.f32 %v5153_v41, %v5123_v31  ;;  %v5062_v4 = vadd.f32 %v8717_v19, %v5023_v17  ;;  %v5024_v40 = vmul.f32 %v8712_v43, %v4964_v27  ;;  %v9181_v41 = vmax.f32 %v9180_v9, 0.0 }
 0x509   : > { %v5065_v47 = vadd.f32 %v8717_v19, %v5026_v49  ;;  %v5096_v23 = vadd.f32 %v5064_v32, %v9169_v39 }
 0x50a   : > { %v5155_v10 = vadd.f32 %v5154_v0, %v5124_v45  ;;  %v5094_v44 = vadd.f32 %v5062_v4, %v9167_v20  ;;  %v5063_v11 = vadd.f32 %v8717_v19, %v5024_v40 }
 0x50b   : > { %v5097_v53 = vadd.f32 %v5065_v47, %v9173_v54  ;;  %v5128_v30 = vmax.f32 %v5096_v23, 0.0 }
 0x50c   : > { %v5126_v55 = vmax.f32 %v5094_v44, 0.0  ;;  %v5156_v42 = vadd.f32 %v5155_v10, %v5125_v34  ;;  %v5095_v62 = vadd.f32 %v5063_v11, %v9171_v48  ;;  %v6626_v7 = vpop.f32.mrb[120].mxu1 }
 0x50d   : > { %v5029_v21 = vmul.f32 %v6626_v7, %v8712_v43  ;;  %v4977_v22 = vpop.f32.mrb[121].mxu1  ;;  %v5129_v51 = vmax.f32 %v5097_v53, 0.0 }
 0x50e   : > { %v5157_v37 = vadd.f32 %v5156_v42, %v5126_v55  ;;  %v5127_v1 = vmax.f32 %v5095_v62, 0.0  ;;  %v5027_v52 = vmul.f32 %v8712_v43, %v4977_v22  ;;  %v6627_v56 = vpop.f32.mrb[122].mxu1 }
 0x50f   : > { %v5030_v59 = vmul.f32 %v6627_v56, %v8712_v43  ;;  %v4980_v61 = vpop.f32.mrb[123].mxu1  ;;  %v5068_v16 = vadd.f32 %v8717_v19, %v5029_v21 }
 0x510   : > { %v5158_v24 = vadd.f32 %v5157_v37, %v5127_v1  ;;  %v5066_v13 = vadd.f32 %v8717_v19, %v5027_v52  ;;  %v5028_v6 = vmul.f32 %v8712_v43, %v4980_v61 }
 0x511   : > { %v5069_v28 = vadd.f32 %v8717_v19, %v5030_v59  ;;  %v5100_v58 = vadd.f32 %v5068_v16, %v9177_v3 }
 0x512   : > { %v5159_v12 = vadd.f32 %v5158_v24, %v5128_v30  ;;  %v5098_v5 = vadd.f32 %v5066_v13, %v9175_v60  ;;  %v5067_v14 = vadd.f32 %v8717_v19, %v5028_v6 }
 0x513   : > { %v5101_v25 = vadd.f32 %v5069_v28, %v9181_v41  ;;  %v5132_v63 = vmax.f32 %v5100_v58, 0.0 }
 0x514   : > { %v5130_v35 = vmax.f32 %v5098_v5, 0.0  ;;  %v5160_v15 = vadd.f32 %v5159_v12, %v5129_v51  ;;  %v5099_v2 = vadd.f32 %v5067_v14, %v9179_v57 }
 0x515   : > { %v5133_v17 = vmax.f32 %v5101_v25, 0.0 }
 0x516   : > { %v5161_v43 = vadd.f32 %v5160_v15, %v5130_v35  ;;  %v5131_v26 = vmax.f32 %v5099_v2, 0.0 }
 0x518   : > { %v5162_v31 = vadd.f32 %v5161_v43, %v5131_v26 }
 0x51a   : > { %v5163_v38 = vadd.f32 %v5162_v31, %v5132_v63 }
 0x51c   : > { %v5164_v32 = vadd.f32 %v5163_v38, %v5133_v17 }
 0x51e   : > { %v5165_v19 = vrot.slane %v5164_v32, 4 }
 0x520   : > { %v5166_v49 = vadd.f32 %v5165_v19, %v5164_v32 }
 0x522   : > { %v5167_v27 = vrot.slane %v5166_v49, 2 }
 0x524   : > { %v5168_v45 = vadd.f32 %v5167_v27, %v5166_v49 }
 0x526   : > { %v5169_v0 = vrot.slane %v5168_v45, 1 }
 0x528   : > { %v5170_v4 = vadd.f32 %v5169_v0, %v5168_v45 }
 0x52a   : > { %v5171_v40 = vmul.f32 0.00390625, %v5170_v4 }
 0x52c   : > { %5172 = vst [vmem:[%s440_s19] sm:$0xff] %v5171_v40 }
 0x52d PF: > { %s23_s25 = sadd.s32 1, %s7023_s25  }
 0x52e   : > { %p20_p5 = scmp.ge.s32.totalorder %s23_s25, 4  }
 0x530   :  { %22 = sbr.rel (!%p20_p5) target bundleno = 1 (0x1), region = 110 }

</bundles_post_ra>
